<compile_context>
chip_gen: v5e
topology: v5e:2x2
jax: 0.10.0
libtpu: 0.0.40
codegen_flags: <defaults>
</compile_context>

<pallas_src>
import math

import jax
import jax.numpy as jnp
from jax.experimental import pallas as pl
from jax.experimental.pallas import tpu as pltpu

NUM_HEADS = 8
NUM_LAYERS = 6
LN_EPS = 1e-12


def _gelu_tanh(x):
    c = 0.7978845608028654  # sqrt(2/pi)
    return 0.5 * x * (1.0 + jnp.tanh(c * (x + 0.044715 * x * x * x)))


def _layer_norm(x, gamma, beta):
    mu = jnp.mean(x, axis=-1, keepdims=True)
    xc = x - mu
    var = jnp.mean(xc * xc, axis=-1, keepdims=True)
    return xc * jax.lax.rsqrt(var + LN_EPS) * gamma + beta


def fused_bert_kernel(
    # layer-invariant inputs (resident across the layer grid)
    x_ref,          # (M, C)    input activations (consumed at layer 0 only)
    bias_ref,       # (M, M)    block-diagonal attention bias (0 / -1e30), f32
    hmask_ref,      # (H, 1, C) per-head 0/1 column masks, bf16
    # per-layer weights, stacked with a leading L axis (streamed by the grid)
    wq_ref, bq_ref, wk_ref, bk_ref, wv_ref, bv_ref,
    wao_ref, bao_ref, g1_ref, b1_ref,
    wi_ref, bi_ref, wo_ref, bo_ref, g2_ref, b2_ref,
    # output
    out_ref,        # (M, C)
    # scratch
    h_ref,          # VMEM (M, C) f32 : activation carry across layers
):
    layer = pl.program_id(0)

    @pl.when(layer == 0)
    def _():
        h_ref[...] = x_ref[...].astype(jnp.float32)

    h = h_ref[...]                                     # (M, C) f32
    m, c = h.shape
    head_dim = c // NUM_HEADS
    scale = 1.0 / math.sqrt(head_dim)

    h_bf = h.astype(jnp.bfloat16)
    hmask = hmask_ref[...]                             # (H, 1, C) bf16
    attn_bias = bias_ref[...]                          # (M, M) f32

    def dense(inp_bf, w_ref, b_ref):
        # bf16 x bf16 on the MXU, f32 accumulation, f32 bias add.
        return jnp.dot(inp_bf, w_ref[0],
                       preferred_element_type=jnp.float32) + b_ref[0]

    # ---- multi-head self-attention (plain 2-D MXU dots, masked head selection) ----
    q = dense(h_bf, wq_ref, bq_ref).astype(jnp.bfloat16)        # (M, C)
    kt = dense(h_bf, wk_ref, bk_ref).T.astype(jnp.bfloat16)     # (C, M)
    v = dense(h_bf, wv_ref, bv_ref).astype(jnp.bfloat16)        # (M, C)

    ctx = jnp.zeros((m, c), jnp.float32)
    for hh in range(NUM_HEADS):                                 # static unroll (8)
        q_h = q * hmask[hh]                                     # keep head hh's columns
        s = jnp.dot(q_h, kt, preferred_element_type=jnp.float32) * scale   # (M, M)
        s = s + attn_bias                                       # block cross-batch keys
        s = s - jnp.max(s, axis=-1, keepdims=True)              # stable softmax (f32)
        p = jnp.exp(s)
        p = p * pl.reciprocal(jnp.sum(p, axis=-1, keepdims=True), approx=True)
        v_h = v * hmask[hh]                                     # head hh's columns only
        ctx = ctx + jnp.dot(p.astype(jnp.bfloat16), v_h,
                            preferred_element_type=jnp.float32)  # disjoint cols -> sum

    # ---- attention output dense + residual + LayerNorm ----
    attn_out = dense(ctx.astype(jnp.bfloat16), wao_ref, bao_ref)
    h1 = _layer_norm(attn_out + h, g1_ref[0], b1_ref[0])

    # ---- feed-forward: GELU(intermediate) -> output dense + residual + LayerNorm ----
    inter = _gelu_tanh(dense(h1.astype(jnp.bfloat16), wi_ref, bi_ref))
    ffn = dense(inter.astype(jnp.bfloat16), wo_ref, bo_ref)
    out = _layer_norm(ffn + h1, g2_ref[0], b2_ref[0])

    h_ref[...] = out                                   # carry to the next layer
    out_ref[...] = out.astype(out_ref.dtype)           # resident output block


def _stacked_spec(arr):
    """BlockSpec for a (L, ...)-stacked per-layer parameter: one layer per grid step."""
    zeros = (0,) * (arr.ndim - 1)
    return pl.BlockSpec((1,) + arr.shape[1:], lambda l: (l,) + zeros)


def self_attention_forward(x, params):
    """Equivalent of SelfAttention.forward: 6 fused BertLayers, then token 0."""
    B, T, C = x.shape
    M = B * T
    H = NUM_HEADS
    L = params["wq"].shape[0]
    I = params["wi"].shape[-1]

    x2d = x.reshape(M, C)

    # Block-diagonal attention bias: token i attends only within its own batch element.
    bid = jnp.arange(M, dtype=jnp.int32) // T
    attn_bias = jnp.where(bid[:, None] == bid[None, :], 0.0, -1e30).astype(jnp.float32)

    # Per-head 0/1 column masks (exact in bf16).
    col_head = jnp.arange(C, dtype=jnp.int32) // (C // H)
    head_masks = (col_head[None, :] == jnp.arange(H, dtype=jnp.int32)[:, None])
    head_masks = head_masks.astype(jnp.bfloat16).reshape(H, 1, C)

    names = ["wq", "bq", "wk", "bk", "wv", "bv",
             "wao", "bao", "g1", "b1",
             "wi", "bi", "wo", "bo", "g2", "b2"]
    stacked = [params[n] for n in names]

    in_specs = (
        [pl.BlockSpec((M, C), lambda l: (0, 0)),
         pl.BlockSpec((M, M), lambda l: (0, 0)),
         pl.BlockSpec((H, 1, C), lambda l: (0, 0, 0))]
        + [_stacked_spec(a) for a in stacked]
    )
    out_spec = pl.BlockSpec((M, C), lambda l: (0, 0))

    flops = L * (2 * M * C * C * 4 + 2 * M * C * I * 2 + 4 * H * M * M * C)
    transcendentals = L * (H * M * M + M * I)
    bytes_accessed = (2 * x2d.nbytes + attn_bias.nbytes + head_masks.nbytes
                      + sum(a.nbytes for a in stacked))

    out2d = pl.pallas_call(
        fused_bert_kernel,
        out_shape=jax.ShapeDtypeStruct((M, C), x.dtype),
        grid_spec=pltpu.PrefetchScalarGridSpec(
            num_scalar_prefetch=0,
            grid=(L,),                                   # one grid step per BertLayer
            in_specs=in_specs,
            out_specs=out_spec,
            scratch_shapes=[pltpu.VMEM((M, C), jnp.float32)],
        ),
        compiler_params=pltpu.CompilerParams(
            dimension_semantics=("arbitrary",),          # layers are sequential
            vmem_limit_bytes=32 * 1024 * 1024,
        ),
        cost_estimate=pl.CostEstimate(
            flops=flops,
            transcendentals=transcendentals,
            bytes_accessed=bytes_accessed,
        ),
    )(x2d, attn_bias, head_masks, *stacked)

    return out2d.reshape(B, T, C)[:, 0]                  # (B, C)


def init_params(key, dim, intermediate, num_layers=NUM_LAYERS):
    """BERT-style init: normal(0, 0.02) weights (stored bf16), zero biases, unit LN."""
    std = 0.02
    zeros_c = jnp.zeros((1, dim), jnp.float32)
    ones_c = jnp.ones((1, dim), jnp.float32)
    zeros_i = jnp.zeros((1, intermediate), jnp.float32)

    def one_layer(k):
        ks = jax.random.split(k, 6)

        def w(kk, shp):
            return (jax.random.normal(kk, shp, jnp.float32) * std).astype(jnp.bfloat16)

        return dict(
            wq=w(ks[0], (dim, dim)), bq=zeros_c,
            wk=w(ks[1], (dim, dim)), bk=zeros_c,
            wv=w(ks[2], (dim, dim)), bv=zeros_c,
            wao=w(ks[3], (dim, dim)), bao=zeros_c,
            g1=ones_c, b1=zeros_c,
            wi=w(ks[4], (dim, intermediate)), bi=zeros_i,
            wo=w(ks[5], (intermediate, dim)), bo=zeros_c,
            g2=ones_c, b2=zeros_c,
        )

    layers = [one_layer(k) for k in jax.random.split(key, num_layers)]
    return {name: jnp.stack([lyr[name] for lyr in layers], axis=0) for name in layers[0]}


if __name__ == "__main__":
    B, T, DIM, INTERMEDIATE = 2, 8, 64, 2048

    key = jax.random.PRNGKey(0)
    x_key, p_key = jax.random.split(key)

    x = jax.random.normal(x_key, (B, T, DIM), jnp.float32)
    params = init_params(p_key, DIM, INTERMEDIATE)

    out = jax.block_until_ready(self_attention_forward(x, params))
    assert out.shape == (B, DIM), out.shape
    print("KERNEL_OK")
</pallas_src>

<mosaic_0001>
module attributes {stable_mosaic.version = 11 : i64} {
  func.func @fused_bert_kernel(%arg0: i32, %arg1: memref<16x64xf32, #tpu.memory_space<vmem>>, %arg2: memref<16x16xf32, #tpu.memory_space<vmem>>, %arg3: memref<8x1x64xbf16, #tpu.memory_space<vmem>>, %arg4: memref<1x64x64xbf16, #tpu.memory_space<vmem>>, %arg5: memref<1x1x64xf32, #tpu.memory_space<vmem>>, %arg6: memref<1x64x64xbf16, #tpu.memory_space<vmem>>, %arg7: memref<1x1x64xf32, #tpu.memory_space<vmem>>, %arg8: memref<1x64x64xbf16, #tpu.memory_space<vmem>>, %arg9: memref<1x1x64xf32, #tpu.memory_space<vmem>>, %arg10: memref<1x64x64xbf16, #tpu.memory_space<vmem>>, %arg11: memref<1x1x64xf32, #tpu.memory_space<vmem>>, %arg12: memref<1x1x64xf32, #tpu.memory_space<vmem>>, %arg13: memref<1x1x64xf32, #tpu.memory_space<vmem>>, %arg14: memref<1x64x2048xbf16, #tpu.memory_space<vmem>>, %arg15: memref<1x1x2048xf32, #tpu.memory_space<vmem>>, %arg16: memref<1x2048x64xbf16, #tpu.memory_space<vmem>>, %arg17: memref<1x1x64xf32, #tpu.memory_space<vmem>>, %arg18: memref<1x1x64xf32, #tpu.memory_space<vmem>>, %arg19: memref<1x1x64xf32, #tpu.memory_space<vmem>>, %arg20: memref<16x64xf32, #tpu.memory_space<vmem>>, %arg21: memref<16x64xf32, #tpu.memory_space<vmem>>) attributes {dimension_semantics = [#tpu.dimension_semantics<arbitrary>], iteration_bounds = array<i64: 6>, scalar_prefetch = 0 : i64, scratch_operands = 1 : i64, tpu.core_type = #tpu.core_type<tc>, window_params = [{pipeline_mode = #tpu.pipeline_mode<synchronous>, transform_indices = @transform_0, window_bounds = array<i64: 16, 64>}, {pipeline_mode = #tpu.pipeline_mode<synchronous>, transform_indices = @transform_1, window_bounds = array<i64: 16, 16>}, {pipeline_mode = #tpu.pipeline_mode<synchronous>, transform_indices = @transform_2, window_bounds = array<i64: 8, 1, 64>}, {transform_indices = @transform_3, window_bounds = array<i64: 1, 64, 64>}, {transform_indices = @transform_4, window_bounds = array<i64: 1, 1, 64>}, {transform_indices = @transform_5, window_bounds = array<i64: 1, 64, 64>}, {transform_indices = @transform_6, window_bounds = array<i64: 1, 1, 64>}, {transform_indices = @transform_7, window_bounds = array<i64: 1, 64, 64>}, {transform_indices = @transform_8, window_bounds = array<i64: 1, 1, 64>}, {transform_indices = @transform_9, window_bounds = array<i64: 1, 64, 64>}, {transform_indices = @transform_10, window_bounds = array<i64: 1, 1, 64>}, {transform_indices = @transform_11, window_bounds = array<i64: 1, 1, 64>}, {transform_indices = @transform_12, window_bounds = array<i64: 1, 1, 64>}, {transform_indices = @transform_13, window_bounds = array<i64: 1, 64, 2048>}, {transform_indices = @transform_14, window_bounds = array<i64: 1, 1, 2048>}, {transform_indices = @transform_15, window_bounds = array<i64: 1, 2048, 64>}, {transform_indices = @transform_16, window_bounds = array<i64: 1, 1, 64>}, {transform_indices = @transform_17, window_bounds = array<i64: 1, 1, 64>}, {transform_indices = @transform_18, window_bounds = array<i64: 1, 1, 64>}, {pipeline_mode = #tpu.pipeline_mode<synchronous>, transform_indices = @transform_19, window_bounds = array<i64: 16, 64>}]} {
    %c0_i32 = arith.constant 0 : i32
    %0 = arith.cmpi eq, %arg0, %c0_i32 : i32
    %1 = arith.extui %0 : i1 to i32
    %c0_i32_0 = arith.constant 0 : i32
    %2 = arith.cmpi ne, %1, %c0_i32_0 : i32
    scf.if %2 {
      %c0_119 = arith.constant 0 : index
      %c0_120 = arith.constant 0 : index
      %322 = vector.load %arg1[%c0_119, %c0_120] : memref<16x64xf32, #tpu.memory_space<vmem>>, vector<16x64xf32>
      %c0_121 = arith.constant 0 : index
      %c0_122 = arith.constant 0 : index
      %323 = vector.load %arg21[%c0_121, %c0_122] : memref<16x64xf32, #tpu.memory_space<vmem>>, vector<16x64xf32>
      tpu.vector_store %arg21[%c0_121, %c0_122], %322 {strides = array<i32>} : memref<16x64xf32, #tpu.memory_space<vmem>>, vector<16x64xf32>,
    } else {
    }
    %c0 = arith.constant 0 : index
    %c0_1 = arith.constant 0 : index
    %3 = vector.load %arg21[%c0, %c0_1] : memref<16x64xf32, #tpu.memory_space<vmem>>, vector<16x64xf32>
    %4 = arith.truncf %3 : vector<16x64xf32> to vector<16x64xbf16>
    %c0_2 = arith.constant 0 : index
    %c0_3 = arith.constant 0 : index
    %c0_4 = arith.constant 0 : index
    %5 = vector.load %arg3[%c0_2, %c0_3, %c0_4] : memref<8x1x64xbf16, #tpu.memory_space<vmem>>, vector<8x1x64xbf16>
    %c0_5 = arith.constant 0 : index
    %c0_6 = arith.constant 0 : index
    %6 = vector.load %arg2[%c0_5, %c0_6] : memref<16x16xf32, #tpu.memory_space<vmem>>, vector<16x16xf32>
    %c0_7 = arith.constant 0 : index
    %c0_8 = arith.constant 0 : index
    %c0_9 = arith.constant 0 : index
    %7 = vector.load %arg4[%c0_7, %c0_8, %c0_9] : memref<1x64x64xbf16, #tpu.memory_space<vmem>>, vector<1x64x64xbf16>
    %8 = vector.shape_cast %7 : vector<1x64x64xbf16> to vector<64x64xbf16>
    %cst = arith.constant dense<0.000000e+00> : vector<16x64xf32>
    %9 = tpu.matmul %4, %8, %cst {dimension_numbers = #tpu.dot_dimension_numbers<[1], [0], [0], [1], [0, 0, 1, 1], [], []>} : vector<16x64xbf16>, vector<64x64xbf16>, vector<16x64xf32> -> vector<16x64xf32>
    %c0_10 = arith.constant 0 : index
    %c0_11 = arith.constant 0 : index
    %c0_12 = arith.constant 0 : index
    %10 = vector.load %arg5[%c0_10, %c0_11, %c0_12] : memref<1x1x64xf32, #tpu.memory_space<vmem>>, vector<1x1x64xf32>
    %11 = vector.shape_cast %10 : vector<1x1x64xf32> to vector<1x64xf32>
    %12 = vector.broadcast %11 : vector<1x64xf32> to vector<16x64xf32>
    %13 = arith.addf %9, %12 : vector<16x64xf32>
    %14 = arith.truncf %13 : vector<16x64xf32> to vector<16x64xbf16>
    %c0_13 = arith.constant 0 : index
    %c0_14 = arith.constant 0 : index
    %c0_15 = arith.constant 0 : index
    %15 = vector.load %arg6[%c0_13, %c0_14, %c0_15] : memref<1x64x64xbf16, #tpu.memory_space<vmem>>, vector<1x64x64xbf16>
    %16 = vector.shape_cast %15 : vector<1x64x64xbf16> to vector<64x64xbf16>
    %cst_16 = arith.constant dense<0.000000e+00> : vector<16x64xf32>
    %17 = tpu.matmul %4, %16, %cst_16 {dimension_numbers = #tpu.dot_dimension_numbers<[1], [0], [0], [1], [0, 0, 1, 1], [], []>} : vector<16x64xbf16>, vector<64x64xbf16>, vector<16x64xf32> -> vector<16x64xf32>
    %c0_17 = arith.constant 0 : index
    %c0_18 = arith.constant 0 : index
    %c0_19 = arith.constant 0 : index
    %18 = vector.load %arg7[%c0_17, %c0_18, %c0_19] : memref<1x1x64xf32, #tpu.memory_space<vmem>>, vector<1x1x64xf32>
    %19 = vector.shape_cast %18 : vector<1x1x64xf32> to vector<1x64xf32>
    %20 = vector.broadcast %19 : vector<1x64xf32> to vector<16x64xf32>
    %21 = arith.addf %17, %20 : vector<16x64xf32>
    %22 = tpu.transpose %21, [1, 0] : vector<16x64xf32> -> vector<64x16xf32>
    %23 = arith.truncf %22 : vector<64x16xf32> to vector<64x16xbf16>
    %c0_20 = arith.constant 0 : index
    %c0_21 = arith.constant 0 : index
    %c0_22 = arith.constant 0 : index
    %24 = vector.load %arg8[%c0_20, %c0_21, %c0_22] : memref<1x64x64xbf16, #tpu.memory_space<vmem>>, vector<1x64x64xbf16>
    %25 = vector.shape_cast %24 : vector<1x64x64xbf16> to vector<64x64xbf16>
    %cst_23 = arith.constant dense<0.000000e+00> : vector<16x64xf32>
    %26 = tpu.matmul %4, %25, %cst_23 {dimension_numbers = #tpu.dot_dimension_numbers<[1], [0], [0], [1], [0, 0, 1, 1], [], []>} : vector<16x64xbf16>, vector<64x64xbf16>, vector<16x64xf32> -> vector<16x64xf32>
    %c0_24 = arith.constant 0 : index
    %c0_25 = arith.constant 0 : index
    %c0_26 = arith.constant 0 : index
    %27 = vector.load %arg9[%c0_24, %c0_25, %c0_26] : memref<1x1x64xf32, #tpu.memory_space<vmem>>, vector<1x1x64xf32>
    %28 = vector.shape_cast %27 : vector<1x1x64xf32> to vector<1x64xf32>
    %29 = vector.broadcast %28 : vector<1x64xf32> to vector<16x64xf32>
    %30 = arith.addf %26, %29 : vector<16x64xf32>
    %31 = arith.truncf %30 : vector<16x64xf32> to vector<16x64xbf16>
    %cst_27 = arith.constant 0.000000e+00 : f32
    %32 = vector.broadcast %cst_27 : f32 to vector<16x64xf32>
    %33 = vector.extract_strided_slice %5 {offsets = [0, 0, 0], sizes = [1, 1, 64], strides = [1, 1, 1]} : vector<8x1x64xbf16> to vector<1x1x64xbf16>
    %34 = vector.shape_cast %33 : vector<1x1x64xbf16> to vector<1x64xbf16>
    %35 = vector.broadcast %34 : vector<1x64xbf16> to vector<16x64xbf16>
    %36 = arith.mulf %14, %35 : vector<16x64xbf16>
    %cst_28 = arith.constant dense<0.000000e+00> : vector<16x16xf32>
    %37 = tpu.matmul %36, %23, %cst_28 {dimension_numbers = #tpu.dot_dimension_numbers<[1], [0], [0], [1], [0, 0, 1, 1], [], []>} : vector<16x64xbf16>, vector<64x16xbf16>, vector<16x16xf32> -> vector<16x16xf32>
    %cst_29 = arith.constant 0.353553385 : f32
    %38 = vector.broadcast %cst_29 : f32 to vector<16x16xf32>
    %39 = arith.mulf %37, %38 : vector<16x16xf32>
    %40 = arith.addf %39, %6 : vector<16x16xf32>
    %cst_30 = arith.constant dense<0xFF800000> : vector<16xf32>
    %41 = vector.multi_reduction <maximumf>, %40, %cst_30 [1] : vector<16x16xf32> to vector<16xf32>
    %42 = vector.shape_cast %41 : vector<16xf32> to vector<16x1xf32>
    %43 = vector.broadcast %42 : vector<16x1xf32> to vector<16x16xf32>
    %44 = arith.subf %40, %43 : vector<16x16xf32>
    %45 = math.exp %44 : vector<16x16xf32>
    %cst_31 = arith.constant dense<0.000000e+00> : vector<16xf32>
    %46 = vector.multi_reduction <add>, %45, %cst_31 [1] : vector<16x16xf32> to vector<16xf32>
    %47 = vector.shape_cast %46 : vector<16xf32> to vector<16x1xf32>
    %48 = tpu.reciprocal %47 {approx = true} : vector<16x1xf32> -> vector<16x1xf32>
    %49 = vector.broadcast %48 : vector<16x1xf32> to vector<16x16xf32>
    %50 = arith.mulf %45, %49 : vector<16x16xf32>
    %51 = vector.extract_strided_slice %5 {offsets = [0, 0, 0], sizes = [1, 1, 64], strides = [1, 1, 1]} : vector<8x1x64xbf16> to vector<1x1x64xbf16>
    %52 = vector.shape_cast %51 : vector<1x1x64xbf16> to vector<1x64xbf16>
    %53 = vector.broadcast %52 : vector<1x64xbf16> to vector<16x64xbf16>
    %54 = arith.mulf %31, %53 : vector<16x64xbf16>
    %55 = arith.truncf %50 : vector<16x16xf32> to vector<16x16xbf16>
    %cst_32 = arith.constant dense<0.000000e+00> : vector<16x64xf32>
    %56 = tpu.matmul %55, %54, %cst_32 {dimension_numbers = #tpu.dot_dimension_numbers<[1], [0], [0], [1], [0, 0, 1, 1], [], []>} : vector<16x16xbf16>, vector<16x64xbf16>, vector<16x64xf32> -> vector<16x64xf32>
    %57 = arith.addf %32, %56 : vector<16x64xf32>
    %58 = vector.extract_strided_slice %5 {offsets = [1, 0, 0], sizes = [1, 1, 64], strides = [1, 1, 1]} : vector<8x1x64xbf16> to vector<1x1x64xbf16>
    %59 = vector.shape_cast %58 : vector<1x1x64xbf16> to vector<1x64xbf16>
    %60 = vector.broadcast %59 : vector<1x64xbf16> to vector<16x64xbf16>
    %61 = arith.mulf %14, %60 : vector<16x64xbf16>
    %cst_33 = arith.constant dense<0.000000e+00> : vector<16x16xf32>
    %62 = tpu.matmul %61, %23, %cst_33 {dimension_numbers = #tpu.dot_dimension_numbers<[1], [0], [0], [1], [0, 0, 1, 1], [], []>} : vector<16x64xbf16>, vector<64x16xbf16>, vector<16x16xf32> -> vector<16x16xf32>
    %cst_34 = arith.constant 0.353553385 : f32
    %63 = vector.broadcast %cst_34 : f32 to vector<16x16xf32>
    %64 = arith.mulf %62, %63 : vector<16x16xf32>
    %65 = arith.addf %64, %6 : vector<16x16xf32>
    %cst_35 = arith.constant dense<0xFF800000> : vector<16xf32>
    %66 = vector.multi_reduction <maximumf>, %65, %cst_35 [1] : vector<16x16xf32> to vector<16xf32>
    %67 = vector.shape_cast %66 : vector<16xf32> to vector<16x1xf32>
    %68 = vector.broadcast %67 : vector<16x1xf32> to vector<16x16xf32>
    %69 = arith.subf %65, %68 : vector<16x16xf32>
    %70 = math.exp %69 : vector<16x16xf32>
    %cst_36 = arith.constant dense<0.000000e+00> : vector<16xf32>
    %71 = vector.multi_reduction <add>, %70, %cst_36 [1] : vector<16x16xf32> to vector<16xf32>
    %72 = vector.shape_cast %71 : vector<16xf32> to vector<16x1xf32>
    %73 = tpu.reciprocal %72 {approx = true} : vector<16x1xf32> -> vector<16x1xf32>
    %74 = vector.broadcast %73 : vector<16x1xf32> to vector<16x16xf32>
    %75 = arith.mulf %70, %74 : vector<16x16xf32>
    %76 = vector.extract_strided_slice %5 {offsets = [1, 0, 0], sizes = [1, 1, 64], strides = [1, 1, 1]} : vector<8x1x64xbf16> to vector<1x1x64xbf16>
    %77 = vector.shape_cast %76 : vector<1x1x64xbf16> to vector<1x64xbf16>
    %78 = vector.broadcast %77 : vector<1x64xbf16> to vector<16x64xbf16>
    %79 = arith.mulf %31, %78 : vector<16x64xbf16>
    %80 = arith.truncf %75 : vector<16x16xf32> to vector<16x16xbf16>
    %cst_37 = arith.constant dense<0.000000e+00> : vector<16x64xf32>
    %81 = tpu.matmul %80, %79, %cst_37 {dimension_numbers = #tpu.dot_dimension_numbers<[1], [0], [0], [1], [0, 0, 1, 1], [], []>} : vector<16x16xbf16>, vector<16x64xbf16>, vector<16x64xf32> -> vector<16x64xf32>
    %82 = arith.addf %57, %81 : vector<16x64xf32>
    %83 = vector.extract_strided_slice %5 {offsets = [2, 0, 0], sizes = [1, 1, 64], strides = [1, 1, 1]} : vector<8x1x64xbf16> to vector<1x1x64xbf16>
    %84 = vector.shape_cast %83 : vector<1x1x64xbf16> to vector<1x64xbf16>
    %85 = vector.broadcast %84 : vector<1x64xbf16> to vector<16x64xbf16>
    %86 = arith.mulf %14, %85 : vector<16x64xbf16>
    %cst_38 = arith.constant dense<0.000000e+00> : vector<16x16xf32>
    %87 = tpu.matmul %86, %23, %cst_38 {dimension_numbers = #tpu.dot_dimension_numbers<[1], [0], [0], [1], [0, 0, 1, 1], [], []>} : vector<16x64xbf16>, vector<64x16xbf16>, vector<16x16xf32> -> vector<16x16xf32>
    %cst_39 = arith.constant 0.353553385 : f32
    %88 = vector.broadcast %cst_39 : f32 to vector<16x16xf32>
    %89 = arith.mulf %87, %88 : vector<16x16xf32>
    %90 = arith.addf %89, %6 : vector<16x16xf32>
    %cst_40 = arith.constant dense<0xFF800000> : vector<16xf32>
    %91 = vector.multi_reduction <maximumf>, %90, %cst_40 [1] : vector<16x16xf32> to vector<16xf32>
    %92 = vector.shape_cast %91 : vector<16xf32> to vector<16x1xf32>
    %93 = vector.broadcast %92 : vector<16x1xf32> to vector<16x16xf32>
    %94 = arith.subf %90, %93 : vector<16x16xf32>
    %95 = math.exp %94 : vector<16x16xf32>
    %cst_41 = arith.constant dense<0.000000e+00> : vector<16xf32>
    %96 = vector.multi_reduction <add>, %95, %cst_41 [1] : vector<16x16xf32> to vector<16xf32>
    %97 = vector.shape_cast %96 : vector<16xf32> to vector<16x1xf32>
    %98 = tpu.reciprocal %97 {approx = true} : vector<16x1xf32> -> vector<16x1xf32>
    %99 = vector.broadcast %98 : vector<16x1xf32> to vector<16x16xf32>
    %100 = arith.mulf %95, %99 : vector<16x16xf32>
    %101 = vector.extract_strided_slice %5 {offsets = [2, 0, 0], sizes = [1, 1, 64], strides = [1, 1, 1]} : vector<8x1x64xbf16> to vector<1x1x64xbf16>
    %102 = vector.shape_cast %101 : vector<1x1x64xbf16> to vector<1x64xbf16>
    %103 = vector.broadcast %102 : vector<1x64xbf16> to vector<16x64xbf16>
    %104 = arith.mulf %31, %103 : vector<16x64xbf16>
    %105 = arith.truncf %100 : vector<16x16xf32> to vector<16x16xbf16>
    %cst_42 = arith.constant dense<0.000000e+00> : vector<16x64xf32>
    %106 = tpu.matmul %105, %104, %cst_42 {dimension_numbers = #tpu.dot_dimension_numbers<[1], [0], [0], [1], [0, 0, 1, 1], [], []>} : vector<16x16xbf16>, vector<16x64xbf16>, vector<16x64xf32> -> vector<16x64xf32>
    %107 = arith.addf %82, %106 : vector<16x64xf32>
    %108 = vector.extract_strided_slice %5 {offsets = [3, 0, 0], sizes = [1, 1, 64], strides = [1, 1, 1]} : vector<8x1x64xbf16> to vector<1x1x64xbf16>
    %109 = vector.shape_cast %108 : vector<1x1x64xbf16> to vector<1x64xbf16>
    %110 = vector.broadcast %109 : vector<1x64xbf16> to vector<16x64xbf16>
    %111 = arith.mulf %14, %110 : vector<16x64xbf16>
    %cst_43 = arith.constant dense<0.000000e+00> : vector<16x16xf32>
    %112 = tpu.matmul %111, %23, %cst_43 {dimension_numbers = #tpu.dot_dimension_numbers<[1], [0], [0], [1], [0, 0, 1, 1], [], []>} : vector<16x64xbf16>, vector<64x16xbf16>, vector<16x16xf32> -> vector<16x16xf32>
    %cst_44 = arith.constant 0.353553385 : f32
    %113 = vector.broadcast %cst_44 : f32 to vector<16x16xf32>
    %114 = arith.mulf %112, %113 : vector<16x16xf32>
    %115 = arith.addf %114, %6 : vector<16x16xf32>
    %cst_45 = arith.constant dense<0xFF800000> : vector<16xf32>
    %116 = vector.multi_reduction <maximumf>, %115, %cst_45 [1] : vector<16x16xf32> to vector<16xf32>
    %117 = vector.shape_cast %116 : vector<16xf32> to vector<16x1xf32>
    %118 = vector.broadcast %117 : vector<16x1xf32> to vector<16x16xf32>
    %119 = arith.subf %115, %118 : vector<16x16xf32>
    %120 = math.exp %119 : vector<16x16xf32>
    %cst_46 = arith.constant dense<0.000000e+00> : vector<16xf32>
    %121 = vector.multi_reduction <add>, %120, %cst_46 [1] : vector<16x16xf32> to vector<16xf32>
    %122 = vector.shape_cast %121 : vector<16xf32> to vector<16x1xf32>
    %123 = tpu.reciprocal %122 {approx = true} : vector<16x1xf32> -> vector<16x1xf32>
    %124 = vector.broadcast %123 : vector<16x1xf32> to vector<16x16xf32>
    %125 = arith.mulf %120, %124 : vector<16x16xf32>
    %126 = vector.extract_strided_slice %5 {offsets = [3, 0, 0], sizes = [1, 1, 64], strides = [1, 1, 1]} : vector<8x1x64xbf16> to vector<1x1x64xbf16>
    %127 = vector.shape_cast %126 : vector<1x1x64xbf16> to vector<1x64xbf16>
    %128 = vector.broadcast %127 : vector<1x64xbf16> to vector<16x64xbf16>
    %129 = arith.mulf %31, %128 : vector<16x64xbf16>
    %130 = arith.truncf %125 : vector<16x16xf32> to vector<16x16xbf16>
    %cst_47 = arith.constant dense<0.000000e+00> : vector<16x64xf32>
    %131 = tpu.matmul %130, %129, %cst_47 {dimension_numbers = #tpu.dot_dimension_numbers<[1], [0], [0], [1], [0, 0, 1, 1], [], []>} : vector<16x16xbf16>, vector<16x64xbf16>, vector<16x64xf32> -> vector<16x64xf32>
    %132 = arith.addf %107, %131 : vector<16x64xf32>
    %133 = vector.extract_strided_slice %5 {offsets = [4, 0, 0], sizes = [1, 1, 64], strides = [1, 1, 1]} : vector<8x1x64xbf16> to vector<1x1x64xbf16>
    %134 = vector.shape_cast %133 : vector<1x1x64xbf16> to vector<1x64xbf16>
    %135 = vector.broadcast %134 : vector<1x64xbf16> to vector<16x64xbf16>
    %136 = arith.mulf %14, %135 : vector<16x64xbf16>
    %cst_48 = arith.constant dense<0.000000e+00> : vector<16x16xf32>
    %137 = tpu.matmul %136, %23, %cst_48 {dimension_numbers = #tpu.dot_dimension_numbers<[1], [0], [0], [1], [0, 0, 1, 1], [], []>} : vector<16x64xbf16>, vector<64x16xbf16>, vector<16x16xf32> -> vector<16x16xf32>
    %cst_49 = arith.constant 0.353553385 : f32
    %138 = vector.broadcast %cst_49 : f32 to vector<16x16xf32>
    %139 = arith.mulf %137, %138 : vector<16x16xf32>
    %140 = arith.addf %139, %6 : vector<16x16xf32>
    %cst_50 = arith.constant dense<0xFF800000> : vector<16xf32>
    %141 = vector.multi_reduction <maximumf>, %140, %cst_50 [1] : vector<16x16xf32> to vector<16xf32>
    %142 = vector.shape_cast %141 : vector<16xf32> to vector<16x1xf32>
    %143 = vector.broadcast %142 : vector<16x1xf32> to vector<16x16xf32>
    %144 = arith.subf %140, %143 : vector<16x16xf32>
    %145 = math.exp %144 : vector<16x16xf32>
    %cst_51 = arith.constant dense<0.000000e+00> : vector<16xf32>
    %146 = vector.multi_reduction <add>, %145, %cst_51 [1] : vector<16x16xf32> to vector<16xf32>
    %147 = vector.shape_cast %146 : vector<16xf32> to vector<16x1xf32>
    %148 = tpu.reciprocal %147 {approx = true} : vector<16x1xf32> -> vector<16x1xf32>
    %149 = vector.broadcast %148 : vector<16x1xf32> to vector<16x16xf32>
    %150 = arith.mulf %145, %149 : vector<16x16xf32>
    %151 = vector.extract_strided_slice %5 {offsets = [4, 0, 0], sizes = [1, 1, 64], strides = [1, 1, 1]} : vector<8x1x64xbf16> to vector<1x1x64xbf16>
    %152 = vector.shape_cast %151 : vector<1x1x64xbf16> to vector<1x64xbf16>
    %153 = vector.broadcast %152 : vector<1x64xbf16> to vector<16x64xbf16>
    %154 = arith.mulf %31, %153 : vector<16x64xbf16>
    %155 = arith.truncf %150 : vector<16x16xf32> to vector<16x16xbf16>
    %cst_52 = arith.constant dense<0.000000e+00> : vector<16x64xf32>
    %156 = tpu.matmul %155, %154, %cst_52 {dimension_numbers = #tpu.dot_dimension_numbers<[1], [0], [0], [1], [0, 0, 1, 1], [], []>} : vector<16x16xbf16>, vector<16x64xbf16>, vector<16x64xf32> -> vector<16x64xf32>
    %157 = arith.addf %132, %156 : vector<16x64xf32>
    %158 = vector.extract_strided_slice %5 {offsets = [5, 0, 0], sizes = [1, 1, 64], strides = [1, 1, 1]} : vector<8x1x64xbf16> to vector<1x1x64xbf16>
    %159 = vector.shape_cast %158 : vector<1x1x64xbf16> to vector<1x64xbf16>
    %160 = vector.broadcast %159 : vector<1x64xbf16> to vector<16x64xbf16>
    %161 = arith.mulf %14, %160 : vector<16x64xbf16>
    %cst_53 = arith.constant dense<0.000000e+00> : vector<16x16xf32>
    %162 = tpu.matmul %161, %23, %cst_53 {dimension_numbers = #tpu.dot_dimension_numbers<[1], [0], [0], [1], [0, 0, 1, 1], [], []>} : vector<16x64xbf16>, vector<64x16xbf16>, vector<16x16xf32> -> vector<16x16xf32>
    %cst_54 = arith.constant 0.353553385 : f32
    %163 = vector.broadcast %cst_54 : f32 to vector<16x16xf32>
    %164 = arith.mulf %162, %163 : vector<16x16xf32>
    %165 = arith.addf %164, %6 : vector<16x16xf32>
    %cst_55 = arith.constant dense<0xFF800000> : vector<16xf32>
    %166 = vector.multi_reduction <maximumf>, %165, %cst_55 [1] : vector<16x16xf32> to vector<16xf32>
    %167 = vector.shape_cast %166 : vector<16xf32> to vector<16x1xf32>
    %168 = vector.broadcast %167 : vector<16x1xf32> to vector<16x16xf32>
    %169 = arith.subf %165, %168 : vector<16x16xf32>
    %170 = math.exp %169 : vector<16x16xf32>
    %cst_56 = arith.constant dense<0.000000e+00> : vector<16xf32>
    %171 = vector.multi_reduction <add>, %170, %cst_56 [1] : vector<16x16xf32> to vector<16xf32>
    %172 = vector.shape_cast %171 : vector<16xf32> to vector<16x1xf32>
    %173 = tpu.reciprocal %172 {approx = true} : vector<16x1xf32> -> vector<16x1xf32>
    %174 = vector.broadcast %173 : vector<16x1xf32> to vector<16x16xf32>
    %175 = arith.mulf %170, %174 : vector<16x16xf32>
    %176 = vector.extract_strided_slice %5 {offsets = [5, 0, 0], sizes = [1, 1, 64], strides = [1, 1, 1]} : vector<8x1x64xbf16> to vector<1x1x64xbf16>
    %177 = vector.shape_cast %176 : vector<1x1x64xbf16> to vector<1x64xbf16>
    %178 = vector.broadcast %177 : vector<1x64xbf16> to vector<16x64xbf16>
    %179 = arith.mulf %31, %178 : vector<16x64xbf16>
    %180 = arith.truncf %175 : vector<16x16xf32> to vector<16x16xbf16>
    %cst_57 = arith.constant dense<0.000000e+00> : vector<16x64xf32>
    %181 = tpu.matmul %180, %179, %cst_57 {dimension_numbers = #tpu.dot_dimension_numbers<[1], [0], [0], [1], [0, 0, 1, 1], [], []>} : vector<16x16xbf16>, vector<16x64xbf16>, vector<16x64xf32> -> vector<16x64xf32>
    %182 = arith.addf %157, %181 : vector<16x64xf32>
    %183 = vector.extract_strided_slice %5 {offsets = [6, 0, 0], sizes = [1, 1, 64], strides = [1, 1, 1]} : vector<8x1x64xbf16> to vector<1x1x64xbf16>
    %184 = vector.shape_cast %183 : vector<1x1x64xbf16> to vector<1x64xbf16>
    %185 = vector.broadcast %184 : vector<1x64xbf16> to vector<16x64xbf16>
    %186 = arith.mulf %14, %185 : vector<16x64xbf16>
    %cst_58 = arith.constant dense<0.000000e+00> : vector<16x16xf32>
    %187 = tpu.matmul %186, %23, %cst_58 {dimension_numbers = #tpu.dot_dimension_numbers<[1], [0], [0], [1], [0, 0, 1, 1], [], []>} : vector<16x64xbf16>, vector<64x16xbf16>, vector<16x16xf32> -> vector<16x16xf32>
    %cst_59 = arith.constant 0.353553385 : f32
    %188 = vector.broadcast %cst_59 : f32 to vector<16x16xf32>
    %189 = arith.mulf %187, %188 : vector<16x16xf32>
    %190 = arith.addf %189, %6 : vector<16x16xf32>
    %cst_60 = arith.constant dense<0xFF800000> : vector<16xf32>
    %191 = vector.multi_reduction <maximumf>, %190, %cst_60 [1] : vector<16x16xf32> to vector<16xf32>
    %192 = vector.shape_cast %191 : vector<16xf32> to vector<16x1xf32>
    %193 = vector.broadcast %192 : vector<16x1xf32> to vector<16x16xf32>
    %194 = arith.subf %190, %193 : vector<16x16xf32>
    %195 = math.exp %194 : vector<16x16xf32>
    %cst_61 = arith.constant dense<0.000000e+00> : vector<16xf32>
    %196 = vector.multi_reduction <add>, %195, %cst_61 [1] : vector<16x16xf32> to vector<16xf32>
    %197 = vector.shape_cast %196 : vector<16xf32> to vector<16x1xf32>
    %198 = tpu.reciprocal %197 {approx = true} : vector<16x1xf32> -> vector<16x1xf32>
    %199 = vector.broadcast %198 : vector<16x1xf32> to vector<16x16xf32>
    %200 = arith.mulf %195, %199 : vector<16x16xf32>
    %201 = vector.extract_strided_slice %5 {offsets = [6, 0, 0], sizes = [1, 1, 64], strides = [1, 1, 1]} : vector<8x1x64xbf16> to vector<1x1x64xbf16>
    %202 = vector.shape_cast %201 : vector<1x1x64xbf16> to vector<1x64xbf16>
    %203 = vector.broadcast %202 : vector<1x64xbf16> to vector<16x64xbf16>
    %204 = arith.mulf %31, %203 : vector<16x64xbf16>
    %205 = arith.truncf %200 : vector<16x16xf32> to vector<16x16xbf16>
    %cst_62 = arith.constant dense<0.000000e+00> : vector<16x64xf32>
    %206 = tpu.matmul %205, %204, %cst_62 {dimension_numbers = #tpu.dot_dimension_numbers<[1], [0], [0], [1], [0, 0, 1, 1], [], []>} : vector<16x16xbf16>, vector<16x64xbf16>, vector<16x64xf32> -> vector<16x64xf32>
    %207 = arith.addf %182, %206 : vector<16x64xf32>
    %208 = vector.extract_strided_slice %5 {offsets = [7, 0, 0], sizes = [1, 1, 64], strides = [1, 1, 1]} : vector<8x1x64xbf16> to vector<1x1x64xbf16>
    %209 = vector.shape_cast %208 : vector<1x1x64xbf16> to vector<1x64xbf16>
    %210 = vector.broadcast %209 : vector<1x64xbf16> to vector<16x64xbf16>
    %211 = arith.mulf %14, %210 : vector<16x64xbf16>
    %cst_63 = arith.constant dense<0.000000e+00> : vector<16x16xf32>
    %212 = tpu.matmul %211, %23, %cst_63 {dimension_numbers = #tpu.dot_dimension_numbers<[1], [0], [0], [1], [0, 0, 1, 1], [], []>} : vector<16x64xbf16>, vector<64x16xbf16>, vector<16x16xf32> -> vector<16x16xf32>
    %cst_64 = arith.constant 0.353553385 : f32
    %213 = vector.broadcast %cst_64 : f32 to vector<16x16xf32>
    %214 = arith.mulf %212, %213 : vector<16x16xf32>
    %215 = arith.addf %214, %6 : vector<16x16xf32>
    %cst_65 = arith.constant dense<0xFF800000> : vector<16xf32>
    %216 = vector.multi_reduction <maximumf>, %215, %cst_65 [1] : vector<16x16xf32> to vector<16xf32>
    %217 = vector.shape_cast %216 : vector<16xf32> to vector<16x1xf32>
    %218 = vector.broadcast %217 : vector<16x1xf32> to vector<16x16xf32>
    %219 = arith.subf %215, %218 : vector<16x16xf32>
    %220 = math.exp %219 : vector<16x16xf32>
    %cst_66 = arith.constant dense<0.000000e+00> : vector<16xf32>
    %221 = vector.multi_reduction <add>, %220, %cst_66 [1] : vector<16x16xf32> to vector<16xf32>
    %222 = vector.shape_cast %221 : vector<16xf32> to vector<16x1xf32>
    %223 = tpu.reciprocal %222 {approx = true} : vector<16x1xf32> -> vector<16x1xf32>
    %224 = vector.broadcast %223 : vector<16x1xf32> to vector<16x16xf32>
    %225 = arith.mulf %220, %224 : vector<16x16xf32>
    %226 = vector.extract_strided_slice %5 {offsets = [7, 0, 0], sizes = [1, 1, 64], strides = [1, 1, 1]} : vector<8x1x64xbf16> to vector<1x1x64xbf16>
    %227 = vector.shape_cast %226 : vector<1x1x64xbf16> to vector<1x64xbf16>
    %228 = vector.broadcast %227 : vector<1x64xbf16> to vector<16x64xbf16>
    %229 = arith.mulf %31, %228 : vector<16x64xbf16>
    %230 = arith.truncf %225 : vector<16x16xf32> to vector<16x16xbf16>
    %cst_67 = arith.constant dense<0.000000e+00> : vector<16x64xf32>
    %231 = tpu.matmul %230, %229, %cst_67 {dimension_numbers = #tpu.dot_dimension_numbers<[1], [0], [0], [1], [0, 0, 1, 1], [], []>} : vector<16x16xbf16>, vector<16x64xbf16>, vector<16x64xf32> -> vector<16x64xf32>
    %232 = arith.addf %207, %231 : vector<16x64xf32>
    %233 = arith.truncf %232 : vector<16x64xf32> to vector<16x64xbf16>
    %c0_68 = arith.constant 0 : index
    %c0_69 = arith.constant 0 : index
    %c0_70 = arith.constant 0 : index
    %234 = vector.load %arg10[%c0_68, %c0_69, %c0_70] : memref<1x64x64xbf16, #tpu.memory_space<vmem>>, vector<1x64x64xbf16>
    %235 = vector.shape_cast %234 : vector<1x64x64xbf16> to vector<64x64xbf16>
    %cst_71 = arith.constant dense<0.000000e+00> : vector<16x64xf32>
    %236 = tpu.matmul %233, %235, %cst_71 {dimension_numbers = #tpu.dot_dimension_numbers<[1], [0], [0], [1], [0, 0, 1, 1], [], []>} : vector<16x64xbf16>, vector<64x64xbf16>, vector<16x64xf32> -> vector<16x64xf32>
    %c0_72 = arith.constant 0 : index
    %c0_73 = arith.constant 0 : index
    %c0_74 = arith.constant 0 : index
    %237 = vector.load %arg11[%c0_72, %c0_73, %c0_74] : memref<1x1x64xf32, #tpu.memory_space<vmem>>, vector<1x1x64xf32>
    %238 = vector.shape_cast %237 : vector<1x1x64xf32> to vector<1x64xf32>
    %239 = vector.broadcast %238 : vector<1x64xf32> to vector<16x64xf32>
    %240 = arith.addf %236, %239 : vector<16x64xf32>
    %241 = arith.addf %240, %3 : vector<16x64xf32>
    %c0_75 = arith.constant 0 : index
    %c0_76 = arith.constant 0 : index
    %c0_77 = arith.constant 0 : index
    %242 = vector.load %arg12[%c0_75, %c0_76, %c0_77] : memref<1x1x64xf32, #tpu.memory_space<vmem>>, vector<1x1x64xf32>
    %243 = vector.shape_cast %242 : vector<1x1x64xf32> to vector<1x64xf32>
    %c0_78 = arith.constant 0 : index
    %c0_79 = arith.constant 0 : index
    %c0_80 = arith.constant 0 : index
    %244 = vector.load %arg13[%c0_78, %c0_79, %c0_80] : memref<1x1x64xf32, #tpu.memory_space<vmem>>, vector<1x1x64xf32>
    %245 = vector.shape_cast %244 : vector<1x1x64xf32> to vector<1x64xf32>
    %cst_81 = arith.constant dense<0.000000e+00> : vector<16xf32>
    %246 = vector.multi_reduction <add>, %241, %cst_81 [1] : vector<16x64xf32> to vector<16xf32>
    %247 = vector.shape_cast %246 : vector<16xf32> to vector<16x1xf32>
    %cst_82 = arith.constant 6.400000e+01 : f32
    %248 = vector.broadcast %cst_82 : f32 to vector<16x1xf32>
    %249 = arith.divf %247, %248 : vector<16x1xf32>
    %250 = vector.broadcast %249 : vector<16x1xf32> to vector<16x64xf32>
    %251 = arith.subf %241, %250 : vector<16x64xf32>
    %252 = arith.mulf %251, %251 : vector<16x64xf32>
    %cst_83 = arith.constant dense<0.000000e+00> : vector<16xf32>
    %253 = vector.multi_reduction <add>, %252, %cst_83 [1] : vector<16x64xf32> to vector<16xf32>
    %254 = vector.shape_cast %253 : vector<16xf32> to vector<16x1xf32>
    %cst_84 = arith.constant 6.400000e+01 : f32
    %255 = vector.broadcast %cst_84 : f32 to vector<16x1xf32>
    %256 = arith.divf %254, %255 : vector<16x1xf32>
    %cst_85 = arith.constant 9.99999996E-13 : f32
    %257 = vector.broadcast %cst_85 : f32 to vector<16x1xf32>
    %258 = arith.addf %256, %257 : vector<16x1xf32>
    %259 = math.rsqrt %258 : vector<16x1xf32>
    %260 = vector.broadcast %259 : vector<16x1xf32> to vector<16x64xf32>
    %261 = arith.mulf %251, %260 : vector<16x64xf32>
    %262 = vector.broadcast %243 : vector<1x64xf32> to vector<16x64xf32>
    %263 = arith.mulf %261, %262 : vector<16x64xf32>
    %264 = vector.broadcast %245 : vector<1x64xf32> to vector<16x64xf32>
    %265 = arith.addf %263, %264 : vector<16x64xf32>
    %266 = arith.truncf %265 : vector<16x64xf32> to vector<16x64xbf16>
    %c0_86 = arith.constant 0 : index
    %c0_87 = arith.constant 0 : index
    %c0_88 = arith.constant 0 : index
    %267 = vector.load %arg14[%c0_86, %c0_87, %c0_88] : memref<1x64x2048xbf16, #tpu.memory_space<vmem>>, vector<1x64x2048xbf16>
    %268 = vector.shape_cast %267 : vector<1x64x2048xbf16> to vector<64x2048xbf16>
    %cst_89 = arith.constant dense<0.000000e+00> : vector<16x2048xf32>
    %269 = tpu.matmul %266, %268, %cst_89 {dimension_numbers = #tpu.dot_dimension_numbers<[1], [0], [0], [1], [0, 0, 1, 1], [], []>} : vector<16x64xbf16>, vector<64x2048xbf16>, vector<16x2048xf32> -> vector<16x2048xf32>
    %c0_90 = arith.constant 0 : index
    %c0_91 = arith.constant 0 : index
    %c0_92 = arith.constant 0 : index
    %270 = vector.load %arg15[%c0_90, %c0_91, %c0_92] : memref<1x1x2048xf32, #tpu.memory_space<vmem>>, vector<1x1x2048xf32>
    %271 = vector.shape_cast %270 : vector<1x1x2048xf32> to vector<1x2048xf32>
    %272 = vector.broadcast %271 : vector<1x2048xf32> to vector<16x2048xf32>
    %273 = arith.addf %269, %272 : vector<16x2048xf32>
    %cst_93 = arith.constant 5.000000e-01 : f32
    %274 = vector.broadcast %cst_93 : f32 to vector<16x2048xf32>
    %275 = arith.mulf %274, %273 : vector<16x2048xf32>
    %cst_94 = arith.constant 4.471500e-02 : f32
    %276 = vector.broadcast %cst_94 : f32 to vector<16x2048xf32>
    %277 = arith.mulf %276, %273 : vector<16x2048xf32>
    %278 = arith.mulf %277, %273 : vector<16x2048xf32>
    %279 = arith.mulf %278, %273 : vector<16x2048xf32>
    %280 = arith.addf %273, %279 : vector<16x2048xf32>
    %cst_95 = arith.constant 0.797884583 : f32
    %281 = vector.broadcast %cst_95 : f32 to vector<16x2048xf32>
    %282 = arith.mulf %281, %280 : vector<16x2048xf32>
    %283 = math.tanh %282 : vector<16x2048xf32>
    %cst_96 = arith.constant 1.000000e+00 : f32
    %284 = vector.broadcast %cst_96 : f32 to vector<16x2048xf32>
    %285 = arith.addf %284, %283 : vector<16x2048xf32>
    %286 = arith.mulf %275, %285 : vector<16x2048xf32>
    %287 = arith.truncf %286 : vector<16x2048xf32> to vector<16x2048xbf16>
    %c0_97 = arith.constant 0 : index
    %c0_98 = arith.constant 0 : index
    %c0_99 = arith.constant 0 : index
    %288 = vector.load %arg16[%c0_97, %c0_98, %c0_99] : memref<1x2048x64xbf16, #tpu.memory_space<vmem>>, vector<1x2048x64xbf16>
    %289 = vector.shape_cast %288 : vector<1x2048x64xbf16> to vector<2048x64xbf16>
    %cst_100 = arith.constant dense<0.000000e+00> : vector<16x64xf32>
    %290 = tpu.matmul %287, %289, %cst_100 {dimension_numbers = #tpu.dot_dimension_numbers<[1], [0], [0], [1], [0, 0, 1, 1], [], []>} : vector<16x2048xbf16>, vector<2048x64xbf16>, vector<16x64xf32> -> vector<16x64xf32>
    %c0_101 = arith.constant 0 : index
    %c0_102 = arith.constant 0 : index
    %c0_103 = arith.constant 0 : index
    %291 = vector.load %arg17[%c0_101, %c0_102, %c0_103] : memref<1x1x64xf32, #tpu.memory_space<vmem>>, vector<1x1x64xf32>
    %292 = vector.shape_cast %291 : vector<1x1x64xf32> to vector<1x64xf32>
    %293 = vector.broadcast %292 : vector<1x64xf32> to vector<16x64xf32>
    %294 = arith.addf %290, %293 : vector<16x64xf32>
    %295 = arith.addf %294, %265 : vector<16x64xf32>
    %c0_104 = arith.constant 0 : index
    %c0_105 = arith.constant 0 : index
    %c0_106 = arith.constant 0 : index
    %296 = vector.load %arg18[%c0_104, %c0_105, %c0_106] : memref<1x1x64xf32, #tpu.memory_space<vmem>>, vector<1x1x64xf32>
    %297 = vector.shape_cast %296 : vector<1x1x64xf32> to vector<1x64xf32>
    %c0_107 = arith.constant 0 : index
    %c0_108 = arith.constant 0 : index
    %c0_109 = arith.constant 0 : index
    %298 = vector.load %arg19[%c0_107, %c0_108, %c0_109] : memref<1x1x64xf32, #tpu.memory_space<vmem>>, vector<1x1x64xf32>
    %299 = vector.shape_cast %298 : vector<1x1x64xf32> to vector<1x64xf32>
    %cst_110 = arith.constant dense<0.000000e+00> : vector<16xf32>
    %300 = vector.multi_reduction <add>, %295, %cst_110 [1] : vector<16x64xf32> to vector<16xf32>
    %301 = vector.shape_cast %300 : vector<16xf32> to vector<16x1xf32>
    %cst_111 = arith.constant 6.400000e+01 : f32
    %302 = vector.broadcast %cst_111 : f32 to vector<16x1xf32>
    %303 = arith.divf %301, %302 : vector<16x1xf32>
    %304 = vector.broadcast %303 : vector<16x1xf32> to vector<16x64xf32>
    %305 = arith.subf %295, %304 : vector<16x64xf32>
    %306 = arith.mulf %305, %305 : vector<16x64xf32>
    %cst_112 = arith.constant dense<0.000000e+00> : vector<16xf32>
    %307 = vector.multi_reduction <add>, %306, %cst_112 [1] : vector<16x64xf32> to vector<16xf32>
    %308 = vector.shape_cast %307 : vector<16xf32> to vector<16x1xf32>
    %cst_113 = arith.constant 6.400000e+01 : f32
    %309 = vector.broadcast %cst_113 : f32 to vector<16x1xf32>
    %310 = arith.divf %308, %309 : vector<16x1xf32>
    %cst_114 = arith.constant 9.99999996E-13 : f32
    %311 = vector.broadcast %cst_114 : f32 to vector<16x1xf32>
    %312 = arith.addf %310, %311 : vector<16x1xf32>
    %313 = math.rsqrt %312 : vector<16x1xf32>
    %314 = vector.broadcast %313 : vector<16x1xf32> to vector<16x64xf32>
    %315 = arith.mulf %305, %314 : vector<16x64xf32>
    %316 = vector.broadcast %297 : vector<1x64xf32> to vector<16x64xf32>
    %317 = arith.mulf %315, %316 : vector<16x64xf32>
    %318 = vector.broadcast %299 : vector<1x64xf32> to vector<16x64xf32>
    %319 = arith.addf %317, %318 : vector<16x64xf32>
    %c0_115 = arith.constant 0 : index
    %c0_116 = arith.constant 0 : index
    %320 = vector.load %arg21[%c0_115, %c0_116] : memref<16x64xf32, #tpu.memory_space<vmem>>, vector<16x64xf32>
    tpu.vector_store %arg21[%c0_115, %c0_116], %319 {strides = array<i32>} : memref<16x64xf32, #tpu.memory_space<vmem>>, vector<16x64xf32>,
    %c0_117 = arith.constant 0 : index
    %c0_118 = arith.constant 0 : index
    %321 = vector.load %arg20[%c0_117, %c0_118] : memref<16x64xf32, #tpu.memory_space<vmem>>, vector<16x64xf32>
    tpu.vector_store %arg20[%c0_117, %c0_118], %319 {strides = array<i32>} : memref<16x64xf32, #tpu.memory_space<vmem>>, vector<16x64xf32>,
    return
  }
  func.func @transform_0(%arg0: i32) -> (i32, i32) {
    %c0_i32 = arith.constant 0 : i32
    %c0_i32_0 = arith.constant 0 : i32
    %c0_i32_1 = arith.constant 0 : i32
    return %c0_i32, %c0_i32_0 : i32, i32
  }
  func.func @transform_1(%arg0: i32) -> (i32, i32) {
    %c0_i32 = arith.constant 0 : i32
    %c0_i32_0 = arith.constant 0 : i32
    %c0_i32_1 = arith.constant 0 : i32
    return %c0_i32, %c0_i32_0 : i32, i32
  }
  func.func @transform_2(%arg0: i32) -> (i32, i32, i32) {
    %c0_i32 = arith.constant 0 : i32
    %c0_i32_0 = arith.constant 0 : i32
    %c0_i32_1 = arith.constant 0 : i32
    %c0_i32_2 = arith.constant 0 : i32
    return %c0_i32, %c0_i32_0, %c0_i32_1 : i32, i32, i32
  }
  func.func @transform_3(%arg0: i32) -> (i32, i32, i32) {
    %c0_i32 = arith.constant 0 : i32
    %c0_i32_0 = arith.constant 0 : i32
    %c0_i32_1 = arith.constant 0 : i32
    return %arg0, %c0_i32, %c0_i32_0 : i32, i32, i32
  }
  func.func @transform_4(%arg0: i32) -> (i32, i32, i32) {
    %c0_i32 = arith.constant 0 : i32
    %c0_i32_0 = arith.constant 0 : i32
    %c0_i32_1 = arith.constant 0 : i32
    return %arg0, %c0_i32, %c0_i32_0 : i32, i32, i32
  }
  func.func @transform_5(%arg0: i32) -> (i32, i32, i32) {
    %c0_i32 = arith.constant 0 : i32
    %c0_i32_0 = arith.constant 0 : i32
    %c0_i32_1 = arith.constant 0 : i32
    return %arg0, %c0_i32, %c0_i32_0 : i32, i32, i32
  }
  func.func @transform_6(%arg0: i32) -> (i32, i32, i32) {
    %c0_i32 = arith.constant 0 : i32
    %c0_i32_0 = arith.constant 0 : i32
    %c0_i32_1 = arith.constant 0 : i32
    return %arg0, %c0_i32, %c0_i32_0 : i32, i32, i32
  }
  func.func @transform_7(%arg0: i32) -> (i32, i32, i32) {
    %c0_i32 = arith.constant 0 : i32
    %c0_i32_0 = arith.constant 0 : i32
    %c0_i32_1 = arith.constant 0 : i32
    return %arg0, %c0_i32, %c0_i32_0 : i32, i32, i32
  }
  func.func @transform_8(%arg0: i32) -> (i32, i32, i32) {
    %c0_i32 = arith.constant 0 : i32
    %c0_i32_0 = arith.constant 0 : i32
    %c0_i32_1 = arith.constant 0 : i32
    return %arg0, %c0_i32, %c0_i32_0 : i32, i32, i32
  }
  func.func @transform_9(%arg0: i32) -> (i32, i32, i32) {
    %c0_i32 = arith.constant 0 : i32
    %c0_i32_0 = arith.constant 0 : i32
    %c0_i32_1 = arith.constant 0 : i32
    return %arg0, %c0_i32, %c0_i32_0 : i32, i32, i32
  }
  func.func @transform_10(%arg0: i32) -> (i32, i32, i32) {
    %c0_i32 = arith.constant 0 : i32
    %c0_i32_0 = arith.constant 0 : i32
    %c0_i32_1 = arith.constant 0 : i32
    return %arg0, %c0_i32, %c0_i32_0 : i32, i32, i32
  }
  func.func @transform_11(%arg0: i32) -> (i32, i32, i32) {
    %c0_i32 = arith.constant 0 : i32
    %c0_i32_0 = arith.constant 0 : i32
    %c0_i32_1 = arith.constant 0 : i32
    return %arg0, %c0_i32, %c0_i32_0 : i32, i32, i32
  }
  func.func @transform_12(%arg0: i32) -> (i32, i32, i32) {
    %c0_i32 = arith.constant 0 : i32
    %c0_i32_0 = arith.constant 0 : i32
    %c0_i32_1 = arith.constant 0 : i32
    return %arg0, %c0_i32, %c0_i32_0 : i32, i32, i32
  }
  func.func @transform_13(%arg0: i32) -> (i32, i32, i32) {
    %c0_i32 = arith.constant 0 : i32
    %c0_i32_0 = arith.constant 0 : i32
    %c0_i32_1 = arith.constant 0 : i32
    return %arg0, %c0_i32, %c0_i32_0 : i32, i32, i32
  }
  func.func @transform_14(%arg0: i32) -> (i32, i32, i32) {
    %c0_i32 = arith.constant 0 : i32
    %c0_i32_0 = arith.constant 0 : i32
    %c0_i32_1 = arith.constant 0 : i32
    return %arg0, %c0_i32, %c0_i32_0 : i32, i32, i32
  }
  func.func @transform_15(%arg0: i32) -> (i32, i32, i32) {
    %c0_i32 = arith.constant 0 : i32
    %c0_i32_0 = arith.constant 0 : i32
    %c0_i32_1 = arith.constant 0 : i32
    return %arg0, %c0_i32, %c0_i32_0 : i32, i32, i32
  }
  func.func @transform_16(%arg0: i32) -> (i32, i32, i32) {
    %c0_i32 = arith.constant 0 : i32
    %c0_i32_0 = arith.constant 0 : i32
    %c0_i32_1 = arith.constant 0 : i32
    return %arg0, %c0_i32, %c0_i32_0 : i32, i32, i32
  }
  func.func @transform_17(%arg0: i32) -> (i32, i32, i32) {
    %c0_i32 = arith.constant 0 : i32
    %c0_i32_0 = arith.constant 0 : i32
    %c0_i32_1 = arith.constant 0 : i32
    return %arg0, %c0_i32, %c0_i32_0 : i32, i32, i32
  }
  func.func @transform_18(%arg0: i32) -> (i32, i32, i32) {
    %c0_i32 = arith.constant 0 : i32
    %c0_i32_0 = arith.constant 0 : i32
    %c0_i32_1 = arith.constant 0 : i32
    return %arg0, %c0_i32, %c0_i32_0 : i32, i32, i32
  }
  func.func @transform_19(%arg0: i32) -> (i32, i32) {
    %c0_i32 = arith.constant 0 : i32
    %c0_i32_0 = arith.constant 0 : i32
    %c0_i32_1 = arith.constant 0 : i32
    return %c0_i32, %c0_i32_0 : i32, i32
  }
}

</mosaic_0001>

<bundles_post_ra>
// kernel: tpu_custom_call.1
= control target key start
LH: loop header
LB: loop body
LE: loop exit
PB: predicated region body
PF: predicated region fallthrough
CT: control target
= control target key end

     0   :  { %s6830_s0 = inlined_call_operand.vmem [shape: f32[16,64], index: 0, kind: input, shape index: {}]   ;;  %s6831_s1 = inlined_call_operand.vmem [shape: f32[16,16], index: 1, kind: input, shape index: {}]   ;;  %s6832_s2 = inlined_call_operand.vmem [shape: bf16[8,1,64], index: 2, kind: input, shape index: {}]   ;;  %s6833_s3 = inlined_call_operand.vmem [shape: bf16[6,64,64], index: 3, kind: input, shape index: {}]   ;;  %s6834_s4 = inlined_call_operand.vmem [shape: f32[6,1,64], index: 4, kind: input, shape index: {}]   ;;  %s6835_s5 = inlined_call_operand.vmem [shape: bf16[6,64,64], index: 5, kind: input, shape index: {}]   ;;  %s6836_s6 = inlined_call_operand.vmem [shape: f32[6,1,64], index: 6, kind: input, shape index: {}]   ;;  %s6837_s7 = inlined_call_operand.vmem [shape: bf16[6,64,64], index: 7, kind: input, shape index: {}]   ;;  %s6838_s8 = inlined_call_operand.vmem [shape: f32[6,1,64], index: 8, kind: input, shape index: {}]   ;;  %s6839_s9 = inlined_call_operand.vmem [shape: bf16[6,64,64], index: 9, kind: input, shape index: {}]   ;;  %s6840_s10 = inlined_call_operand.vmem [shape: f32[6,1,64], index: 10, kind: input, shape index: {}]   ;;  %s6841_s11 = inlined_call_operand.vmem [shape: f32[6,1,64], index: 11, kind: input, shape index: {}]   ;;  %s6842_s12 = inlined_call_operand.vmem [shape: f32[6,1,64], index: 12, kind: input, shape index: {}]   ;;  %s6843_s13 = inlined_call_operand.vmem [shape: bf16[6,64,2048], index: 13, kind: input, shape index: {}]   ;;  %s6844_s14 = inlined_call_operand.vmem [shape: f32[6,1,2048], index: 14, kind: input, shape index: {}]   ;;  %s6845_s15 = inlined_call_operand.vmem [shape: bf16[6,2048,64], index: 15, kind: input, shape index: {}]   ;;  %s6846_s16 = inlined_call_operand.vmem [shape: f32[6,1,64], index: 16, kind: input, shape index: {}]   ;;  %s6847_s17 = inlined_call_operand.vmem [shape: f32[6,1,64], index: 17, kind: input, shape index: {}]   ;;  %s6848_s18 = inlined_call_operand.vmem [shape: f32[6,1,64], index: 18, kind: input, shape index: {}]   ;;  %s6849_s19 = inlined_call_operand.hbm [shape: f32[16,64], index: 19, kind: output, shape index: {}]  }
   0x1   :  { %6856 = sst [smem:[#allocation9_spill]] %s6830_s0 }
   0x2   :  { %6857 = sst [smem:[#allocation10_spill]] %s6831_s1 }
   0x3   :  { %6858 = sst [smem:[#allocation11_spill]] %s6832_s2 }
   0x4   :  { %6859 = sst [smem:[#allocation12_spill]] %s6833_s3 }
   0x5   :  { %6860 = sst [smem:[#allocation13_spill]] %s6834_s4 }
   0x6   :  { %6861 = sst [smem:[#allocation14_spill]] %s6835_s5 }
   0x7   :  { %6862 = sst [smem:[#allocation15_spill]] %s6836_s6 }
   0x8   :  { %6863 = sst [smem:[#allocation16_spill]] %s6837_s7 }
   0x9   :  { %6864 = sst [smem:[#allocation17_spill]] %s6839_s9 }
   0xa   :  { %6865 = sst [smem:[#allocation18_spill]] %s6843_s13 }
   0xb   :  { %6866 = sst [smem:[#allocation19_spill]] %s6844_s14 }
   0xc   :  { %6867 = sst [smem:[#allocation20_spill]] %s6849_s19 }
   0xd   :  { %24 = vsyncpa [#allocation4], 0  ;;  %s5644_s0 = smov 0  }
   0xe LB: > { %6868 = sst [smem:[#allocation6_spill]] %s5538_s0  ;;  %s5650_s30 = sadd.s32 4294967295, %s5538_s0   ;;  %s5538_s0 = sphi %s5644_s0, %s30_s0  }
   0xf   : > { %6869 = sst [smem:[#allocation7_spill]] %s5650_s30  ;;  %p4233_p0 = scmp.ge.s32.totalorder %s5538_s0, 1 }
  0x10   : > { %p664_p1 = scmp.lt.s32.totalorder %s5538_s0, 7 }
  0x12   : > { %p665_p2 = pnand %p4233_p0, %p664_p1 }
  0x14   : > { %668 = sbr.rel (%p665_p2) target bundleno = 2489 (0x9b9), region = 96 }
  0x19   : > { %p771_p3 = scmp.lt.s32.totalorder %s5650_s30, 5  ;;  %s6871_s25 = sld [smem:[#allocation12_spill]] }
  0x1a   : > { %s6873_s5 = sld [smem:[#allocation14_spill]] }
  0x1b   : > { %s5656_s20 = scalar_select %p771_p3, %s5650_s30, 5 }
  0x1c   : > { %s6875_s7 = sld [smem:[#allocation16_spill]] }
  0x1d   : > { %s5120_s21 = sshll.u32 %s5656_s20, 5  ;;  %s6876_s9 = sld [smem:[#allocation17_spill]] }
  0x1e   : > { %s6877_s13 = sld [smem:[#allocation18_spill]]  ;;  %s4244_s4 = sshll.u32 %s5656_s20, 4 }
  0x1f   : > { %s5666_s3 = scalar_lea.vmem %s6871_s25, %s5120_s21  ;;  %s6878_s14 = sld [smem:[#allocation19_spill]] }
  0x20   : > { %6872 = sst [smem:[#allocation8_spill]] %s5666_s3  ;;  %s5671_s28 = scalar_lea.vmem %s6873_s5, %s5120_s21 }
  0x21   : > { %s5124_s3 = sshll.u32 %s5656_s20, 9  ;;  %s5125_s27 = sshll.u32 %s5656_s20, 10 }
  0x22   : > { %s5680_s22 = scalar_lea.vmem %s6875_s7, %s5120_s21  ;;  %s5719_s29 = scalar_lea.vmem %s6845_s15, %s5125_s27 }
  0x23   : > { %s5689_s26 = scalar_lea.vmem %s6876_s9, %s5120_s21  ;;  %s825_s7 = scalar_lea.vmem %s6846_s16, %s5656_s20 }
  0x24   : > { %s5707_s25 = scalar_lea.vmem %s6877_s13, %s5124_s3  ;;  %s828_s3 = scalar_lea.vmem %s6847_s17, %s5656_s20 }
  0x25   : > { %s5713_s5 = scalar_lea.vmem %s6878_s14, %s4244_s4  ;;  %s831_s21 = scalar_lea.vmem %s6848_s18, %s5656_s20 }
  0x26   : > { %s6879_s4 = sld [smem:[#allocation7_spill]] }
  0x2c   : > { %p4247_p4 = scmp.ne.s32.totalorder %s6879_s4, 0 }
  0x2d   : > { %s6880_s0 = sld [smem:[#allocation9_spill]] (!%p4247_p4) }
  0x2e   : > { %836 = sbr.rel (%p4247_p4) target bundleno = 54 (0x36), region = 100 }
  0x33   : > { %s6881_s19 = smov %s6880_s0  ;;  %v837_v0 = vld [vmem:[%s6880_s0] sm:$0xff]  ;;  %vm839_vm0 = vcmask 523264  }
  0x34   : > { %v838_v1 = vld [vmem:[%s6881_s19 + $0x8] sm:$0xff]  ;;  %840 = vst.msk [vmem:[#allocation2] sm:$0xff] %vm839_vm0, %v837_v0 }
  0x35   : > { %841 = vst.msk [vmem:[#allocation2 + $0x8] sm:$0xff] %vm839_vm0, %v838_v1 }
  0x36 PF: > { %s6882_s6 = sld [smem:[#allocation8_spill]]  ;;  %v5133_v2 = vld [vmem:[%s5671_s28 + $0x18] sm:$0xff]  ;;  %v5132_v3 = vld [vmem:[%s5671_s28 + $0x10] sm:$0xff]  ;;  %v5131_v4 = vld [vmem:[%s5671_s28 + $0x8] sm:$0xff]  ;;  %vm891_vm1 = vcmask 523264   ;;  %s6885_s1 = scalar_lea.vmem %s6838_s8, %s5656_s20  ;;  %vm1080_vm2 = vcmask 130048  }
  0x37   : > { %951 = vmatpush.bf16.msra.mxu1 %v5133_v2  ;;  %v5130_v5 = vld [vmem:[%s5671_s28] sm:$0xff]  ;;  %v5137_v9 = vld [vmem:[%s5680_s22 + $0x18] sm:$0xff]  ;;  %v5136_v11 = vld [vmem:[%s5680_s22 + $0x10] sm:$0xff]  ;;  %s6883_s14 = sld [smem:[#allocation15_spill]]  ;;  %s6890_s23 = scalar_lea.vmem %s6840_s10, %s5656_s20 }
  0x38   : > { %1037 = vmatpush.bf16.msra.mxu2 %v5137_v9  ;;  %v5135_v13 = vld [vmem:[%s5680_s22 + $0x8] sm:$0xff]  ;;  %v5134_v15 = vld [vmem:[%s5680_s22] sm:$0xff]  ;;  %s6886_s4 = sld [smem:[#allocation11_spill]]  ;;  %s6891_s0 = scalar_lea.vmem %s6841_s11, %s5656_s20 }
  0x39   : > { %v5354_v24 = vld [vmem:[%s6885_s1] ss:$0 sm:$0xff]  ;;  %s6887_s27 = sld [smem:[#allocation13_spill]]  ;;  %s6892_s9 = scalar_lea.vmem %s6842_s12, %s5656_s20 }
  0x3a   : > { %s6893_s22 = sld [smem:[#allocation7_spill]]  ;;  %s5543_s24 = smov 8  }
  0x3b   : > { %952 = vmatpush.bf16.msra.mxu1 %v5132_v3  ;;  %v5744_v6 = vld [vmem:[#allocation2] sm:$0xff] }
  0x3c   : > { %v5746_v7 = vld [vmem:[#allocation2 + $0x8] sm:$0xff]  ;;  %v5129_v10 = vld [vmem:[%s6882_s6 + $0x18] sm:$0xff]  ;;  %v5128_v12 = vld [vmem:[%s6882_s6 + $0x10] sm:$0xff]  ;;  %1038 = vmatpush.bf16.msra.mxu2 %v5136_v11 }
  0x3d   : > { %v844_v8 = vpack.c.bf16 %v5746_v7, %v5744_v6  ;;  %899 = vmatpush.bf16.msra.mxu0 %v5129_v10  ;;  %v5127_v14 = vld [vmem:[%s6882_s6 + $0x8] sm:$0xff]  ;;  %v5126_v16 = vld [vmem:[%s6882_s6] sm:$0xff]  ;;  %s6884_s28 = scalar_lea.vmem %s6883_s14, %s5656_s20 }
  0x3e   : > { %v5353_v17 = vld [vmem:[%s6884_s28] ss:$0 sm:$0xff]  ;;  %v846_v32 = vld [vmem:[%s6886_s4 + $0x1] sm:$0x1]  ;;  %v848_v47 = vld [vmem:[%s6886_s4 + $0x3] sm:$0x1] }
  0x3f   : > { %953 = vmatpush.bf16.msra.mxu1 %v5131_v4  ;;  %v1110_v34 = vpack.i.b16 %v846_v32, %v846_v32  ;;  %s6888_s6 = scalar_lea.vmem %s6887_s27, %s5656_s20  ;;  %v850_v48 = vld [vmem:[%s6886_s4 + $0x5] sm:$0x1]  ;;  %v1273_v51 = vpack.i.b16 %v848_v47, %v848_v47  ;;  %v852_v53 = vld [vmem:[%s6886_s4 + $0x7] sm:$0x1]  ;;  %s6889_s28 = sld [smem:[#allocation10_spill]] }
  0x40   : > { %1039 = vmatpush.bf16.msra.mxu2 %v5135_v13  ;;  %v5355_v36 = vld [vmem:[%s6888_s6] ss:$0 sm:$0xff]  ;;  %v1421_v52 = vpack.i.b16 %v850_v48, %v850_v48  ;;  %v1569_v54 = vpack.i.b16 %v852_v53, %v852_v53  ;;  %p5338_p5 = scmp.eq.s32.totalorder %s6893_s22, 5 }
  0x41   : > { %900 = vmatpush.bf16.msra.mxu0 %v5128_v12  ;;  %v1112_v38 = vperm.slane %v1110_v34, 0  ;;  %v1275_v55 = vperm.slane %v1273_v51, 0  ;;  %v845_v13 = vld [vmem:[%s6886_s4] sm:$0x1]  ;;  %v849_v34 = vld [vmem:[%s6886_s4 + $0x4] sm:$0x1] }
  0x42   : > { %v1423_v56 = vperm.slane %v1421_v52, 0  ;;  %v1571_v61 = vperm.slane %v1569_v54, 0 }
  0x43   : > { %954 = vmatpush.bf16.msra.mxu1 %v5130_v5  ;;  %v1113_v40 = vunpack.c.l.bf16 %v1112_v38  ;;  %v5802_v59 = vunpack.c.l.bf16 %v1275_v55  ;;  %v1347_v38 = vpack.i.b16 %v849_v34, %v849_v34 }
  0x44   : > { %1040 = vmatpush.bf16.msra.mxu2 %v5134_v15  ;;  %v5804_v60 = vunpack.c.l.bf16 %v1423_v56  ;;  %v5822_v3 = vunpack.c.l.bf16 %v1571_v61  ;;  %v1050_v15 = vpack.i.b16 %v845_v13, %v845_v13 }
  0x45   : > { %901 = vmatpush.bf16.msra.mxu0 %v5127_v14  ;;  %v5918_v52 = vld [vmem:[%s6889_s28] sm:$0xff] }
  0x46   : > { %4281 = vmatmul.msk.bf16.vlgmr.msra.gmra.mxu1 %vm891_vm1, %v844_v8 }
  0x47   : > { %4298 = vmatmul.msk.bf16.vlgmr.msra.gmra.mxu2 %vm891_vm1, %v844_v8 }
  0x49   : > { %902 = vmatpush.bf16.msra.mxu0 %v5126_v16 }
  0x4c   : > { %4264 = vmatmul.msk.bf16.vlgmr.msra.gmra.mxu0 %vm891_vm1, %v844_v8 }
  0xc3   : > { %v956_v18 = vpop.f32.mrf.mxu1 }
  0xc4   : > { %v957_v19 = vadd.f32 %v5353_v17, %v956_v18 }
  0xc6   : > { %961 = vxpose.xlu0.b32.start [1/2] (short) (narrow) %v957_v19, 64 }
  0xc9   : > { %v904_v26 = vpop.f32.mrf.mxu0 }
  0xca   : > { %v1042_v23 = vpop.f32.mrf.mxu2  ;;  %v905_v41 = vadd.f32 %v5355_v36, %v904_v26 }
  0xcb   : > { %v958_v20 = vpop.f32.mrf.mxu1  ;;  %v1043_v28 = vadd.f32 %v5354_v24, %v1042_v23 }
  0xcc   : > { %v959_v21 = vadd.f32 %v5353_v17, %v958_v20  ;;  %v909_v49 = vpack.c.bf16 %v905_v41, %v905_v41  ;;  %v1052_v17 = vperm.slane %v1050_v15, 0 }
  0xcd   : > { %v1047_v30 = vpack.c.bf16 %v1043_v28, %v1043_v28  ;;  %v847_v28 = vld [vmem:[%s6886_s4 + $0x2] sm:$0x1] }
  0xce   : > { %962 = vxpose.xlu0.b32.end [2/2] (short) (narrow) %v959_v21, 64  ;;  %v5798_v57 = vunpack.c.l.bf16 %v909_v49  ;;  %v5851_v19 = vunpack.c.l.bf16 %v1052_v17 }
  0xcf   : > { %v5778_v35 = vunpack.c.l.bf16 %v1047_v30 }
  0xd0   : > { %v5808_v63 = vmul.f32 %v5802_v59, %v5798_v57  ;;  %v5816_v1 = vmul.f32 %v5804_v60, %v5798_v57  ;;  %v5830_v8 = vmul.f32 %v5822_v3, %v5798_v57  ;;  %v1056_v21 = vmul.f32 %v5851_v19, %v5798_v57 }
  0xd1   : > { %v906_v39 = vpop.f32.mrf.mxu0  ;;  %v1160_v43 = vmul.f32 %v1113_v40, %v5778_v35 }
  0xd2   : > { %v1044_v27 = vpop.f32.mrf.mxu2  ;;  %v907_v42 = vadd.f32 %v5355_v36, %v906_v39  ;;  %v1349_v39 = vperm.slane %v1347_v38, 0 }
  0xd3   : > { %v1045_v29 = vadd.f32 %v5354_v24, %v1044_v27  ;;  %v1114_v24 = vmul.f32 %v1113_v40, %v5798_v57 }
  0xd4   : > { %v910_v50 = vpack.c.bf16 %v907_v42, %v907_v42 }
  0xd5   : > { %v1048_v31 = vpack.c.bf16 %v1045_v29, %v1045_v29 }
  0xd6   : > { %v5800_v58 = vunpack.c.l.bf16 %v910_v50 }
  0xd7   : > { %v5785_v37 = vunpack.c.l.bf16 %v1048_v31  ;;  %v1199_v31 = vpack.i.b16 %v847_v28, %v847_v28 }
  0xd8   : > { %v5812_v0 = vmul.f32 %v5802_v59, %v5800_v58  ;;  %v5820_v2 = vmul.f32 %v5804_v60, %v5800_v58  ;;  %v5834_v9 = vmul.f32 %v5822_v3, %v5800_v58  ;;  %v1057_v23 = vmul.f32 %v5851_v19, %v5800_v58 }
  0xd9   : > { %v1161_v44 = vmul.f32 %v1113_v40, %v5785_v37  ;;  %v1115_v26 = vmul.f32 %v1113_v40, %v5800_v58  ;;  %v5893_v40 = vunpack.c.l.bf16 %v1349_v39 }
  0xda   : > { %v1279_v4 = vpack.c.bf16 %v5812_v0, %v5808_v63  ;;  %v1427_v5 = vpack.c.bf16 %v5820_v2, %v5816_v1  ;;  %v1575_v10 = vpack.c.bf16 %v5834_v9, %v5830_v8  ;;  %v1058_v29 = vpack.c.bf16 %v1057_v23, %v1056_v21 }
  0xdb   : > { %v1162_v46 = vpack.c.bf16 %v1161_v44, %v1160_v43  ;;  %v1116_v30 = vpack.c.bf16 %v1115_v26, %v1114_v24  ;;  %v1351_v41 = vmul.f32 %v5893_v40, %v5798_v57  ;;  %v1352_v42 = vmul.f32 %v5893_v40, %v5800_v58  ;;  %v851_v43 = vld [vmem:[%s6886_s4 + $0x6] sm:$0x1] }
  0xdd   : > { %1174 = vmatpush.bf16.msrb.mxu1 %v1162_v46  ;;  %v1353_v44 = vpack.c.bf16 %v1352_v42, %v1351_v41 }
 0x16a   : > { %v5766_v22 = vpop.trf.xlu0 }
 0x172   : > { %v5773_v25 = vpop.trf.xlu0 }
 0x173   : > { %v5866_v27 = vpack.c.bf16 %v5773_v25, %v5766_v22  ;;  %v1201_v22 = vperm.slane %v1199_v31, 0 }
 0x175   : > { %v5879_v25 = vunpack.c.l.bf16 %v1201_v22 }
 0x177   : > { %v1203_v32 = vmul.f32 %v5879_v25, %v5798_v57 }
 0x17a   : > { %v979_v33 = vpop.trf.xlu0 }
 0x182   : > { %v980_v45 = vpop.trf.xlu0 }
 0x183   : > { %v5853_v20 = vpack.c.bf16 %v980_v45, %v979_v33  ;;  %v1204_v33 = vmul.f32 %v5879_v25, %v5800_v58  ;;  %v1495_v45 = vpack.i.b16 %v851_v43, %v851_v43 }
 0x185   : > { %v1205_v36 = vpack.c.bf16 %v1204_v33, %v1203_v32  ;;  %v1497_v46 = vperm.slane %v1495_v45, 0 }
 0x187   : > { %v5908_v47 = vunpack.c.l.bf16 %v1497_v46  ;;  %v1105_v46 = vmul.f32 %v5778_v35, %v5851_v19 }
 0x189   : > { %v1499_v48 = vmul.f32 %v5908_v47, %v5798_v57  ;;  %v1500_v49 = vmul.f32 %v5908_v47, %v5800_v58  ;;  %v5925_v58 = vld [vmem:[%s6889_s28 + $0x8] sm:$0xff] }
 0x18a   : > { %v981_v62 = vpop.trf.xlu0 }
 0x18b   : > { %v1501_v50 = vpack.c.bf16 %v1500_v49, %v1499_v48  ;;  %v1106_v48 = vmul.f32 %v5785_v37, %v5851_v19  ;;  %v1249_v49 = vmul.f32 %v5879_v25, %v5778_v35 }
 0x192   : > { %v982_v11 = vpop.trf.xlu0 }
 0x193   : > { %v5846_v18 = vpack.c.bf16 %v982_v11, %v981_v62 }
 0x19a   : > { %v983_v12 = vpop.trf.xlu0 }
 0x1a2   : > { %v984_v14 = vpop.trf.xlu0 }
 0x1a3   : > { %v5841_v16 = vpack.c.bf16 %v984_v14, %v983_v12 }
 0x1a5   : > { %1066 = vmatpush.bf16.msra.mxu3 %v5841_v16  ;;  %1124 = vmatpush.bf16.msrb.mxu0 %v5841_v16 }
 0x1a6   : > { %1287 = vmatpush.bf16.msra.mxu1 %v5841_v16 }
 0x1a9   : > { %1067 = vmatpush.bf16.msra.mxu3 %v5846_v18  ;;  %1125 = vmatpush.bf16.msrb.mxu0 %v5846_v18 }
 0x1aa   : > { %1288 = vmatpush.bf16.msra.mxu1 %v5846_v18 }
 0x1ad   : > { %1068 = vmatpush.bf16.msra.mxu3 %v5853_v20  ;;  %1126 = vmatpush.bf16.msrb.mxu0 %v5853_v20 }
 0x1ae   : > { %1289 = vmatpush.bf16.msra.mxu1 %v5853_v20 }
 0x1b1   : > { %1069 = vmatpush.bf16.msra.mxu3 %v5866_v27  ;;  %1127 = vmatpush.bf16.msrb.mxu0 %v5866_v27 }
 0x1b2   : > { %1290 = vmatpush.bf16.msra.mxu1 %v5866_v27 }
 0x1b4   : > { %4299 = vmatmul.msk.bf16.vlgmr.msra.gmra.mxu3 %vm891_vm1, %v1058_v29  ;;  %4300 = vmatmul.msk.bf16.vlgmr.msrb.gmra.mxu0 %vm891_vm1, %v1116_v30 }
 0x1b5   : > { %1213 = vmatpush.bf16.msrb.mxu3 %v5841_v16 }
 0x1b9   : > { %1214 = vmatpush.bf16.msrb.mxu3 %v5846_v18 }
 0x1bd   : > { %1215 = vmatpush.bf16.msrb.mxu3 %v5853_v20 }
 0x1c1   : > { %1216 = vmatpush.bf16.msrb.mxu3 %v5866_v27 }
 0x1c4   : > { %4303 = vmatmul.msk.bf16.vlgmr.msrb.gmra.mxu3 %vm891_vm1, %v1205_v36 }
 0x1c5   : > { %1361 = vmatpush.bf16.msra.mxu3 %v5841_v16 }
 0x1c9   : > { %1362 = vmatpush.bf16.msra.mxu3 %v5846_v18 }
 0x1cd   : > { %1363 = vmatpush.bf16.msra.mxu3 %v5853_v20 }
 0x1d1   : > { %1364 = vmatpush.bf16.msra.mxu3 %v5866_v27 }
 0x1d4   : > { %4307 = vmatmul.msk.bf16.vlgmr.msra.gmra.mxu3 %vm891_vm1, %v1353_v44 }
 0x1d5   : > { %1509 = vmatpush.bf16.msrb.mxu3 %v5841_v16 }
 0x1d9   : > { %1510 = vmatpush.bf16.msrb.mxu3 %v5846_v18 }
 0x1dd   : > { %1511 = vmatpush.bf16.msrb.mxu3 %v5853_v20 }
 0x1e1   : > { %1512 = vmatpush.bf16.msrb.mxu3 %v5866_v27 }
 0x1e4   : > { %4311 = vmatmul.msk.bf16.vlgmr.msrb.gmra.mxu3 %vm891_vm1, %v1501_v50  ;;  %v1250_v50 = vmul.f32 %v5879_v25, %v5785_v37 }
 0x1e6   : > { %v1251_v19 = vpack.c.bf16 %v1250_v50, %v1249_v49 }
 0x1e8   : > { %1263 = vmatpush.bf16.msra.mxu0 %v1251_v19 }
 0x231   : > { %v1129_v51 = vpop.f32.mrf.mxu0 }
 0x232   : > { %v1134_v53 = vmul.f32 0.35355338, %v1129_v51  ;;  %v1323_v51 = vmul.f32 %v5802_v59, %v5778_v35 }
 0x234   : > { %v1136_v54 = vadd.f32 %v1134_v53, %v5918_v52  ;;  %v1324_v53 = vmul.f32 %v5802_v59, %v5785_v37 }
 0x236   : > { %v1138_v55 = vsel %vm1080_vm2, %v1136_v54, -inf }
 0x237   : > { %1139 = vmax.xlane.f32.xlu1 %v1138_v55  ;;  %v1071_v56 = vpop.f32.mrf.mxu3  ;;  %v1398_v55 = vmul.f32 %v5893_v40, %v5785_v37 }
 0x238   : > { %v1076_v57 = vmul.f32 0.35355338, %v1071_v56  ;;  %v1107_v56 = vpack.c.bf16 %v1106_v48, %v1105_v46 }
 0x239   : > { %v1131_v61 = vpop.f32.mrf.mxu0 }
 0x23a   : > { %v1135_v62 = vmul.f32 0.35355338, %v1131_v61  ;;  %v5928_v11 = vadd.f32 %v1076_v57, %v5918_v52  ;;  %v1325_v57 = vpack.c.bf16 %v1324_v53, %v1323_v51  ;;  %1191 = vmatpush.bf16.msrb.mxu2 %v1107_v56 }
 0x23c   : > { %v1081_v12 = vsel %vm1080_vm2, %v5928_v11, -inf  ;;  %v1137_v13 = vadd.f32 %v1135_v62, %v5925_v58 }
 0x23d   : > { %1082 = vmax.xlane.f32.xlu0 %v1081_v12 }
 0x23e   : > { %v1141_v14 = vsel %vm1080_vm2, %v1137_v13, -inf  ;;  %1337 = vmatpush.bf16.msra.mxu2 %v1325_v57 }
 0x23f   : > { %1142 = vmax.xlane.f32.xlu1 %v1141_v14  ;;  %v1073_v15 = vpop.f32.mrf.mxu3 }
 0x240   : > { %v1077_v17 = vmul.f32 0.35355338, %v1073_v15 }
 0x242   : > { %v5935_v21 = vadd.f32 %v1077_v17, %v5925_v58 }
 0x244   : > { %v1084_v23 = vsel %vm1080_vm2, %v5935_v21, -inf }
 0x247   : > { %v1218_v24 = vpop.f32.mrf.mxu3  ;;  %1085 = vmax.xlane.f32.xlu1 %v1084_v23 }
 0x248   : > { %v1223_v42 = vmul.f32 0.35355338, %v1218_v24 }
 0x24a   : > { %v5947_v44 = vadd.f32 %v1223_v42, %v5918_v52 }
 0x24c   : > { %v1227_v45 = vsel %vm1080_vm2, %v5947_v44, -inf }
 0x24f   : > { %v1220_v26 = vpop.f32.mrf.mxu3 }
 0x250   : > { %v1224_v28 = vmul.f32 0.35355338, %v1220_v26 }
 0x252   : > { %v5940_v29 = vadd.f32 %v1224_v28, %v5925_v58 }
 0x254   : > { %v1230_v30 = vsel %vm1080_vm2, %v5940_v29, -inf }
 0x255   : > { %1231 = vmax.xlane.f32.xlu1 %v1230_v30 }
 0x2aa   : > { %v1140_v31 = vpop.xlane.xlu1 %1139 }
 0x2ab   : > { %v1144_v22 = vsub.f32 %v1136_v54, %v1140_v31  ;;  %v1397_v54 = vmul.f32 %v5893_v40, %v5778_v35 }
 0x2ad   : > { %v1146_v32 = vmul.f32 1.442695, %v1144_v22  ;;  %v1399_v61 = vpack.c.bf16 %v1398_v55, %v1397_v54 }
 0x2af   : > { %5362 = vpow2.f32 %v1146_v32  ;;  %1411 = vmatpush.bf16.msrb.mxu0 %v1399_v61 }
 0x2b2   : > { %v1143_v33 = vpop.xlane.xlu1 %1142 }
 0x2b3   : > { %v1145_v34 = vsub.f32 %v1137_v13, %v1143_v33 }
 0x2b5   : > { %v5363_v36 = vpop.eup %5362  ;;  %v1148_v38 = vmul.f32 1.442695, %v1145_v34 }
 0x2b6   : > { %v1150_v39 = vsel %vm1080_vm2, %v5363_v36, 0.0 }
 0x2b7   : > { %5364 = vpow2.f32 %v1148_v38  ;;  %1151 = vadd.xlane.f32.xlu2 %v1150_v39 }
 0x2ba   : > { %v1086_v31 = vpop.xlane.xlu1 %1085 }
 0x2bd   : > { %v5365_v41 = vpop.eup %5364 }
 0x2be   : > { %v1153_v43 = vsel %vm1080_vm2, %v5365_v41, 0.0 }
 0x2bf   : > { %1154 = vadd.xlane.f32.xlu2 %v1153_v43 }
 0x2c7   : > { %1228 = vmax.xlane.f32.xlu2 %v1227_v45 }
 0x32a   : > { %v1152_v25 = vpop.xlane.xlu2 %1151 }
 0x32b   : > { %5366 = vrcp.f32 %v1152_v25 }
 0x331   : > { %v5367_v12 = vpop.eup %5366 }
 0x332   : > { %v1155_v62 = vpop.xlane.xlu2 %1154  ;;  %v1158_v13 = vmul.f32 %v5367_v12, %v5363_v36 }
 0x333   : > { %5368 = vrcp.f32 %v1155_v62 }
 0x339   : > { %v5369_v59 = vpop.eup %5368 }
 0x33a   : > { %v1159_v14 = vmul.f32 %v5369_v59, %v5365_v41 }
 0x33c   : > { %v1163_v15 = vpack.c.bf16 %v1159_v14, %v1158_v13  ;;  %v1229_v14 = vpop.xlane.xlu2 %1228 }
 0x33e   : > { %4301 = vmatmul.msk.bf16.vlgmr.msrb.gmra.mxu1 %vm1080_vm2, %v1163_v15  ;;  %v1232_v15 = vpop.xlane.xlu1 %1231 }
 0x33f   : > { %1435 = vmatpush.bf16.msrb.mxu1 %v5841_v16 }
 0x343   : > { %1436 = vmatpush.bf16.msrb.mxu1 %v5846_v18 }
 0x347   : > { %1437 = vmatpush.bf16.msrb.mxu1 %v5853_v20 }
 0x34b   : > { %1438 = vmatpush.bf16.msrb.mxu1 %v5866_v27 }
 0x34e   : > { %4305 = vmatmul.msk.bf16.vlgmr.msra.gmra.mxu1 %vm891_vm1, %v1279_v4  ;;  %v1366_v4 = vpop.f32.mrf.mxu3 }
 0x34f   : > { %1583 = vmatpush.bf16.msra.mxu1 %v5841_v16 }
 0x353   : > { %1584 = vmatpush.bf16.msra.mxu1 %v5846_v18 }
 0x357   : > { %1585 = vmatpush.bf16.msra.mxu1 %v5853_v20 }
 0x35b   : > { %1586 = vmatpush.bf16.msra.mxu1 %v5866_v27  ;;  %v1371_v27 = vmul.f32 0.35355338, %v1366_v4 }
 0x35d   : > { %v5998_v9 = vadd.f32 %v1371_v27, %v5918_v52 }
 0x35e   : > { %4309 = vmatmul.msk.bf16.vlgmr.msrb.gmra.mxu1 %vm891_vm1, %v1427_v5  ;;  %v1083_v5 = vpop.xlane.xlu0 %1082 }
 0x35f   : > { %v1087_v17 = vsub.f32 %v5928_v11, %v1083_v5  ;;  %v1375_v24 = vsel %vm1080_vm2, %v5998_v9, -inf  ;;  %v1088_v11 = vsub.f32 %v5935_v21, %v1086_v31 }
 0x361   : > { %v1089_v28 = vmul.f32 1.442695, %v1087_v17  ;;  %v1091_v38 = vmul.f32 1.442695, %v1088_v11  ;;  %v1234_v17 = vsub.f32 %v5940_v29, %v1232_v15 }
 0x363   : > { %5370 = vpow2.f32 %v1089_v28 }
 0x364   : > { %5372 = vpow2.f32 %v1091_v38 }
 0x369   : > { %v6019_v42 = vpop.eup %5370 }
 0x36a   : > { %v1093_v21 = vsel %vm1080_vm2, %v6019_v42, 0.0  ;;  %v6028_v50 = vpop.eup %5372 }
 0x36b   : > { %v1096_v55 = vsel %vm1080_vm2, %v6028_v50, 0.0 }
 0x36e   : > { %4313 = vmatmul.msk.bf16.vlgmr.msra.gmra.mxu1 %vm891_vm1, %v1575_v10  ;;  %v1368_v10 = vpop.f32.mrf.mxu3 }
 0x36f   : > { %v1372_v23 = vmul.f32 0.35355338, %v1368_v10 }
 0x371   : > { %v6009_v32 = vadd.f32 %v1372_v23, %v5925_v58 }
 0x373   : > { %v1378_v36 = vsel %vm1080_vm2, %v6009_v32, -inf }
 0x376   : > { %v1514_v46 = vpop.f32.mrf.mxu3 }
 0x377   : > { %v1519_v53 = vmul.f32 0.35355338, %v1514_v46 }
 0x379   : > { %v6038_v57 = vadd.f32 %v1519_v53, %v5918_v52 }
 0x37b   : > { %v1523_v12 = vsel %vm1080_vm2, %v6038_v57, -inf }
 0x37e   : > { %v1516_v61 = vpop.f32.mrf.mxu3 }
 0x37f   : > { %v1520_v62 = vmul.f32 0.35355338, %v1516_v61 }
 0x381   : > { %v6048_v13 = vadd.f32 %v1520_v62, %v5925_v58  ;;  %v1471_v62 = vmul.f32 %v5804_v60, %v5778_v35 }
 0x3bb   : > { %v5988_v63 = vpop.f32.mrf.mxu1 }
 0x3c3   : > { %v5990_v0 = vpop.f32.mrf.mxu1 }
 0x3cb   : > { %v1292_v16 = vpop.f32.mrf.mxu1 }
 0x3cc   : > { %v1297_v18 = vmul.f32 0.35355338, %v1292_v16 }
 0x3ce   : > { %v5993_v20 = vadd.f32 %v1297_v18, %v5918_v52  ;;  %v1233_v18 = vsub.f32 %v5947_v44, %v1229_v14 }
 0x3d0   : > { %v1301_v1 = vsel %vm1080_vm2, %v5993_v20, -inf }
 0x3d1   : > { %1302 = vmax.xlane.f32.xlu2 %v1301_v1  ;;  %v1235_v1 = vmul.f32 1.442695, %v1233_v18 }
 0x3d3   : > { %v1294_v2 = vpop.f32.mrf.mxu1 }
 0x3d4   : > { %v1298_v8 = vmul.f32 0.35355338, %v1294_v2 }
 0x3d6   : > { %v6001_v40 = vadd.f32 %v1298_v8, %v5925_v58 }
 0x3d8   : > { %v1304_v26 = vsel %vm1080_vm2, %v6001_v40, -inf }
 0x3d9   : > { %1376 = vmax.xlane.f32.xlu2 %v1375_v24  ;;  %1305 = vmax.xlane.f32.xlu1 %v1304_v26 }
 0x3db   : > { %v1440_v30 = vpop.f32.mrf.mxu1 }
 0x3dc   : > { %v1445_v22 = vmul.f32 0.35355338, %v1440_v30 }
 0x3de   : > { %v6012_v33 = vadd.f32 %v1445_v22, %v5918_v52 }
 0x3e0   : > { %v1449_v34 = vsel %vm1080_vm2, %v6012_v33, -inf }
 0x3e1   : > { %1450 = vmax.xlane.f32.xlu2 %v1449_v34  ;;  %1379 = vmax.xlane.f32.xlu1 %v1378_v36 }
 0x3e3   : > { %v1442_v39 = vpop.f32.mrf.mxu1 }
 0x3e4   : > { %v1446_v41 = vmul.f32 0.35355338, %v1442_v39 }
 0x3e6   : > { %v6022_v43 = vadd.f32 %v1446_v41, %v5925_v58 }
 0x3e8   : > { %v1452_v45 = vsel %vm1080_vm2, %v6022_v43, -inf }
 0x3e9   : > { %1094 = vadd.xlane.f32.xlu2 %v1093_v21  ;;  %1453 = vmax.xlane.f32.xlu1 %v1452_v45 }
 0x3eb   : > { %v1588_v48 = vpop.f32.mrf.mxu1 }
 0x3ec   : > { %v1593_v49 = vmul.f32 0.35355338, %v1588_v48 }
 0x3ee   : > { %v6031_v51 = vadd.f32 %v1593_v49, %v5918_v52  ;;  %v1526_v52 = vsel %vm1080_vm2, %v6048_v13, -inf }
 0x3f0   : > { %v1597_v54 = vsel %vm1080_vm2, %v6031_v51, -inf }
 0x3f1   : > { %1598 = vmax.xlane.f32.xlu2 %v1597_v54  ;;  %1097 = vadd.xlane.f32.xlu1 %v1096_v55 }
 0x3f3   : > { %v1590_v56 = vpop.f32.mrf.mxu1 }
 0x3f4   : > { %v1594_v19 = vmul.f32 0.35355338, %v1590_v56 }
 0x3f6   : > { %v6041_v25 = vadd.f32 %v1594_v19, %v5925_v58 }
 0x3f8   : > { %v1600_v59 = vsel %vm1080_vm2, %v6041_v25, -inf }
 0x3f9   : > { %1524 = vmax.xlane.f32.xlu2 %v1523_v12  ;;  %1601 = vmax.xlane.f32.xlu1 %v1600_v59 }
 0x401   : > { %1527 = vmax.xlane.f32.xlu1 %v1526_v52 }
 0x444   : > { %v1303_v4 = vpop.xlane.xlu2 %1302 }
 0x445   : > { %v1307_v16 = vsub.f32 %v5993_v20, %v1303_v4  ;;  %v1237_v20 = vmul.f32 1.442695, %v1234_v17 }
 0x447   : > { %v1309_v27 = vmul.f32 1.442695, %v1307_v16 }
 0x449   : > { %5374 = vpow2.f32 %v1309_v27 }
 0x44a   : > { %5376 = vpow2.f32 %v1235_v1 }
 0x44c   : > { %v1377_v2 = vpop.xlane.xlu2 %1376  ;;  %v1306_v5 = vpop.xlane.xlu1 %1305 }
 0x44d   : > { %v1308_v8 = vsub.f32 %v6001_v40, %v1306_v5  ;;  %v1381_v40 = vsub.f32 %v5998_v9, %v1377_v2 }
 0x44f   : > { %v6055_v58 = vpop.eup %5374  ;;  %v1311_v10 = vmul.f32 1.442695, %v1308_v8  ;;  %v1383_v11 = vmul.f32 1.442695, %v1381_v40 }
 0x450   : > { %v1313_v23 = vsel %vm1080_vm2, %v6055_v58, 0.0  ;;  %v6060_v26 = vpop.eup %5376 }
 0x451   : > { %1314 = vadd.xlane.f32.xlu2 %v1313_v23  ;;  %5378 = vpow2.f32 %v1311_v10  ;;  %v1239_v29 = vsel %vm1080_vm2, %v6060_v26, 0.0 }
 0x452   : > { %5380 = vpow2.f32 %v1237_v20 }
 0x454   : > { %v1451_v44 = vpop.xlane.xlu2 %1450  ;;  %v1380_v24 = vpop.xlane.xlu1 %1379 }
 0x455   : > { %v1455_v28 = vsub.f32 %v6012_v33, %v1451_v44  ;;  %v1382_v41 = vsub.f32 %v6009_v32, %v1380_v24 }
 0x457   : > { %v1457_v30 = vmul.f32 1.442695, %v1455_v28  ;;  %v6064_v31 = vpop.eup %5378  ;;  %v1385_v46 = vmul.f32 1.442695, %v1382_v41 }
 0x458   : > { %v1316_v22 = vsel %vm1080_vm2, %v6064_v31, 0.0  ;;  %v6071_v38 = vpop.eup %5380 }
 0x459   : > { %5382 = vpow2.f32 %v1457_v30  ;;  %1240 = vadd.xlane.f32.xlu2 %v1239_v29  ;;  %1317 = vadd.xlane.f32.xlu1 %v1316_v22  ;;  %v1242_v45 = vsel %vm1080_vm2, %v6071_v38, 0.0  ;;  %v1619_v22 = vmul.f32 %v5822_v3, %v5778_v35 }
 0x45a   : > { %5384 = vpow2.f32 %v1383_v11  ;;  %v1620_v11 = vmul.f32 %v5822_v3, %v5785_v37  ;;  %v1546_v3 = vmul.f32 %v5908_v47, %v5785_v37 }
 0x45c   : > { %v1095_v34 = vpop.xlane.xlu2 %1094  ;;  %v1454_v36 = vpop.xlane.xlu1 %1453  ;;  %v1621_v41 = vpack.c.bf16 %v1620_v11, %v1619_v22 }
 0x45d   : > { %v1456_v33 = vsub.f32 %v6022_v43, %v1454_v36 }
 0x45f   : > { %v6073_v9 = vpop.eup %5382  ;;  %v1459_v39 = vmul.f32 1.442695, %v1456_v33 }
 0x460   : > { %v1461_v21 = vsel %vm1080_vm2, %v6073_v9, 0.0  ;;  %v6080_v49 = vpop.eup %5384 }
 0x461   : > { %5386 = vpow2.f32 %v1459_v39  ;;  %1462 = vadd.xlane.f32.xlu2 %v1461_v21  ;;  %1243 = vadd.xlane.f32.xlu1 %v1242_v45  ;;  %v1387_v55 = vsel %vm1080_vm2, %v6080_v49, 0.0 }
 0x462   : > { %5388 = vrcp.f32 %v1095_v34 }
 0x464   : > { %v1599_v43 = vpop.xlane.xlu2 %1598  ;;  %v1098_v48 = vpop.xlane.xlu1 %1097 }
 0x465   : > { %v1603_v53 = vsub.f32 %v6031_v51, %v1599_v43  ;;  %5390 = vrcp.f32 %v1098_v48  ;;  %v1472_v51 = vmul.f32 %v5804_v60, %v5785_v37 }
 0x466   : > { %5392 = vpow2.f32 %v1385_v46  ;;  %v1545_v46 = vmul.f32 %v5908_v47, %v5778_v35 }
 0x467   : > { %v6083_v54 = vpop.eup %5386  ;;  %v1605_v32 = vmul.f32 1.442695, %v1603_v53  ;;  %v1473_v5 = vpack.c.bf16 %v1472_v51, %v1471_v62 }
 0x468   : > { %v1464_v56 = vsel %vm1080_vm2, %v6083_v54, 0.0  ;;  %v5389_v19 = vpop.eup %5388 }
 0x469   : > { %5394 = vpow2.f32 %v1605_v32  ;;  %1388 = vadd.xlane.f32.xlu2 %v1387_v55  ;;  %1465 = vadd.xlane.f32.xlu1 %v1464_v56  ;;  %v1101_v12 = vmul.f32 %v5389_v19, %v6019_v42  ;;  %v1547_v32 = vpack.c.bf16 %v1546_v3, %v1545_v46 }
 0x46b   : > { %v5391_v61 = vpop.eup %5390 }
 0x46c   : > { %v1102_v59 = vmul.f32 %v5391_v61, %v6028_v50  ;;  %v1525_v52 = vpop.xlane.xlu2 %1524  ;;  %v1602_v14 = vpop.xlane.xlu1 %1601 }
 0x46d   : > { %v1529_v15 = vsub.f32 %v6038_v57, %v1525_v52  ;;  %v1604_v4 = vsub.f32 %v6041_v25, %v1602_v14  ;;  %v6097_v16 = vpop.eup %5392 }
 0x46e   : > { %v1108_v18 = vpack.c.bf16 %v1102_v59, %v1101_v12  ;;  %v1390_v42 = vsel %vm1080_vm2, %v6097_v16, 0.0 }
 0x46f   : > { %v6099_v27 = vpop.eup %5394  ;;  %v1531_v1 = vmul.f32 1.442695, %v1529_v15  ;;  %v1607_v2 = vmul.f32 1.442695, %v1604_v4 }
 0x470   : > { %4302 = vmatmul.msk.bf16.vlgmr.msrb.gmra.mxu2 %vm1080_vm2, %v1108_v18  ;;  %v1609_v60 = vsel %vm1080_vm2, %v6099_v27, 0.0 }
 0x471   : > { %5396 = vpow2.f32 %v1531_v1  ;;  %1485 = vmatpush.bf16.msrb.mxu2 %v1473_v5  ;;  %1610 = vadd.xlane.f32.xlu2 %v1609_v60 }
 0x472   : > { %5398 = vpow2.f32 %v1607_v2  ;;  %1391 = vadd.xlane.f32.xlu1 %v1390_v42 }
 0x474   : > { %v1528_v50 = vpop.xlane.xlu1 %1527 }
 0x475   : > { %v1530_v57 = vsub.f32 %v6048_v13, %v1528_v50  ;;  %v5141_v50 = vld [vmem:[%s5689_s26 + $0x18] sm:$0xff] }
 0x476   : > { %1686 = vmatpush.bf16.msra.mxu3 %v5141_v50 }
 0x477   : > { %v6107_v25 = vpop.eup %5396  ;;  %v1533_v8 = vmul.f32 1.442695, %v1530_v57 }
 0x478   : > { %v6109_v10 = vpop.eup %5398  ;;  %v1535_v17 = vsel %vm1080_vm2, %v6107_v25, 0.0 }
 0x479   : > { %5400 = vpow2.f32 %v1533_v8  ;;  %1536 = vadd.xlane.f32.xlu2 %v1535_v17  ;;  %v1612_v23 = vsel %vm1080_vm2, %v6109_v10, 0.0  ;;  %v5140_v8 = vld [vmem:[%s5689_s26 + $0x10] sm:$0xff]  ;;  %v5139_v17 = vld [vmem:[%s5689_s26 + $0x8] sm:$0xff] }
 0x47a   : > { %1613 = vadd.xlane.f32.xlu1 %v1612_v23  ;;  %1687 = vmatpush.bf16.msra.mxu3 %v5140_v8  ;;  %v4536_v8 = vld [vmem:[%s5707_s25 + $0x1c8] sm:$0xf0] }
 0x47e   : > { %1688 = vmatpush.bf16.msra.mxu3 %v5139_v17  ;;  %v4462_v17 = vld [vmem:[%s5707_s25 + $0x100] sm:$0xf] }
 0x47f   : > { %v6115_v20 = vpop.eup %5400 }
 0x480   : > { %v1538_v44 = vsel %vm1080_vm2, %v6115_v20, 0.0 }
 0x482   : > { %1539 = vadd.xlane.f32.xlu1 %v1538_v44  ;;  %v5138_v44 = vld [vmem:[%s5689_s26] sm:$0xff] }
 0x483   : > { %1689 = vmatpush.bf16.msra.mxu3 %v5138_v44  ;;  %v5174_v44 = vld [vmem:[%s5707_s25 + $0x104] sm:$0xf] }
 0x4c4   : > { %v1315_v13 = vpop.xlane.xlu2 %1314 }
 0x4c5   : > { %5402 = vrcp.f32 %v1315_v13 }
 0x4cb   : > { %v5403_v40 = vpop.eup %5402 }
 0x4cc   : > { %v1241_v24 = vpop.xlane.xlu2 %1240  ;;  %v1318_v28 = vpop.xlane.xlu1 %1317  ;;  %v1321_v34 = vmul.f32 %v5403_v40, %v6055_v58 }
 0x4cd   : > { %5404 = vrcp.f32 %v1318_v28 }
 0x4ce   : > { %5406 = vrcp.f32 %v1241_v24 }
 0x4d3   : > { %v5405_v30 = vpop.eup %5404 }
 0x4d4   : > { %v1463_v29 = vpop.xlane.xlu2 %1462  ;;  %v1322_v36 = vmul.f32 %v5405_v30, %v6064_v31  ;;  %v1244_v33 = vpop.xlane.xlu1 %1243 }
 0x4d5   : > { %5408 = vrcp.f32 %v1244_v33  ;;  %v5407_v21 = vpop.eup %5406 }
 0x4d6   : > { %v1326_v39 = vpack.c.bf16 %v1322_v36, %v1321_v34  ;;  %5410 = vrcp.f32 %v1463_v29  ;;  %v1247_v58 = vmul.f32 %v5407_v21, %v6060_v26 }
 0x4d8   : > { %4306 = vmatmul.msk.bf16.vlgmr.msra.gmra.mxu2 %vm1080_vm2, %v1326_v39 }
 0x4d9   : > { %1633 = vmatpush.bf16.msra.mxu2 %v1621_v41 }
 0x4db   : > { %v5409_v45 = vpop.eup %5408 }
 0x4dc   : > { %v1248_v31 = vmul.f32 %v5409_v45, %v6071_v38  ;;  %v1389_v43 = vpop.xlane.xlu2 %1388  ;;  %v1466_v48 = vpop.xlane.xlu1 %1465 }
 0x4dd   : > { %5412 = vrcp.f32 %v1466_v48  ;;  %v5411_v55 = vpop.eup %5410 }
 0x4de   : > { %v1252_v53 = vpack.c.bf16 %v1248_v31, %v1247_v58  ;;  %5414 = vrcp.f32 %v1389_v43  ;;  %v1469_v35 = vmul.f32 %v5411_v55, %v6073_v9 }
 0x4e0   : > { %4304 = vmatmul.msk.bf16.vlgmr.msra.gmra.mxu0 %vm1080_vm2, %v1252_v53 }
 0x4e1   : > { %1559 = vmatpush.bf16.msra.mxu0 %v1547_v32 }
 0x4e3   : > { %v5413_v56 = vpop.eup %5412 }
 0x4e4   : > { %v1470_v19 = vmul.f32 %v5413_v56, %v6083_v54  ;;  %v1611_v26 = vpop.xlane.xlu2 %1610  ;;  %v5415_v38 = vpop.eup %5414 }
 0x4e5   : > { %v1392_v37 = vpop.xlane.xlu1 %1391  ;;  %v1395_v62 = vmul.f32 %v5415_v38, %v6080_v49 }
 0x4e6   : > { %5416 = vrcp.f32 %v1392_v37  ;;  %v1474_v47 = vpack.c.bf16 %v1470_v19, %v1469_v35 }
 0x4e7   : > { %5418 = vrcp.f32 %v1611_v26 }
 0x4e8   : > { %4310 = vmatmul.msk.bf16.vlgmr.msrb.gmra.mxu2 %vm1080_vm2, %v1474_v47  ;;  %v5540_v47 = vmov 64.0  }
 0x4ec   : > { %v5417_v61 = vpop.eup %5416  ;;  %v1537_v52 = vpop.xlane.xlu2 %1536 }
 0x4ed   : > { %v1396_v51 = vmul.f32 %v5417_v61, %v6097_v16  ;;  %v1614_v12 = vpop.xlane.xlu1 %1613  ;;  %v5419_v9 = vpop.eup %5418 }
 0x4ee   : > { %5420 = vrcp.f32 %v1614_v12  ;;  %v1617_v14 = vmul.f32 %v5419_v9, %v6099_v27 }
 0x4ef   : > { %v1400_v59 = vpack.c.bf16 %v1396_v51, %v1395_v62  ;;  %5422 = vrcp.f32 %v1537_v52 }
 0x4f1   : > { %4308 = vmatmul.msk.bf16.vlgmr.msrb.gmra.mxu0 %vm1080_vm2, %v1400_v59 }
 0x4f3   : > { %v1193_v27 = vpop.f32.mrf.mxu2 }
 0x4f4   : > { %v5421_v54 = vpop.eup %5420  ;;  %v1194_v28 = vadd.f32 %v1193_v27, %v5988_v63  ;;  %v4534_v27 = vld [vmem:[%s5707_s25 + $0x188] sm:$0xf] }
 0x4f5   : > { %v1618_v15 = vmul.f32 %v5421_v54, %v6109_v10  ;;  %v1540_v4 = vpop.xlane.xlu1 %1539  ;;  %v5423_v16 = vpop.eup %5422 }
 0x4f6   : > { %5424 = vrcp.f32 %v1540_v4  ;;  %v1543_v1 = vmul.f32 %v5423_v16, %v6107_v25  ;;  %v4526_v16 = vld [vmem:[%s5707_s25 + $0x180] sm:$0xf] }
 0x4f7   : > { %v1622_v49 = vpack.c.bf16 %v1618_v15, %v1617_v14  ;;  %5426 = vrcp.f32 %v5540_v47  ;;  %v5143_v47 = vld [vmem:[%s5707_s25 + $0xc] sm:$0xf] }
 0x4f9   : > { %4314 = vmatmul.msk.bf16.vlgmr.msra.gmra.mxu2 %vm1080_vm2, %v1622_v49 }
 0x4fb   : > { %v1195_v60 = vpop.f32.mrf.mxu2 }
 0x4fc   : > { %v5425_v18 = vpop.eup %5424  ;;  %v1196_v40 = vadd.f32 %v1195_v60, %v5990_v0  ;;  %v5356_v0 = vld [vmem:[%s6890_s23] ss:$0 sm:$0xff]  ;;  %v5199_v60 = vld [vmem:[%s5707_s25 + $0x1c4] sm:$0xf0]  ;;  %s5542_s23 = smov 128  }
 0x4fd   : > { %v1544_v2 = vmul.f32 %v5425_v18, %v6115_v20  ;;  %v5427_v26 = vpop.eup %5426  ;;  %v5198_v18 = vld [vmem:[%s5707_s25 + $0x1bc] sm:$0xf0]  ;;  %v4535_v50 = vor.u32 %v5199_v60, %v4534_v27  ;;  %v5184_v27 = vld [vmem:[%s5707_s25 + $0x14c] sm:$0xf0]  ;;  %v5176_v60 = vld [vmem:[%s5707_s25 + $0x114] sm:$0xf] }
 0x4fe   : > { %v1707_v38 = vmul.f32 64.0, %v5427_v26  ;;  %vm1711_vm3 = vweird.f32 %v5427_v26 }
 0x4ff   : > { %v1548_v5 = vpack.c.bf16 %v1544_v2, %v1543_v1  ;;  %v5190_v1 = vld [vmem:[%s5707_s25 + $0x184] sm:$0xf]  ;;  %v4527_v2 = vor.u32 %v5198_v18, %v4526_v16  ;;  %2217 = vmatpush.bf16.msrb.mxu2 %v4535_v50  ;;  %v5193_v16 = vld [vmem:[%s5707_s25 + $0x19c] sm:$0xf] }
 0x500   : > { %v1708_v61 = vsub.f32 1.0, %v1707_v38  ;;  %v4552_v18 = vld [vmem:[%s5707_s25 + $0x1d8] sm:$0xf0] }
 0x501   : > { %4312 = vmatmul.msk.bf16.vlgmr.msra.gmra.mxu0 %vm1080_vm2, %v1548_v5  ;;  %v4528_v5 = vld [vmem:[%s5707_s25 + $0x1c0] sm:$0xf0] }
 0x502   : > { %v1709_v62 = vmul.f32 %v5427_v26, %v1708_v61  ;;  %2189 = vmatpush.bf16.msrb.mxu0 %v4527_v2 }
 0x504   : > { %v1710_v51 = vadd.f32 %v5427_v26, %v1709_v62  ;;  %v4542_v62 = vld [vmem:[%s5707_s25 + $0x190] sm:$0xf] }
 0x55b   : > { %v1339_v42 = vpop.f32.mrf.mxu2 }
 0x55d   : > { %v1265_v57 = vpop.f32.mrf.mxu0 }
 0x55e   : > { %v1270_v30 = vadd.f32 %v1265_v57, %v1194_v28  ;;  %v5191_v57 = vld [vmem:[%s5707_s25 + $0x18c] sm:$0xf] }
 0x560   : > { %v1344_v22 = vadd.f32 %v1339_v42, %v1270_v30  ;;  %v4531_v42 = vor.u32 %v5190_v1, %v4528_v5  ;;  %v5175_v30 = vld [vmem:[%s5707_s25 + $0x10c] sm:$0xf]  ;;  %v4478_v1 = vld [vmem:[%s5707_s25 + $0x110] sm:$0xf]  ;;  %v4555_v5 = vor.u32 %v5193_v16, %v4552_v18  ;;  %v4558_v16 = vld [vmem:[%s5707_s25 + $0x1a0] sm:$0xf] }
 0x561   : > { %v4479_v50 = vor.u32 %v5184_v27, %v4478_v1  ;;  %v5194_v18 = vld [vmem:[%s5707_s25 + $0x1a4] sm:$0xf] }
 0x562   : > { %2203 = vmatpush.bf16.msrb.mxu1 %v4531_v42  ;;  %v4480_v42 = vld [vmem:[%s5707_s25 + $0x150] sm:$0xf0]  ;;  %v4560_v1 = vld [vmem:[%s5707_s25 + $0x1e0] sm:$0xf0] }
 0x563   : > { %v1341_v10 = vpop.f32.mrf.mxu2 }
 0x565   : > { %v1267_v23 = vpop.f32.mrf.mxu0 }
 0x566   : > { %v1271_v29 = vadd.f32 %v1267_v23, %v1196_v40  ;;  %v5182_v23 = vld [vmem:[%s5707_s25 + $0x13c] sm:$0xf0] }
 0x568   : > { %v1345_v33 = vadd.f32 %v1341_v10, %v1271_v29  ;;  %v4539_v10 = vor.u32 %v5191_v57, %v4536_v8  ;;  %v4472_v29 = vld [vmem:[%s5707_s25 + $0x148] sm:$0xf0]  ;;  %v4483_v57 = vor.u32 %v5176_v60, %v4480_v42  ;;  %v4486_v8 = vld [vmem:[%s5707_s25 + $0x118] sm:$0xf]  ;;  %v5203_v60 = vld [vmem:[%s5707_s25 + $0x1e4] sm:$0xf0] }
 0x569   : > { %v5195_v42 = vld [vmem:[%s5707_s25 + $0x1ac] sm:$0xf] }
 0x56a   : > { %2231 = vmatpush.bf16.msrb.mxu3 %v4539_v10  ;;  %v5185_v10 = vld [vmem:[%s5707_s25 + $0x154] sm:$0xf0] }
 0x56b   : > { %v1487_v25 = vpop.f32.mrf.mxu2 }
 0x56e   : > { %v1413_v13 = vpop.f32.mrf.mxu0 }
 0x56f   : > { %v1418_v36 = vadd.f32 %v1413_v13, %v1344_v22  ;;  %v4464_v13 = vld [vmem:[%s5707_s25 + $0x140] sm:$0xf0]  ;;  %v4475_v22 = vor.u32 %v5175_v30, %v4472_v29  ;;  %v5160_v30 = vld [vmem:[%s5707_s25 + $0x94] sm:$0xf] }
 0x570   : > { %v4467_v28 = vor.u32 %v5174_v44, %v4464_v13  ;;  %v4488_v13 = vld [vmem:[%s5707_s25 + $0x158] sm:$0xf0]  ;;  %v4416_v29 = vld [vmem:[%s5707_s25 + $0xd0] sm:$0xf0] }
 0x571   : > { %v1492_v41 = vadd.f32 %v1487_v25, %v1418_v36  ;;  %v4463_v25 = vor.u32 %v5182_v23, %v4462_v17  ;;  %v5158_v36 = vld [vmem:[%s5707_s25 + $0x84] sm:$0xf]  ;;  %2232 = vmatpush.bf16.msrb.mxu3 %v4475_v22  ;;  %v5177_v17 = vld [vmem:[%s5707_s25 + $0x11c] sm:$0xf] }
 0x572   : > { %2204 = vmatpush.bf16.msrb.mxu1 %v4467_v28  ;;  %v4491_v28 = vor.u32 %v5177_v17, %v4488_v13  ;;  %v5186_v17 = vld [vmem:[%s5707_s25 + $0x15c] sm:$0xf0]  ;;  %v4496_v13 = vld [vmem:[%s5707_s25 + $0x160] sm:$0xf0] }
 0x573   : > { %v1489_v20 = vpop.f32.mrf.mxu2  ;;  %2190 = vmatpush.bf16.msrb.mxu0 %v4463_v25  ;;  %v4487_v25 = vor.u32 %v5185_v10, %v4486_v8  ;;  %v4563_v8 = vor.u32 %v5194_v18, %v4560_v1  ;;  %v4494_v10 = vld [vmem:[%s5707_s25 + $0x120] sm:$0xf]  ;;  %v5180_v18 = vld [vmem:[%s5707_s25 + $0x134] sm:$0xf] }
 0x574   : > { %v4512_v1 = vld [vmem:[%s5707_s25 + $0x170] sm:$0xf0] }
 0x576   : > { %v1415_v24 = vpop.f32.mrf.mxu0 }
 0x577   : > { %v1419_v39 = vadd.f32 %v1415_v24, %v1345_v33  ;;  %v5183_v24 = vld [vmem:[%s5707_s25 + $0x144] sm:$0xf0] }
 0x579   : > { %v1493_v45 = vadd.f32 %v1489_v20, %v1419_v39  ;;  %v4470_v20 = vld [vmem:[%s5707_s25 + $0x108] sm:$0xf]  ;;  %v4400_v39 = vld [vmem:[%s5707_s25 + $0xc0] sm:$0xf0] }
 0x57a   : > { %v4471_v40 = vor.u32 %v5183_v24, %v4470_v20  ;;  %v4414_v20 = vld [vmem:[%s5707_s25 + $0x90] sm:$0xf] }
 0x57c   : > { %v1635_v11 = vpop.f32.mrf.mxu2  ;;  %2218 = vmatpush.bf16.msrb.mxu2 %v4471_v40  ;;  %v5168_v40 = vld [vmem:[%s5707_s25 + $0xcc] sm:$0xf0] }
 0x57d   : > { %v4415_v22 = vor.u32 %v5168_v40, %v4414_v20  ;;  %v4502_v20 = vld [vmem:[%s5707_s25 + $0x128] sm:$0xf]  ;;  %v4504_v40 = vld [vmem:[%s5707_s25 + $0x168] sm:$0xf0] }
 0x57e   : > { %v1561_v34 = vpop.f32.mrf.mxu0 }
 0x57f   : > { %v1566_v21 = vadd.f32 %v1561_v34, %v1492_v41  ;;  %v5166_v34 = vld [vmem:[%s5707_s25 + $0xbc] sm:$0xf0]  ;;  %v4406_v41 = vld [vmem:[%s5707_s25 + $0x88] sm:$0xf] }
 0x581   : > { %v1640_v31 = vadd.f32 %v1635_v11, %v1566_v21  ;;  %v4398_v11 = vld [vmem:[%s5707_s25 + $0x80] sm:$0xf]  ;;  %v5167_v21 = vld [vmem:[%s5707_s25 + $0xc4] sm:$0xf0] }
 0x582   : > { %v4399_v33 = vor.u32 %v5166_v34, %v4398_v11  ;;  %v4422_v11 = vld [vmem:[%s5707_s25 + $0x98] sm:$0xf] }
 0x583   : > { %v5169_v34 = vld [vmem:[%s5707_s25 + $0xd4] sm:$0xf0] }
 0x584   : > { %v1637_v58 = vpop.f32.mrf.mxu2  ;;  %2191 = vmatpush.bf16.msrb.mxu0 %v4399_v33  ;;  %v4419_v33 = vor.u32 %v5160_v30, %v4416_v29  ;;  %v4495_v30 = vor.u32 %v5186_v17, %v4494_v10  ;;  %v4446_v10 = vld [vmem:[%s5707_s25 + $0xb0] sm:$0xf] }
 0x585   : > { %v5172_v17 = vld [vmem:[%s5707_s25 + $0xec] sm:$0xf0] }
 0x586   : > { %v1563_v46 = vpop.f32.mrf.mxu0 }
 0x587   : > { %v1567_v3 = vadd.f32 %v1563_v46, %v1493_v45  ;;  %v4403_v46 = vor.u32 %v5158_v36, %v4400_v39  ;;  %v4423_v39 = vor.u32 %v5169_v34, %v4422_v11  ;;  %v5170_v11 = vld [vmem:[%s5707_s25 + $0xdc] sm:$0xf0] }
 0x589   : > { %v1641_v43 = vadd.f32 %v1637_v58, %v1567_v3  ;;  %v4407_v3 = vor.u32 %v5167_v21, %v4406_v41  ;;  %v5159_v58 = vld [vmem:[%s5707_s25 + $0x8c] sm:$0xf]  ;;  %2205 = vmatpush.bf16.msrb.mxu1 %v4403_v46  ;;  %v5161_v41 = vld [vmem:[%s5707_s25 + $0x9c] sm:$0xf] }
 0x58a   : > { %v4424_v21 = vld [vmem:[%s5707_s25 + $0xd8] sm:$0xf0] }
 0x58b   : > { %v1642_v63 = vpack.c.bf16 %v1641_v43, %v1640_v31  ;;  %v4408_v31 = vld [vmem:[%s5707_s25 + $0xc8] sm:$0xf0]  ;;  %2219 = vmatpush.bf16.msrb.mxu2 %v4407_v3  ;;  %v4427_v46 = vor.u32 %v5161_v41, %v4424_v21  ;;  %v5152_v3 = vld [vmem:[%s5707_s25 + $0x4c] sm:$0xf0]  ;;  %v4438_v41 = vld [vmem:[%s5707_s25 + $0xa8] sm:$0xf] }
 0x58c   : > { %v5171_v21 = vld [vmem:[%s5707_s25 + $0xe4] sm:$0xf0] }
 0x58d   : > { %4331 = vmatmul.msk.bf16.vlgmr.msra.gmra.mxu3 %vm891_vm1, %v1642_v63  ;;  %v4411_v63 = vor.u32 %v5159_v58, %v4408_v31  ;;  %v5144_v58 = vld [vmem:[%s5707_s25 + $0x14] sm:$0xf] }
 0x58e   : > { %v4352_v31 = vld [vmem:[%s5707_s25 + $0x50] sm:$0xf0] }
 0x58f   : > { %2233 = vmatpush.bf16.msrb.mxu3 %v4411_v63  ;;  %v4358_v63 = vld [vmem:[%s5707_s25 + $0x18] sm:$0xf] }
 0x610   : > { %v1691_v48 = vpop.f32.mrf.mxu3 }
 0x611   : > { %v1692_v53 = vadd.f32 %v5356_v0, %v1691_v48  ;;  %v5150_v48 = vld [vmem:[%s5707_s25 + $0x3c] sm:$0xf0] }
 0x613   : > { %v1696_v32 = vadd.f32 %v1692_v53, %v5744_v6  ;;  %v6161_v6 = vsel %vm1711_vm3, %v5427_v26, %v1710_v51  ;;  %v5142_v53 = vld [vmem:[%s5707_s25 + $0x4] sm:$0xf]  ;;  %v4344_v26 = vld [vmem:[%s5707_s25 + $0x48] sm:$0xf0]  ;;  %v5200_v51 = vld [vmem:[%s5707_s25 + $0x1cc] sm:$0xf0] }
 0x614   : > { %v4347_v61 = vor.u32 %v5143_v47, %v4344_v26 }
 0x615   : > { %v1700_v55 = vsel %vm891_vm1, %v1696_v32, 0.0 }
 0x616   : > { %1701 = vadd.xlane.f32.xlu2 %v1700_v55  ;;  %2234 = vmatpush.bf16.msrb.mxu3 %v4347_v61 }
 0x618   : > { %v1693_v56 = vpop.f32.mrf.mxu3 }
 0x619   : > { %v1694_v35 = vadd.f32 %v5356_v0, %v1693_v56  ;;  %v4334_v0 = vld [vmem:[%s5707_s25] sm:$0xf]  ;;  %v4336_v56 = vld [vmem:[%s5707_s25 + $0x40] sm:$0xf0] }
 0x61a   : > { %v4335_v55 = vor.u32 %v5150_v48, %v4334_v0  ;;  %2287 = vmatpush.bf16.msra.mxu3 %v4555_v5  ;;  %v5153_v0 = vld [vmem:[%s5707_s25 + $0x54] sm:$0xf0] }
 0x61b   : > { %v1697_v19 = vadd.f32 %v1694_v35, %v5746_v7  ;;  %v4342_v35 = vld [vmem:[%s5707_s25 + $0x8] sm:$0xf] }
 0x61c   : > { %2192 = vmatpush.bf16.msrb.mxu0 %v4335_v55  ;;  %v4360_v55 = vld [vmem:[%s5707_s25 + $0x58] sm:$0xf0] }
 0x61d   : > { %v1703_v37 = vsel %vm891_vm1, %v1697_v19, 0.0 }
 0x61e   : > { %1704 = vadd.xlane.f32.xlu1 %v1703_v37  ;;  %v5151_v37 = vld [vmem:[%s5707_s25 + $0x44] sm:$0xf0]  ;;  %2288 = vmatpush.bf16.msra.mxu3 %v4491_v28  ;;  %v5179_v28 = vld [vmem:[%s5707_s25 + $0x12c] sm:$0xf] }
 0x61f   : > { %v4343_v38 = vor.u32 %v5151_v37, %v4342_v35  ;;  %v4355_v35 = vor.u32 %v5144_v58, %v4352_v31  ;;  %v4366_v31 = vld [vmem:[%s5707_s25 + $0x20] sm:$0xf] }
 0x621   : > { %2220 = vmatpush.bf16.msrb.mxu2 %v4343_v38 }
 0x622   : > { %2289 = vmatpush.bf16.msra.mxu3 %v4427_v46  ;;  %v4440_v46 = vld [vmem:[%s5707_s25 + $0xe8] sm:$0xf0] }
 0x689   : > { %v1702_v12 = vpop.xlane.xlu2 %1701 }
 0x68a   : > { %v1713_v7 = vmul.f32 %v6161_v6, %v1702_v12  ;;  %v5192_v12 = vld [vmem:[%s5707_s25 + $0x194] sm:$0xf] }
 0x68c   : > { %v6164_v59 = vsub.f32 %v1696_v32, %v1713_v7  ;;  %v4543_v7 = vor.u32 %v5200_v51, %v4542_v62 }
 0x68e   : > { %v1717_v52 = vmul.f32 %v6164_v59, %v6164_v59  ;;  %2245 = vmatpush.bf16.msra.mxu0 %v4543_v7 }
 0x690   : > { %v1719_v9 = vsel %vm891_vm1, %v1717_v52, 0.0  ;;  %v4544_v52 = vld [vmem:[%s5707_s25 + $0x1d0] sm:$0xf0] }
 0x691   : > { %v1705_v54 = vpop.xlane.xlu1 %1704  ;;  %1720 = vadd.xlane.f32.xlu2 %v1719_v9  ;;  %v4550_v9 = vld [vmem:[%s5707_s25 + $0x198] sm:$0xf] }
 0x692   : > { %v1714_v14 = vmul.f32 %v6161_v6, %v1705_v54  ;;  %v5201_v54 = vld [vmem:[%s5707_s25 + $0x1d4] sm:$0xf0]  ;;  %2246 = vmatpush.bf16.msra.mxu0 %v4479_v50 }
 0x694   : > { %v6170_v15 = vsub.f32 %v1697_v19, %v1714_v14  ;;  %v4339_v19 = vor.u32 %v5142_v53, %v4336_v56  ;;  %v5145_v53 = vld [vmem:[%s5707_s25 + $0x1c] sm:$0xf] }
 0x695   : > { %v4363_v47 = vor.u32 %v5145_v53, %v4360_v55  ;;  %v4368_v53 = vld [vmem:[%s5707_s25 + $0x60] sm:$0xf0]  ;;  %v4374_v55 = vld [vmem:[%s5707_s25 + $0x28] sm:$0xf] }
 0x696   : > { %v1718_v4 = vmul.f32 %v6170_v15, %v6170_v15  ;;  %2206 = vmatpush.bf16.msrb.mxu1 %v4339_v19  ;;  %2247 = vmatpush.bf16.msra.mxu0 %v4415_v22  ;;  %v4359_v19 = vor.u32 %v5153_v0, %v4358_v63  ;;  %v4430_v22 = vld [vmem:[%s5707_s25 + $0xa0] sm:$0xf]  ;;  %v4439_v63 = vor.u32 %v5171_v21, %v4438_v41  ;;  %v4390_v41 = vld [vmem:[%s5707_s25 + $0x38] sm:$0xf] }
 0x697   : > { %2290 = vmatpush.bf16.msra.mxu3 %v4363_v47  ;;  %v5157_v21 = vld [vmem:[%s5707_s25 + $0x74] sm:$0xf0] }
 0x698   : > { %v1722_v49 = vsel %vm891_vm1, %v1718_v4, 0.0  ;;  %v4547_v4 = vor.u32 %v5192_v12, %v4544_v52 }
 0x699   : > { %1723 = vadd.xlane.f32.xlu1 %v1722_v49  ;;  %v4551_v49 = vor.u32 %v5201_v54, %v4550_v9  ;;  %v5358_v54 = vld [vmem:[%s6892_s9] ss:$0 sm:$0xff] }
 0x69a   : > { %2259 = vmatpush.bf16.msra.mxu1 %v4547_v4 }
 0x69b   : > { %2273 = vmatpush.bf16.msra.mxu2 %v4551_v49 }
 0x69e   : > { %2260 = vmatpush.bf16.msra.mxu1 %v4483_v57 }
 0x69f   : > { %2274 = vmatpush.bf16.msra.mxu2 %v4487_v25  ;;  %v5178_v25 = vld [vmem:[%s5707_s25 + $0x124] sm:$0xf] }
 0x6a0   : > { %v4499_v29 = vor.u32 %v5178_v25, %v4496_v13  ;;  %v5164_v25 = vld [vmem:[%s5707_s25 + $0xb4] sm:$0xf] }
 0x6a1   : > { %v4448_v13 = vld [vmem:[%s5707_s25 + $0xf0] sm:$0xf0] }
 0x6a2   : > { %2261 = vmatpush.bf16.msra.mxu1 %v4419_v33  ;;  %v5162_v33 = vld [vmem:[%s5707_s25 + $0xa4] sm:$0xf] }
 0x6a3   : > { %2275 = vmatpush.bf16.msra.mxu2 %v4423_v39  ;;  %v4432_v39 = vld [vmem:[%s5707_s25 + $0xe0] sm:$0xf0] }
 0x6a4   : > { %v4435_v58 = vor.u32 %v5162_v33, %v4432_v39  ;;  %v5148_v33 = vld [vmem:[%s5707_s25 + $0x34] sm:$0xf] }
 0x6a5   : > { %v4384_v39 = vld [vmem:[%s5707_s25 + $0x70] sm:$0xf0] }
 0x6a6   : > { %2262 = vmatpush.bf16.msra.mxu1 %v4355_v35  ;;  %v5147_v35 = vld [vmem:[%s5707_s25 + $0x2c] sm:$0xf] }
 0x6a7   : > { %2276 = vmatpush.bf16.msra.mxu2 %v4359_v19  ;;  %v4376_v19 = vld [vmem:[%s5707_s25 + $0x68] sm:$0xf0] }
 0x704   : > { %v1721_v45 = vpop.xlane.xlu2 %1720 }
 0x705   : > { %v1725_v43 = vmul.f32 %v1721_v45, %v6161_v6  ;;  %v4350_v45 = vld [vmem:[%s5707_s25 + $0x10] sm:$0xf] }
 0x706   : > { %v4351_v48 = vor.u32 %v5152_v3, %v4350_v45  ;;  %v5163_v45 = vld [vmem:[%s5707_s25 + $0xac] sm:$0xf]  ;;  %v4431_v3 = vor.u32 %v5170_v11, %v4430_v22  ;;  %v4382_v22 = vld [vmem:[%s5707_s25 + $0x30] sm:$0xf] }
 0x707   : > { %v6203_v32 = vadd.f32 1e-12, %v1725_v43  ;;  %v4443_v0 = vor.u32 %v5163_v45, %v4440_v46  ;;  %v5156_v11 = vld [vmem:[%s5707_s25 + $0x6c] sm:$0xf0]  ;;  %v5149_v45 = vld [vmem:[%s5707_s25 + $0x3c] sm:$0xf] }
 0x708   : > { %2248 = vmatpush.bf16.msra.mxu0 %v4351_v48  ;;  %v5146_v48 = vld [vmem:[%s5707_s25 + $0x24] sm:$0xf]  ;;  %v4392_v46 = vld [vmem:[%s5707_s25 + $0x78] sm:$0xf0] }
 0x709   : > { %5428 = vrsqrt.f32 %v6203_v32  ;;  %vm1735_vm5 = vweird.f32 %v6203_v32  ;;  %v4371_v47 = vor.u32 %v5146_v48, %v4368_v53  ;;  %v5229_v48 = vld [vmem:[%s5719_s29 + $0xb8] sm:$0xff] }
 0x70a   : > { %v5237_v53 = vld [vmem:[%s5719_s29 + $0xf8] sm:$0xff] }
 0x70c   : > { %v1724_v14 = vpop.xlane.xlu1 %1723 }
 0x70d   : > { %v1726_v2 = vmul.f32 %v1724_v14, %v6161_v6 }
 0x70f   : > { %v5429_v23 = vpop.eup %5428  ;;  %v1728_v44 = vadd.f32 1e-12, %v1726_v2  ;;  %v4566_v2 = vld [vmem:[%s5707_s25 + $0x1a8] sm:$0xf] }
 0x710   : > { %v1730_v24 = vmul.f32 %v5429_v23, %v6203_v32  ;;  %vm1736_vm4 = vweird.f32 %v5429_v23  ;;  %v5357_v32 = vld [vmem:[%s6891_s0] ss:$0 sm:$0xff] }
 0x711   : > { %5430 = vrsqrt.f32 %v1728_v44  ;;  %vm1737_vm6 = vmor %vm1735_vm5, %vm1736_vm4  ;;  %vm1745_vm8 = vweird.f32 %v1728_v44 }
 0x712   : > { %v1731_v36 = vmul.f32 %v5429_v23, %v1730_v24  ;;  %v5187_v24 = vld [vmem:[%s5707_s25 + $0x164] sm:$0xf0] }
 0x713   : > { %v4503_v34 = vor.u32 %v5187_v24, %v4502_v20  ;;  %v4454_v20 = vld [vmem:[%s5707_s25 + $0xb8] sm:$0xf] }
 0x714   : > { %v1732_v43 = vmul.f32 0.5, %v1731_v36  ;;  %v4507_v36 = vor.u32 %v5179_v28, %v4504_v40  ;;  %v5173_v24 = vld [vmem:[%s5707_s25 + $0xf4] sm:$0xf0]  ;;  %v5165_v28 = vld [vmem:[%s5707_s25 + $0xbc] sm:$0xf] }
 0x715   : > { %v4456_v40 = vld [vmem:[%s5707_s25 + $0xf8] sm:$0xf0] }
 0x716   : > { %v1733_v56 = vsub.f32 1.5, %v1732_v43  ;;  %v5154_v43 = vld [vmem:[%s5707_s25 + $0x5c] sm:$0xf0] }
 0x717   : > { %v5431_v37 = vpop.eup %5430 }
 0x718   : > { %v1734_v26 = vmul.f32 %v5429_v23, %v1733_v56  ;;  %v1740_v38 = vmul.f32 %v5431_v37, %v1728_v44  ;;  %vm1746_vm7 = vweird.f32 %v5431_v37  ;;  %v5155_v56 = vld [vmem:[%s5707_s25 + $0x64] sm:$0xf0] }
 0x719   : > { %vm1747_vm9 = vmor %vm1745_vm8, %vm1746_vm7 }
 0x71a   : > { %v1741_v61 = vmul.f32 %v5431_v37, %v1740_v38  ;;  %v1738_v62 = vsel %vm1737_vm6, %v5429_v23, %v1734_v26  ;;  %v4567_v23 = vor.u32 %v5203_v60, %v4566_v2  ;;  %v4574_v26 = vld [vmem:[%s5707_s25 + $0x1b0] sm:$0xf]  ;;  %v4518_v2 = vld [vmem:[%s5707_s25 + $0x138] sm:$0xf] }
 0x71b   : > { %v1749_v7 = vmul.f32 %v1738_v62, %v6164_v59  ;;  %v5202_v59 = vld [vmem:[%s5707_s25 + $0x1dc] sm:$0xf0]  ;;  %v5204_v38 = vld [vmem:[%s5707_s25 + $0x1ec] sm:$0xf0]  ;;  %v4379_v62 = vor.u32 %v5147_v35, %v4376_v19  ;;  %v5189_v60 = vld [vmem:[%s5707_s25 + $0x174] sm:$0xf0] }
 0x71c   : > { %v1742_v51 = vmul.f32 0.5, %v1741_v61  ;;  %v4559_v57 = vor.u32 %v5202_v59, %v4558_v16  ;;  %v4375_v61 = vor.u32 %v5155_v56, %v4374_v55  ;;  %v5212_v55 = vld [vmem:[%s5719_s29 + $0x30] sm:$0xff] }
 0x71d   : > { %v1754_v14 = vmul.f32 %v5357_v32, %v1749_v7  ;;  %v5205_v7 = vld [vmem:[%s5707_s25 + $0x1f4] sm:$0xf0]  ;;  %v5220_v56 = vld [vmem:[%s5719_s29 + $0x70] sm:$0xff] }
 0x71e   : > { %v1743_v12 = vsub.f32 1.5, %v1742_v51  ;;  %v5196_v51 = vld [vmem:[%s5707_s25 + $0x1b4] sm:$0xf] }
 0x71f   : > { %v6263_v5 = vadd.f32 %v5358_v54, %v1754_v14  ;;  %v5228_v35 = vld [vmem:[%s5719_s29 + $0xb0] sm:$0xff] }
 0x720   : > { %v1744_v52 = vmul.f32 %v5431_v37, %v1743_v12  ;;  %v4576_v12 = vld [vmem:[%s5707_s25 + $0x1f0] sm:$0xf0] }
 0x721   : > { %v4579_v14 = vor.u32 %v5196_v51, %v4576_v12  ;;  %v5236_v19 = vld [vmem:[%s5719_s29 + $0xf0] sm:$0xff]  ;;  %v5226_v51 = vld [vmem:[%s5719_s29 + $0xa0] sm:$0xff] }
 0x722   : > { %v1748_v9 = vsel %vm1747_vm9, %v5431_v37, %v1744_v52  ;;  %v4367_v37 = vor.u32 %v5154_v43, %v4366_v31  ;;  %v5197_v52 = vld [vmem:[%s5707_s25 + $0x1bc] sm:$0xf]  ;;  %v4391_v31 = vor.u32 %v5157_v21, %v4390_v41  ;;  %v4395_v43 = vor.u32 %v5149_v45, %v4392_v46  ;;  %v5234_v12 = vld [vmem:[%s5719_s29 + $0xe0] sm:$0xff] }
 0x723   : > { %v1750_v4 = vmul.f32 %v1748_v9, %v6170_v15  ;;  %v4568_v15 = vld [vmem:[%s5707_s25 + $0x1e8] sm:$0xf0]  ;;  %v4584_v9 = vld [vmem:[%s5707_s25 + $0x1f8] sm:$0xf0] }
 0x724   : > { %v4571_v44 = vor.u32 %v5195_v42, %v4568_v15  ;;  %v4587_v59 = vor.u32 %v5197_v52, %v4584_v9  ;;  %v5181_v42 = vld [vmem:[%s5707_s25 + $0x13c] sm:$0xf] }
 0x725   : > { %v1755_v49 = vmul.f32 %v5357_v32, %v1750_v4  ;;  %v4582_v32 = vld [vmem:[%s5707_s25 + $0x1b8] sm:$0xf]  ;;  %v4510_v4 = vld [vmem:[%s5707_s25 + $0x130] sm:$0xf]  ;;  %v4520_v15 = vld [vmem:[%s5707_s25 + $0x178] sm:$0xf0] }
 0x726   : > { %v4583_v16 = vor.u32 %v5205_v7, %v4582_v32  ;;  %v5209_v32 = vld [vmem:[%s5719_s29 + $0x18] sm:$0xff] }
 0x727   : > { %v6265_v27 = vadd.f32 %v5358_v54, %v1755_v49  ;;  %v4575_v54 = vor.u32 %v5204_v38, %v4574_v26  ;;  %v5188_v49 = vld [vmem:[%s5707_s25 + $0x16c] sm:$0xf0]  ;;  %v5227_v26 = vld [vmem:[%s5719_s29 + $0xa8] sm:$0xff]  ;;  %v5217_v7 = vld [vmem:[%s5719_s29 + $0x58] sm:$0xff] }
 0x728   : > { %v5235_v38 = vld [vmem:[%s5719_s29 + $0xe8] sm:$0xff]  ;;  %v5225_v52 = vld [vmem:[%s5719_s29 + $0x98] sm:$0xff] }
 0x729   : > { %v6272_v50 = vpack.c.bf16 %v6265_v27, %v6263_v5  ;;  %v5233_v9 = vld [vmem:[%s5719_s29 + $0xd8] sm:$0xff] }
 0x72a   : > { %v5257_v41 = vld [vmem:[%s5719_s29 + $0x198] sm:$0xff] }
 0x72b   : > { %4588 = vmatmul.msk.bf16.vlgmr.msrb.gmra.mxu0 %vm891_vm1, %v6272_v50  ;;  %4589 = vmatmul.msk.bf16.vlgmr.msrb.gmra.mxu1 %vm891_vm1, %v6272_v50  ;;  %v5265_v21 = vld [vmem:[%s5719_s29 + $0x1d8] sm:$0xff] }
 0x72c   : > { %4590 = vmatmul.msk.bf16.vlgmr.msrb.gmra.mxu2 %vm891_vm1, %v6272_v50  ;;  %4591 = vmatmul.msk.bf16.vlgmr.msrb.gmra.mxu3 %vm891_vm1, %v6272_v50 }
 0x72d   : > { %2301 = vmatpush.bf16.msrb.mxu0 %v4559_v57  ;;  %2315 = vmatpush.bf16.msrb.mxu1 %v4563_v8  ;;  %v4511_v57 = vor.u32 %v5188_v49, %v4510_v4  ;;  %v4515_v8 = vor.u32 %v5180_v18, %v4512_v1  ;;  %v5207_v4 = vld [vmem:[%s5719_s29 + $0x8] sm:$0xff]  ;;  %v5214_v18 = vld [vmem:[%s5719_s29 + $0x40] sm:$0xff]  ;;  %v5245_v1 = vld [vmem:[%s5719_s29 + $0x138] sm:$0xff] }
 0x72e   : > { %2329 = vmatpush.bf16.msrb.mxu2 %v4567_v23  ;;  %2343 = vmatpush.bf16.msrb.mxu3 %v4571_v44  ;;  %v4519_v23 = vor.u32 %v5189_v60, %v4518_v2  ;;  %v4523_v44 = vor.u32 %v5181_v42, %v4520_v15  ;;  %v5215_v49 = vld [vmem:[%s5719_s29 + $0x48] sm:$0xff]  ;;  %v5253_v2 = vld [vmem:[%s5719_s29 + $0x178] sm:$0xff]  ;;  %v5244_v15 = vld [vmem:[%s5719_s29 + $0x130] sm:$0xff] }
 0x72f   : > { %v5223_v60 = vld [vmem:[%s5719_s29 + $0x88] sm:$0xff] }
 0x730   : > { %v5231_v42 = vld [vmem:[%s5719_s29 + $0xc8] sm:$0xff] }
 0x731   : > { %2302 = vmatpush.bf16.msrb.mxu0 %v4495_v30  ;;  %2316 = vmatpush.bf16.msrb.mxu1 %v4499_v29  ;;  %v4447_v30 = vor.u32 %v5172_v17, %v4446_v10  ;;  %v4451_v29 = vor.u32 %v5164_v25, %v4448_v13  ;;  %v5230_v10 = vld [vmem:[%s5719_s29 + $0xc0] sm:$0xff]  ;;  %v5261_v17 = vld [vmem:[%s5719_s29 + $0x1b8] sm:$0xff]  ;;  %v5251_v25 = vld [vmem:[%s5719_s29 + $0x168] sm:$0xff] }
 0x732   : > { %2330 = vmatpush.bf16.msrb.mxu2 %v4503_v34  ;;  %2344 = vmatpush.bf16.msrb.mxu3 %v4507_v36  ;;  %v4455_v34 = vor.u32 %v5173_v24, %v4454_v20  ;;  %v4459_v36 = vor.u32 %v5165_v28, %v4456_v40  ;;  %v5260_v13 = vld [vmem:[%s5719_s29 + $0x1b0] sm:$0xff]  ;;  %v5242_v24 = vld [vmem:[%s5719_s29 + $0x120] sm:$0xff]  ;;  %v5259_v40 = vld [vmem:[%s5719_s29 + $0x1a8] sm:$0xff] }
 0x733   : > { %v5268_v20 = vld [vmem:[%s5719_s29 + $0x1f0] sm:$0xff]  ;;  %v5250_v28 = vld [vmem:[%s5719_s29 + $0x160] sm:$0xff] }
 0x735   : > { %2303 = vmatpush.bf16.msrb.mxu0 %v4431_v3  ;;  %2317 = vmatpush.bf16.msrb.mxu1 %v4435_v58  ;;  %v4383_v3 = vor.u32 %v5156_v11, %v4382_v22  ;;  %v4387_v58 = vor.u32 %v5148_v33, %v4384_v39  ;;  %v5249_v22 = vld [vmem:[%s5719_s29 + $0x158] sm:$0xff]  ;;  %v5258_v11 = vld [vmem:[%s5719_s29 + $0x1a0] sm:$0xff]  ;;  %v5248_v33 = vld [vmem:[%s5719_s29 + $0x150] sm:$0xff] }
 0x736   : > { %2331 = vmatpush.bf16.msrb.mxu2 %v4439_v63  ;;  %2345 = vmatpush.bf16.msrb.mxu3 %v4443_v0  ;;  %v5213_v63 = vld [vmem:[%s5719_s29 + $0x38] sm:$0xff]  ;;  %v6415_v39 = vld [vmem:[%s5713_s5] sm:$0xff] }
 0x737   : > { %v5221_v0 = vld [vmem:[%s5719_s29 + $0x78] sm:$0xff]  ;;  %v1830_v45 = vperm.slane %v6415_v39, 0  ;;  %v1831_v46 = vperm.slane %v6415_v39, 1 }
 0x739   : > { %2304 = vmatpush.bf16.msrb.mxu0 %v4367_v37  ;;  %2318 = vmatpush.bf16.msrb.mxu1 %v4371_v47  ;;  %v5211_v37 = vld [vmem:[%s5719_s29 + $0x28] sm:$0xff] }
 0x73a   : > { %2332 = vmatpush.bf16.msrb.mxu2 %v4375_v61  ;;  %2346 = vmatpush.bf16.msrb.mxu3 %v4379_v62  ;;  %v5219_v47 = vld [vmem:[%s5719_s29 + $0x68] sm:$0xff]  ;;  %v5210_v61 = vld [vmem:[%s5719_s29 + $0x20] sm:$0xff] }
 0x73b   : > { %4592 = vmatmul.msk.bf16.vlgmr.msra.gmra.mxu0 %vm891_vm1, %v6272_v50  ;;  %4593 = vmatmul.msk.bf16.vlgmr.msra.gmra.mxu1 %vm891_vm1, %v6272_v50  ;;  %v5218_v62 = vld [vmem:[%s5719_s29 + $0x60] sm:$0xff] }
 0x73c   : > { %4594 = vmatmul.msk.bf16.vlgmr.msra.gmra.mxu2 %vm891_vm1, %v6272_v50  ;;  %4595 = vmatmul.msk.bf16.vlgmr.msra.gmra.mxu3 %vm891_vm1, %v6272_v50 }
 0x73d   : > { %2357 = vmatpush.bf16.msra.mxu0 %v4575_v54  ;;  %2371 = vmatpush.bf16.msra.mxu1 %v4579_v14  ;;  %v5208_v54 = vld [vmem:[%s5719_s29 + $0x10] sm:$0xff] }
 0x73e   : > { %2385 = vmatpush.bf16.msra.mxu2 %v4583_v16  ;;  %2399 = vmatpush.bf16.msra.mxu3 %v4587_v59  ;;  %v5216_v14 = vld [vmem:[%s5719_s29 + $0x50] sm:$0xff]  ;;  %v5206_v59 = vld [vmem:[%s5719_s29] sm:$0xff] }
 0x73f   : > { %v5224_v16 = vld [vmem:[%s5719_s29 + $0x90] sm:$0xff] }
 0x741   : > { %2358 = vmatpush.bf16.msra.mxu0 %v4511_v57  ;;  %2372 = vmatpush.bf16.msra.mxu1 %v4515_v8  ;;  %v5252_v57 = vld [vmem:[%s5719_s29 + $0x170] sm:$0xff]  ;;  %v5222_v8 = vld [vmem:[%s5719_s29 + $0x80] sm:$0xff] }
 0x742   : > { %2386 = vmatpush.bf16.msra.mxu2 %v4519_v23  ;;  %2400 = vmatpush.bf16.msra.mxu3 %v4523_v44  ;;  %v5269_v23 = vld [vmem:[%s5719_s29 + $0x1f8] sm:$0xff]  ;;  %v5243_v44 = vld [vmem:[%s5719_s29 + $0x128] sm:$0xff] }
 0x745   : > { %2359 = vmatpush.bf16.msra.mxu0 %v4447_v30  ;;  %2373 = vmatpush.bf16.msra.mxu1 %v4451_v29  ;;  %v5267_v30 = vld [vmem:[%s5719_s29 + $0x1e8] sm:$0xff]  ;;  %v5241_v29 = vld [vmem:[%s5719_s29 + $0x118] sm:$0xff] }
 0x746   : > { %2387 = vmatpush.bf16.msra.mxu2 %v4455_v34  ;;  %2401 = vmatpush.bf16.msra.mxu3 %v4459_v36  ;;  %v5266_v34 = vld [vmem:[%s5719_s29 + $0x1e0] sm:$0xff]  ;;  %v5240_v36 = vld [vmem:[%s5719_s29 + $0x110] sm:$0xff] }
 0x749   : > { %2360 = vmatpush.bf16.msra.mxu0 %v4383_v3  ;;  %2374 = vmatpush.bf16.msra.mxu1 %v4387_v58  ;;  %v5239_v3 = vld [vmem:[%s5719_s29 + $0x108] sm:$0xff] }
 0x74a   : > { %2388 = vmatpush.bf16.msra.mxu2 %v4391_v31  ;;  %2402 = vmatpush.bf16.msra.mxu3 %v4395_v43  ;;  %v5247_v58 = vld [vmem:[%s5719_s29 + $0x148] sm:$0xff]  ;;  %v5256_v31 = vld [vmem:[%s5719_s29 + $0x190] sm:$0xff] }
 0x74b   : > { %4596 = vmatmul.msk.bf16.vlgmr.msrb.gmra.mxu0 %vm891_vm1, %v6272_v50  ;;  %4597 = vmatmul.msk.bf16.vlgmr.msrb.gmra.mxu1 %vm891_vm1, %v6272_v50  ;;  %v5264_v43 = vld [vmem:[%s5719_s29 + $0x1d0] sm:$0xff] }
 0x74c   : > { %4598 = vmatmul.msk.bf16.vlgmr.msrb.gmra.mxu2 %vm891_vm1, %v6272_v50  ;;  %4599 = vmatmul.msk.bf16.vlgmr.msrb.gmra.mxu3 %vm891_vm1, %v6272_v50 }
 0x74d   : > { %3741 = vmatpush.bf16.msrb.mxu0 %v5213_v63  ;;  %3755 = vmatpush.bf16.msrb.mxu1 %v5221_v0 }
 0x74e   : > { %3769 = vmatpush.bf16.msrb.mxu2 %v5229_v48  ;;  %3783 = vmatpush.bf16.msrb.mxu3 %v5237_v53 }
 0x751   : > { %3742 = vmatpush.bf16.msrb.mxu0 %v5212_v55  ;;  %3756 = vmatpush.bf16.msrb.mxu1 %v5220_v56  ;;  %v5238_v55 = vld [vmem:[%s5719_s29 + $0x100] sm:$0xff] }
 0x752   : > { %3770 = vmatpush.bf16.msrb.mxu2 %v5228_v35  ;;  %3784 = vmatpush.bf16.msrb.mxu3 %v5236_v19  ;;  %v5246_v56 = vld [vmem:[%s5719_s29 + $0x140] sm:$0xff] }
 0x755   : > { %3743 = vmatpush.bf16.msrb.mxu0 %v5211_v37  ;;  %3757 = vmatpush.bf16.msrb.mxu1 %v5219_v47  ;;  %v1832_v37 = vperm.slane %v6415_v39, 2 }
 0x756   : > { %3771 = vmatpush.bf16.msrb.mxu2 %v5227_v26  ;;  %3785 = vmatpush.bf16.msrb.mxu3 %v5235_v38  ;;  %v1833_v38 = vperm.slane %v6415_v39, 3 }
 0x759   : > { %3744 = vmatpush.bf16.msrb.mxu0 %v5210_v61  ;;  %3758 = vmatpush.bf16.msrb.mxu1 %v5218_v62  ;;  %v5255_v61 = vld [vmem:[%s5719_s29 + $0x188] sm:$0xff] }
 0x75a   : > { %3772 = vmatpush.bf16.msrb.mxu2 %v5226_v51  ;;  %3786 = vmatpush.bf16.msrb.mxu3 %v5234_v12  ;;  %v5263_v62 = vld [vmem:[%s5719_s29 + $0x1c8] sm:$0xff] }
 0x75b   : > { %4600 = vmatmul.msk.bf16.vlgmr.msra.gmra.mxu0 %vm891_vm1, %v6272_v50  ;;  %4601 = vmatmul.msk.bf16.vlgmr.msra.gmra.mxu1 %vm891_vm1, %v6272_v50 }
 0x75c   : > { %4602 = vmatmul.msk.bf16.vlgmr.msra.gmra.mxu2 %vm891_vm1, %v6272_v50  ;;  %4603 = vmatmul.msk.bf16.vlgmr.msra.gmra.mxu3 %vm891_vm1, %v6272_v50  ;;  %v5232_v50 = vld [vmem:[%s5719_s29 + $0xd0] sm:$0xff] }
 0x75d   : > { %3745 = vmatpush.bf16.msrb.mxu0 %v5209_v32  ;;  %3759 = vmatpush.bf16.msrb.mxu1 %v5217_v7 }
 0x75e   : > { %3773 = vmatpush.bf16.msrb.mxu2 %v5225_v52  ;;  %3787 = vmatpush.bf16.msrb.mxu3 %v5233_v9 }
 0x761   : > { %3746 = vmatpush.bf16.msrb.mxu0 %v5208_v54  ;;  %3760 = vmatpush.bf16.msrb.mxu1 %v5216_v14 }
 0x762   : > { %3774 = vmatpush.bf16.msrb.mxu2 %v5224_v16  ;;  %3788 = vmatpush.bf16.msrb.mxu3 %v5232_v50 }
 0x765   : > { %3747 = vmatpush.bf16.msrb.mxu0 %v5207_v4  ;;  %3761 = vmatpush.bf16.msrb.mxu1 %v5215_v49 }
 0x766   : > { %3775 = vmatpush.bf16.msrb.mxu2 %v5223_v60  ;;  %3789 = vmatpush.bf16.msrb.mxu3 %v5231_v42  ;;  %v5254_v60 = vld [vmem:[%s5719_s29 + $0x180] sm:$0xff] }
 0x767   : > { %v5262_v42 = vld [vmem:[%s5719_s29 + $0x1c0] sm:$0xff] }
 0x769   : > { %3748 = vmatpush.bf16.msrb.mxu0 %v5206_v59  ;;  %3762 = vmatpush.bf16.msrb.mxu1 %v5214_v18 }
 0x76a   : > { %3776 = vmatpush.bf16.msrb.mxu2 %v5222_v8  ;;  %3790 = vmatpush.bf16.msrb.mxu3 %v5230_v10 }
 0x76d   : > { %3797 = vmatpush.bf16.msra.mxu0 %v5245_v1  ;;  %3811 = vmatpush.bf16.msra.mxu1 %v5253_v2 }
 0x76e   : > { %3825 = vmatpush.bf16.msra.mxu2 %v5261_v17  ;;  %3839 = vmatpush.bf16.msra.mxu3 %v5269_v23 }
 0x771   : > { %3798 = vmatpush.bf16.msra.mxu0 %v5244_v15  ;;  %3812 = vmatpush.bf16.msra.mxu1 %v5252_v57 }
 0x772   : > { %3826 = vmatpush.bf16.msra.mxu2 %v5260_v13  ;;  %3840 = vmatpush.bf16.msra.mxu3 %v5268_v20 }
 0x775   : > { %3799 = vmatpush.bf16.msra.mxu0 %v5243_v44  ;;  %3813 = vmatpush.bf16.msra.mxu1 %v5251_v25 }
 0x776   : > { %3827 = vmatpush.bf16.msra.mxu2 %v5259_v40  ;;  %3841 = vmatpush.bf16.msra.mxu3 %v5267_v30 }
 0x779   : > { %3800 = vmatpush.bf16.msra.mxu0 %v5242_v24  ;;  %3814 = vmatpush.bf16.msra.mxu1 %v5250_v28 }
 0x77a   : > { %3828 = vmatpush.bf16.msra.mxu2 %v5258_v11  ;;  %3842 = vmatpush.bf16.msra.mxu3 %v5266_v34 }
 0x77d   : > { %3801 = vmatpush.bf16.msra.mxu0 %v5241_v29  ;;  %3815 = vmatpush.bf16.msra.mxu1 %v5249_v22 }
 0x77e   : > { %3829 = vmatpush.bf16.msra.mxu2 %v5257_v41  ;;  %3843 = vmatpush.bf16.msra.mxu3 %v5265_v21  ;;  %v1834_v41 = vperm.slane %v6415_v39, 4 }
 0x781   : > { %3802 = vmatpush.bf16.msra.mxu0 %v5240_v36  ;;  %3816 = vmatpush.bf16.msra.mxu1 %v5248_v33 }
 0x782   : > { %3830 = vmatpush.bf16.msra.mxu2 %v5256_v31  ;;  %3844 = vmatpush.bf16.msra.mxu3 %v5264_v43 }
 0x785   : > { %3803 = vmatpush.bf16.msra.mxu0 %v5239_v3  ;;  %3817 = vmatpush.bf16.msra.mxu1 %v5247_v58  ;;  %v1835_v3 = vperm.slane %v6415_v39, 5 }
 0x786   : > { %3831 = vmatpush.bf16.msra.mxu2 %v5255_v61  ;;  %3845 = vmatpush.bf16.msra.mxu3 %v5263_v62 }
 0x789   : > { %3804 = vmatpush.bf16.msra.mxu0 %v5238_v55  ;;  %3818 = vmatpush.bf16.msra.mxu1 %v5246_v56 }
 0x78a   : > { %3832 = vmatpush.bf16.msra.mxu2 %v5254_v60  ;;  %3846 = vmatpush.bf16.msra.mxu3 %v5262_v42 }
 0x7a8   : > { %v2194_v63 = vpop.f32.mrf.mxu0  ;;  %v2208_v0 = vpop.f32.mrf.mxu1 }
 0x7a9   : > { %v6425_v48 = vadd.f32 %v2194_v63, %v1830_v45  ;;  %v6427_v53 = vadd.f32 %v2208_v0, %v1831_v46 }
 0x7ab   : > { %v2441_v35 = vmul.f32 0.044715, %v6425_v48  ;;  %v2442_v19 = vmul.f32 0.044715, %v6427_v53 }
 0x7ad   : > { %v2473_v47 = vmul.f32 %v2441_v35, %v6425_v48  ;;  %v2474_v26 = vmul.f32 %v2442_v19, %v6427_v53 }
 0x7af   : > { %v2505_v51 = vmul.f32 %v2473_v47, %v6425_v48  ;;  %v2222_v12 = vpop.f32.mrf.mxu2  ;;  %v2236_v32 = vpop.f32.mrf.mxu3  ;;  %v2506_v7 = vmul.f32 %v2474_v26, %v6427_v53 }
 0x7b0   : > { %v6441_v52 = vadd.f32 %v2222_v12, %v1832_v37  ;;  %v2196_v9 = vpop.f32.mrf.mxu0  ;;  %v2210_v54 = vpop.f32.mrf.mxu1  ;;  %v6446_v16 = vadd.f32 %v2236_v32, %v1833_v38  ;;  %v1836_v32 = vperm.slane %v6415_v39, 6 }
 0x7b1   : > { %v2197_v14 = vadd.f32 %v2196_v9, %v1830_v45  ;;  %v6443_v4 = vadd.f32 %v2210_v54, %v1831_v46  ;;  %v2537_v50 = vadd.f32 %v2505_v51, %v6425_v48  ;;  %v2538_v18 = vadd.f32 %v2506_v7, %v6427_v53 }
 0x7b2   : > { %v2443_v49 = vmul.f32 0.044715, %v6441_v52  ;;  %v2444_v57 = vmul.f32 0.044715, %v6446_v16 }
 0x7b3   : > { %v2457_v59 = vmul.f32 0.044715, %v2197_v14  ;;  %v2458_v2 = vmul.f32 0.044715, %v6443_v4  ;;  %v2569_v10 = vmul.f32 0.7978846, %v2537_v50 }
 0x7b4   : > { %v2475_v1 = vmul.f32 %v2443_v49, %v6441_v52  ;;  %v2570_v25 = vmul.f32 0.7978846, %v2538_v18  ;;  %v2476_v22 = vmul.f32 %v2444_v57, %v6446_v16  ;;  %v2425_v7 = vmul.f32 0.5, %v2197_v14 }
 0x7b5   : > { %v2489_v15 = vmul.f32 %v2457_v59, %v2197_v14  ;;  %v2490_v8 = vmul.f32 %v2458_v2, %v6443_v4  ;;  %5432 = vtanh.f32 %v2569_v10  ;;  %v2426_v50 = vmul.f32 0.5, %v6443_v4 }
 0x7b6   : > { %v2507_v13 = vmul.f32 %v2475_v1, %v6441_v52  ;;  %5434 = vtanh.f32 %v2570_v25  ;;  %v2508_v58 = vmul.f32 %v2476_v22, %v6446_v16  ;;  %v1837_v57 = vperm.slane %v6415_v39, 7 }
 0x7b7   : > { %v2521_v17 = vmul.f32 %v2489_v15, %v2197_v14  ;;  %v2224_v23 = vpop.f32.mrf.mxu2  ;;  %v2238_v44 = vpop.f32.mrf.mxu3  ;;  %v2522_v20 = vmul.f32 %v2490_v8, %v6443_v4  ;;  %v6488_v15 = vld [vmem:[%s5713_s5 + $0x8] sm:$0xff] }
 0x7b8   : > { %v6458_v24 = vadd.f32 %v2224_v23, %v1832_v37  ;;  %v2250_v28 = vpop.f32.mrf.mxu0  ;;  %v2264_v40 = vpop.f32.mrf.mxu1  ;;  %v6460_v29 = vadd.f32 %v2238_v44, %v1833_v38  ;;  %v2539_v21 = vadd.f32 %v2507_v13, %v6441_v52  ;;  %v2540_v38 = vadd.f32 %v2508_v58, %v6446_v16 }
 0x7b9   : > { %v2553_v30 = vadd.f32 %v2521_v17, %v2197_v14  ;;  %v2554_v11 = vadd.f32 %v2522_v20, %v6443_v4  ;;  %v6474_v35 = vadd.f32 %v2250_v28, %v1834_v41  ;;  %v6478_v51 = vadd.f32 %v2264_v40, %v1835_v3 }
 0x7ba   : > { %v2459_v34 = vmul.f32 0.044715, %v6458_v24  ;;  %v2460_v33 = vmul.f32 0.044715, %v6460_v29  ;;  %v2571_v55 = vmul.f32 0.7978846, %v2539_v21 }
 0x7bb   : > { %v2585_v36 = vmul.f32 0.7978846, %v2553_v30  ;;  %v2586_v45 = vmul.f32 0.7978846, %v2554_v11  ;;  %v5433_v47 = vpop.eup %5432  ;;  %v2445_v54 = vmul.f32 0.044715, %v6474_v35 }
 0x7bc   : > { %v2491_v46 = vmul.f32 %v2459_v34, %v6458_v24  ;;  %v2492_v43 = vmul.f32 %v2460_v33, %v6460_v29  ;;  %v5435_v26 = vpop.eup %5434  ;;  %v2633_v59 = vadd.f32 1.0, %v5433_v47  ;;  %v2572_v2 = vmul.f32 0.7978846, %v2540_v38  ;;  %v5277_v33 = vld [vmem:[%s5719_s29 + $0x238] sm:$0xff]  ;;  %v5276_v38 = vld [vmem:[%s5719_s29 + $0x230] sm:$0xff] }
 0x7bd   : > { %5436 = vtanh.f32 %v2585_v36  ;;  %v2446_v42 = vmul.f32 0.044715, %v6478_v51  ;;  %v2634_v14 = vadd.f32 1.0, %v5435_v26  ;;  %v2409_v4 = vmul.f32 0.5, %v6425_v48 }
 0x7be   : > { %v2523_v31 = vmul.f32 %v2491_v46, %v6458_v24  ;;  %5438 = vtanh.f32 %v2586_v45  ;;  %v2524_v62 = vmul.f32 %v2492_v43, %v6460_v29  ;;  %v2410_v28 = vmul.f32 0.5, %v6427_v53 }
 0x7bf   : > { %v2278_v63 = vpop.f32.mrf.mxu2  ;;  %v2292_v0 = vpop.f32.mrf.mxu3  ;;  %5440 = vtanh.f32 %v2571_v55  ;;  %v2477_v39 = vmul.f32 %v2445_v54, %v6474_v35  ;;  %v1838_v30 = vperm.slane %v6488_v15, 0  ;;  %v2665_v22 = vmul.f32 %v2633_v59, %v2409_v4 }
 0x7c0   : > { %v2555_v56 = vadd.f32 %v2523_v31, %v6458_v24  ;;  %v2252_v19 = vpop.f32.mrf.mxu0  ;;  %v2266_v37 = vpop.f32.mrf.mxu1  ;;  %v2556_v60 = vadd.f32 %v2524_v62, %v6460_v29  ;;  %v6494_v44 = vadd.f32 %v2278_v63, %v1836_v32  ;;  %v2478_v48 = vmul.f32 %v2446_v42, %v6478_v51 }
 0x7c1   : > { %v6482_v49 = vadd.f32 %v2252_v19, %v1834_v41  ;;  %v6491_v8 = vadd.f32 %v2266_v37, %v1835_v3  ;;  %v2666_v36 = vmul.f32 %v2634_v14, %v2410_v28  ;;  %v6502_v21 = vadd.f32 %v2292_v0, %v1837_v57  ;;  %v5285_v3 = vld [vmem:[%s5719_s29 + $0x278] sm:$0xff] }
 0x7c2   : > { %v2587_v61 = vmul.f32 0.7978846, %v2555_v56  ;;  %v2588_v34 = vmul.f32 0.7978846, %v2556_v60  ;;  %v1839_v53 = vperm.slane %v6488_v15, 1  ;;  %v2427_v0 = vmul.f32 0.5, %v6458_v24 }
 0x7c3   : > { %v5437_v12 = vpop.eup %5436  ;;  %v2461_v25 = vmul.f32 0.044715, %v6482_v49  ;;  %v2462_v45 = vmul.f32 0.044715, %v6491_v8  ;;  %v2447_v58 = vmul.f32 0.044715, %v6494_v44  ;;  %v2509_v37 = vmul.f32 %v2477_v39, %v6474_v35 }
 0x7c4   : > { %v5439_v9 = vpop.eup %5438  ;;  %v2649_v18 = vadd.f32 1.0, %v5437_v12  ;;  %5442 = vtanh.f32 %v2587_v61  ;;  %v2510_v47 = vmul.f32 %v2478_v48, %v6478_v51  ;;  %v2448_v61 = vmul.f32 0.044715, %v6502_v21  ;;  %v5284_v12 = vld [vmem:[%s5719_s29 + $0x270] sm:$0xff] }
 0x7c5   : > { %v2650_v1 = vadd.f32 1.0, %v5439_v9  ;;  %v5441_v11 = vpop.eup %5440  ;;  %5444 = vtanh.f32 %v2572_v2  ;;  %v2493_v31 = vmul.f32 %v2461_v25, %v6482_v49  ;;  %v2494_v62 = vmul.f32 %v2462_v45, %v6491_v8  ;;  %v5293_v25 = vld [vmem:[%s5719_s29 + $0x2b8] sm:$0xff] }
 0x7c6   : > { %v2681_v23 = vmul.f32 %v2649_v18, %v2425_v7  ;;  %v2635_v56 = vadd.f32 1.0, %v5441_v11  ;;  %5446 = vtanh.f32 %v2588_v34  ;;  %v2479_v54 = vmul.f32 %v2447_v58, %v6494_v44 }
 0x7c7   : > { %v2280_v10 = vpop.f32.mrf.mxu2  ;;  %v2294_v17 = vpop.f32.mrf.mxu3  ;;  %v2682_v40 = vmul.f32 %v2650_v1, %v2426_v50  ;;  %v2525_v50 = vmul.f32 %v2493_v31, %v6482_v49  ;;  %v1841_v42 = vperm.slane %v6488_v15, 3  ;;  %v2526_v28 = vmul.f32 %v2494_v62, %v6491_v8 }
 0x7c8   : > { %v2306_v13 = vpop.f32.mrf.mxu0  ;;  %v2320_v20 = vpop.f32.mrf.mxu1  ;;  %v2697_v46 = vpack.c.bf16 %v2681_v23, %v2665_v22  ;;  %v6509_v43 = vadd.f32 %v2280_v10, %v1836_v32  ;;  %v6511_v55 = vadd.f32 %v2294_v17, %v1837_v57  ;;  %v2411_v32 = vmul.f32 0.5, %v6441_v52  ;;  %v5283_v22 = vld [vmem:[%s5719_s29 + $0x268] sm:$0xff] }
 0x7c9   : > { %v2698_v63 = vpack.c.bf16 %v2682_v40, %v2666_v36  ;;  %v6518_v26 = vadd.f32 %v2306_v13, %v1838_v30  ;;  %v6530_v18 = vadd.f32 %v2320_v20, %v1839_v53  ;;  %v1840_v52 = vperm.slane %v6488_v15, 2  ;;  %v5275_v13 = vld [vmem:[%s5719_s29 + $0x228] sm:$0xff] }
 0x7ca   : > { %v5443_v41 = vpop.eup %5442  ;;  %3749 = vmatmul.bf16.vlgmr.msrb.gmra.mxu0 %v2697_v46  ;;  %v2463_v59 = vmul.f32 0.044715, %v6509_v43  ;;  %v2464_v60 = vmul.f32 0.044715, %v6511_v55  ;;  %v2667_v14 = vmul.f32 %v2635_v56, %v2411_v32  ;;  %v2541_v57 = vadd.f32 %v2509_v37, %v6474_v35  ;;  %v5301_v32 = vld [vmem:[%s5719_s29 + $0x2f8] sm:$0xff] }
 0x7cb   : > { %v2651_v19 = vadd.f32 1.0, %v5443_v41  ;;  %3763 = vmatmul.bf16.vlgmr.msrb.gmra.mxu1 %v2698_v63  ;;  %3853 = vmatpush.bf16.msrb.mxu0 %v5277_v33  ;;  %v5445_v9 = vpop.eup %5444  ;;  %v2542_v10 = vadd.f32 %v2510_v47, %v6478_v51  ;;  %v2449_v17 = vmul.f32 0.044715, %v6518_v26  ;;  %v2412_v23 = vmul.f32 0.5, %v6446_v16  ;;  %v5292_v63 = vld [vmem:[%s5719_s29 + $0x2b0] sm:$0xff] }
 0x7cc   : > { %3867 = vmatpush.bf16.msrb.mxu1 %v5285_v3  ;;  %v2480_v20 = vmul.f32 %v2448_v61, %v6502_v21  ;;  %v2636_v39 = vadd.f32 1.0, %v5445_v9  ;;  %v5447_v11 = vpop.eup %5446  ;;  %v2511_v34 = vmul.f32 %v2479_v54, %v6494_v44  ;;  %v2557_v48 = vadd.f32 %v2525_v50, %v6482_v49 }
 0x7cd   : > { %v2683_v7 = vmul.f32 %v2651_v19, %v2427_v0  ;;  %v2495_v36 = vmul.f32 %v2463_v59, %v6509_v43  ;;  %v2450_v16 = vmul.f32 0.044715, %v6530_v18  ;;  %v2496_v33 = vmul.f32 %v2464_v60, %v6511_v55  ;;  %v5274_v0 = vld [vmem:[%s5719_s29 + $0x220] sm:$0xff] }
 0x7ce   : > { %v2428_v41 = vmul.f32 0.5, %v6460_v29  ;;  %v2652_v45 = vadd.f32 1.0, %v5447_v11  ;;  %v1842_v46 = vperm.slane %v6488_v15, 4  ;;  %v2481_v3 = vmul.f32 %v2449_v17, %v6518_v26 }
 0x7cf   : > { %v2334_v24 = vpop.f32.mrf.mxu2  ;;  %v2348_v4 = vpop.f32.mrf.mxu3  ;;  %3854 = vmatpush.bf16.msrb.mxu0 %v5276_v38  ;;  %v2699_v40 = vpack.c.bf16 %v2683_v7, %v2667_v14  ;;  %v2512_v29 = vmul.f32 %v2480_v20, %v6502_v21  ;;  %v2558_v56 = vadd.f32 %v2526_v28, %v6491_v8  ;;  %v2668_v19 = vmul.f32 %v2636_v39, %v2412_v23  ;;  %v5282_v38 = vld [vmem:[%s5719_s29 + $0x260] sm:$0xff]  ;;  %v5281_v28 = vld [vmem:[%s5719_s29 + $0x258] sm:$0xff] }
 0x7d0   : > { %v2308_v1 = vpop.f32.mrf.mxu0  ;;  %v6532_v2 = vpop.f32.mrf.mxu1  ;;  %3868 = vmatpush.bf16.msrb.mxu1 %v5284_v12  ;;  %v6556_v58 = vadd.f32 %v2334_v24, %v1840_v52  ;;  %v6560_v31 = vadd.f32 %v2348_v4, %v1841_v42  ;;  %v2684_v37 = vmul.f32 %v2652_v45, %v2428_v41  ;;  %v2573_v61 = vmul.f32 0.7978846, %v2541_v57  ;;  %v5272_v41 = vld [vmem:[%s5719_s29 + $0x210] sm:$0xff] }
 0x7d1   : > { %3777 = vmatmul.bf16.vlgmr.msrb.gmra.mxu2 %v2699_v40  ;;  %v2589_v62 = vmul.f32 0.7978846, %v2557_v48  ;;  %v2527_v24 = vmul.f32 %v2495_v36, %v6509_v43  ;;  %v2482_v12 = vmul.f32 %v2450_v16, %v6530_v18  ;;  %v2528_v9 = vmul.f32 %v2496_v33, %v6511_v55  ;;  %v5290_v33 = vld [vmem:[%s5719_s29 + $0x2a0] sm:$0xff] }
 0x7d2   : > { %3881 = vmatpush.bf16.msrb.mxu2 %v5293_v25  ;;  %v6573_v54 = vadd.f32 %v2308_v1, %v1838_v30  ;;  %v2700_v50 = vpack.c.bf16 %v2684_v37, %v2668_v19  ;;  %v2543_v14 = vadd.f32 %v2511_v34, %v6494_v44  ;;  %v2513_v57 = vmul.f32 %v2481_v3, %v6518_v26  ;;  %v5291_v30 = vld [vmem:[%s5719_s29 + $0x2a8] sm:$0xff]  ;;  %v5273_v1 = vld [vmem:[%s5719_s29 + $0x218] sm:$0xff] }
 0x7d3   : > { %3855 = vmatpush.bf16.msrb.mxu0 %v5275_v13  ;;  %v2451_v17 = vmul.f32 0.044715, %v6556_v58  ;;  %v2452_v4 = vmul.f32 0.044715, %v6560_v31  ;;  %v2574_v23 = vmul.f32 0.7978846, %v2542_v10  ;;  %v2544_v25 = vadd.f32 %v2512_v29, %v6502_v21 }
 0x7d4   : > { %3869 = vmatpush.bf16.msrb.mxu1 %v5283_v22  ;;  %v2590_v13 = vmul.f32 0.7978846, %v2558_v56  ;;  %v6591_v20 = vadd.f32 %v6532_v2, %v1839_v53  ;;  %3791 = vmatmul.bf16.vlgmr.msrb.gmra.mxu3 %v2700_v50  ;;  %v2559_v40 = vadd.f32 %v2527_v24, %v6509_v43  ;;  %v2514_v39 = vmul.f32 %v2482_v12, %v6530_v18  ;;  %v5300_v22 = vld [vmem:[%s5719_s29 + $0x2f0] sm:$0xff]  ;;  %v5299_v19 = vld [vmem:[%s5719_s29 + $0x2e8] sm:$0xff]  ;;  %v5289_v50 = vld [vmem:[%s5719_s29 + $0x298] sm:$0xff] }
 0x7d5   : > { %3895 = vmatpush.bf16.msrb.mxu3 %v5301_v32  ;;  %5448 = vtanh.f32 %v2573_v61  ;;  %v2560_v53 = vadd.f32 %v2528_v9, %v6511_v55  ;;  %v2465_v2 = vmul.f32 0.044715, %v6573_v54  ;;  %v6604_v48 = vmul.f32 0.7978846, %v2543_v14  ;;  %v5271_v14 = vld [vmem:[%s5719_s29 + $0x208] sm:$0xff] }
 0x7d6   : > { %3882 = vmatpush.bf16.msrb.mxu2 %v5292_v63  ;;  %5450 = vtanh.f32 %v2589_v62  ;;  %v2545_v36 = vadd.f32 %v2513_v57, %v6518_v26  ;;  %v2483_v16 = vmul.f32 %v2451_v17, %v6556_v58  ;;  %v6611_v45 = vmul.f32 0.7978846, %v2544_v25  ;;  %v5280_v63 = vld [vmem:[%s5719_s29 + $0x250] sm:$0xff]  ;;  %v5279_v25 = vld [vmem:[%s5719_s29 + $0x248] sm:$0xff] }
 0x7d7   : > { %v2336_v47 = vpop.f32.mrf.mxu2  ;;  %3856 = vmatpush.bf16.msrb.mxu0 %v5274_v0  ;;  %v2350_v11 = vpop.f32.mrf.mxu3  ;;  %v2466_v3 = vmul.f32 0.044715, %v6591_v20  ;;  %5452 = vtanh.f32 %v2574_v23  ;;  %v1843_v56 = vperm.slane %v6488_v15, 5  ;;  %v6622_v37 = vmul.f32 0.7978846, %v2559_v40 }
 0x7d8   : > { %v2362_v7 = vpop.f32.mrf.mxu0  ;;  %v6579_v60 = vpop.f32.mrf.mxu1  ;;  %3870 = vmatpush.bf16.msrb.mxu1 %v5282_v38  ;;  %v6599_v10 = vadd.f32 %v2336_v47, %v1840_v52  ;;  %v2484_v52 = vmul.f32 %v2452_v4, %v6560_v31  ;;  %v6618_v29 = vadd.f32 %v2350_v11, %v1841_v42  ;;  %5454 = vtanh.f32 %v2590_v13 }
 0x7d9   : > { %v6577_v59 = vadd.f32 %v2362_v7, %v1842_v46  ;;  %3896 = vmatpush.bf16.msrb.mxu3 %v5300_v22  ;;  %v6625_v47 = vadd.f32 %v2514_v39, %v6530_v18  ;;  %v2497_v38 = vmul.f32 %v2465_v2, %v6573_v54  ;;  %v6629_v12 = vmul.f32 0.7978846, %v2560_v53  ;;  %v5298_v22 = vld [vmem:[%s5719_s29 + $0x2e0] sm:$0xff] }
 0x7da   : > { %3883 = vmatpush.bf16.msrb.mxu2 %v5291_v30  ;;  %v2467_v0 = vmul.f32 0.044715, %v6599_v10  ;;  %v6631_v42 = vmul.f32 0.7978846, %v2545_v36  ;;  %v2515_v32 = vmul.f32 %v2483_v16, %v6556_v58  ;;  %v2516_v7 = vmul.f32 %v2484_v52, %v6560_v31 }
 0x7db   : > { %v2453_v34 = vmul.f32 0.044715, %v6577_v59  ;;  %3857 = vmatpush.bf16.msrb.mxu0 %v5273_v1  ;;  %v5449_v24 = vpop.eup %5448  ;;  %v2498_v17 = vmul.f32 %v2466_v3, %v6591_v20  ;;  %v2413_v4 = vmul.f32 0.5, %v6474_v35  ;;  %v2429_v30 = vmul.f32 0.5, %v6482_v49 }
 0x7dc   : > { %3871 = vmatpush.bf16.msrb.mxu1 %v5281_v28  ;;  %v5451_v57 = vpop.eup %5450  ;;  %v2637_v1 = vadd.f32 1.0, %v5449_v24  ;;  %v2499_v13 = vmul.f32 %v2467_v0, %v6599_v10  ;;  %v2468_v28 = vmul.f32 0.044715, %v6618_v29  ;;  %v6644_v40 = vadd.f32 %v6579_v60, %v1843_v56 }
 0x7dd   : > { %v2485_v61 = vmul.f32 %v2453_v34, %v6577_v59  ;;  %3897 = vmatpush.bf16.msrb.mxu3 %v5299_v19  ;;  %v2653_v39 = vadd.f32 1.0, %v5451_v57  ;;  %v5453_v11 = vpop.eup %5452  ;;  %v2529_v35 = vmul.f32 %v2497_v38, %v6573_v54  ;;  %v1844_v53 = vperm.slane %v6488_v15, 6  ;;  %v5270_v19 = vld [vmem:[%s5719_s29 + $0x200] sm:$0xff] }
 0x7de   : > { %3884 = vmatpush.bf16.msrb.mxu2 %v5290_v33  ;;  %v5455_v34 = vpop.eup %5454  ;;  %v2669_v36 = vmul.f32 %v2637_v1, %v2413_v4  ;;  %v2638_v16 = vadd.f32 1.0, %v5453_v11  ;;  %v2530_v3 = vmul.f32 %v2498_v17, %v6591_v20  ;;  %v2531_v38 = vmul.f32 %v2499_v13, %v6599_v10  ;;  %v5309_v17 = vld [vmem:[%s5719_s29 + $0x338] sm:$0xff] }
 0x7df   : > { %v2390_v62 = vpop.f32.mrf.mxu2  ;;  %3858 = vmatpush.bf16.msrb.mxu0 %v5272_v41  ;;  %v2517_v49 = vmul.f32 %v2485_v61, %v6577_v59  ;;  %v2685_v60 = vmul.f32 %v2653_v39, %v2429_v30  ;;  %v6654_v52 = vpop.f32.mrf.mxu3  ;;  %v5288_v41 = vld [vmem:[%s5719_s29 + $0x290] sm:$0xff]  ;;  %v2654_v0 = vadd.f32 1.0, %v5455_v34  ;;  %v2500_v61 = vmul.f32 %v2468_v28, %v6618_v29 }
 0x7e0   : > { %v2364_v9 = vpop.f32.mrf.mxu0  ;;  %3872 = vmatpush.bf16.msrb.mxu1 %v5280_v63  ;;  %v2378_v23 = vpop.f32.mrf.mxu1  ;;  %v2414_v63 = vmul.f32 0.5, %v6478_v51  ;;  %v2547_v4 = vadd.f32 %v2515_v32, %v6556_v58  ;;  %v6672_v30 = vadd.f32 %v2390_v62, %v1844_v53  ;;  %5456 = vtanh.f32 %v6604_v48  ;;  %v5296_v48 = vld [vmem:[%s5719_s29 + $0x2d0] sm:$0xff] }
 0x7e1   : > { %v6652_v2 = vadd.f32 %v2364_v9, %v1842_v46  ;;  %v6656_v33 = vadd.f32 %v2378_v23, %v1843_v56  ;;  %v2430_v46 = vmul.f32 0.5, %v6491_v8  ;;  %v2454_v56 = vmul.f32 0.044715, %v6644_v40  ;;  %3898 = vmatpush.bf16.msrb.mxu3 %v5298_v22  ;;  %v5297_v9 = vld [vmem:[%s5719_s29 + $0x2d8] sm:$0xff] }
 0x7e2   : > { %3885 = vmatpush.bf16.msrb.mxu2 %v5289_v50  ;;  %v2701_v24 = vpack.c.bf16 %v2685_v60, %v2669_v36  ;;  %v5278_v50 = vld [vmem:[%s5719_s29 + $0x240] sm:$0xff]  ;;  %v2549_v51 = vadd.f32 %v2517_v49, %v6577_v59  ;;  %v5317_v23 = vld [vmem:[%s5719_s29 + $0x378] sm:$0xff]  ;;  %v2548_v13 = vadd.f32 %v2516_v7, %v6560_v31  ;;  %v2561_v28 = vadd.f32 %v2529_v35, %v6573_v54  ;;  %v5308_v60 = vld [vmem:[%s5719_s29 + $0x330] sm:$0xff] }
 0x7e3   : > { %3859 = vmatpush.bf16.msrb.mxu0 %v5271_v14  ;;  %v2670_v14 = vmul.f32 %v2638_v16, %v2414_v63  ;;  %v2686_v57 = vmul.f32 %v2654_v0, %v2430_v46  ;;  %v2469_v8 = vmul.f32 0.044715, %v6652_v2  ;;  %v2470_v1 = vmul.f32 0.044715, %v6656_v33 }
 0x7e4   : > { %3873 = vmatpush.bf16.msrb.mxu1 %v5279_v25  ;;  %3805 = vmatmul.bf16.vlgmr.msra.gmra.mxu0 %v2701_v24  ;;  %v5287_v25 = vld [vmem:[%s5719_s29 + $0x288] sm:$0xff]  ;;  %v2562_v39 = vadd.f32 %v2530_v3, %v6591_v20  ;;  %v2532_v62 = vmul.f32 %v2500_v61, %v6618_v29  ;;  %v2486_v11 = vmul.f32 %v2454_v56, %v6644_v40  ;;  %v1845_v49 = vperm.slane %v6488_v15, 7  ;;  %v5286_v3 = vld [vmem:[%s5719_s29 + $0x280] sm:$0xff] }
 0x7e5   : > { %v2702_v22 = vpack.c.bf16 %v2686_v57, %v2670_v14  ;;  %5458 = vtanh.f32 %v6622_v37  ;;  %3899 = vmatpush.bf16.msrb.mxu3 %v5297_v9  ;;  %v2578_v7 = vmul.f32 0.7978846, %v6625_v47  ;;  %v2563_v35 = vadd.f32 %v2531_v38, %v6599_v10  ;;  %v5316_v47 = vld [vmem:[%s5719_s29 + $0x370] sm:$0xff]  ;;  %v5295_v24 = vld [vmem:[%s5719_s29 + $0x2c8] sm:$0xff] }
 0x7e6   : > { %3886 = vmatpush.bf16.msrb.mxu2 %v5288_v41  ;;  %v2581_v34 = vmul.f32 0.7978846, %v2549_v51  ;;  %v2501_v36 = vmul.f32 %v2469_v8, %v6652_v2  ;;  %v6690_v16 = vmul.f32 0.7978846, %v2547_v4  ;;  %v2455_v15 = vmul.f32 0.044715, %v6672_v30 }
 0x7e7   : > { %v2392_v32 = vpop.f32.mrf.mxu2  ;;  %3860 = vmatpush.bf16.msrb.mxu0 %v5270_v19  ;;  %3819 = vmatmul.bf16.vlgmr.msra.gmra.mxu1 %v2702_v22  ;;  %v2502_v37 = vmul.f32 %v2470_v1, %v6656_v33  ;;  %v6698_v63 = vmul.f32 0.7978846, %v2548_v13  ;;  %v2593_v46 = vmul.f32 0.7978846, %v2561_v28  ;;  %v2594_v0 = vmul.f32 0.7978846, %v2562_v39  ;;  %v5457_v19 = vpop.eup %5456 }
 0x7e8   : > { %3874 = vmatpush.bf16.msrb.mxu1 %v5278_v50  ;;  %v6694_v41 = vadd.f32 %v2392_v32, %v1844_v53  ;;  %v2564_v38 = vadd.f32 %v2532_v62, %v6618_v29  ;;  %v2518_v61 = vmul.f32 %v2486_v11, %v6644_v40  ;;  %v6703_v56 = vadd.f32 %v6654_v52, %v1845_v49  ;;  %v2406_v53 = vpop.f32.mrf.mxu3  ;;  %v5307_v14 = vld [vmem:[%s5719_s29 + $0x328] sm:$0xff] }
 0x7e9   : > { %5460 = vtanh.f32 %v6611_v45  ;;  %3900 = vmatpush.bf16.msrb.mxu3 %v5296_v48  ;;  %v2595_v9 = vmul.f32 0.7978846, %v2563_v35  ;;  %v2533_v50 = vmul.f32 %v2501_v36, %v6652_v2  ;;  %v2639_v51 = vadd.f32 1.0, %v5457_v19  ;;  %v5325_v35 = vld [vmem:[%s5719_s29 + $0x3b8] sm:$0xff] }
 0x7ea   : > { %3887 = vmatpush.bf16.msrb.mxu2 %v5287_v25  ;;  %5462 = vtanh.f32 %v2581_v34  ;;  %v2487_v8 = vmul.f32 %v2455_v15, %v6672_v30  ;;  %v2534_v52 = vmul.f32 %v2502_v37, %v6656_v33  ;;  %v2471_v45 = vmul.f32 0.044715, %v6694_v41  ;;  %v5314_v34 = vld [vmem:[%s5719_s29 + $0x360] sm:$0xff] }
 0x7eb   : > { %3909 = vmatpush.bf16.msra.mxu0 %v5309_v17  ;;  %v5459_v57 = vpop.eup %5458  ;;  %5464 = vtanh.f32 %v6629_v12  ;;  %v5315_v17 = vld [vmem:[%s5719_s29 + $0x368] sm:$0xff]  ;;  %v2415_v4 = vmul.f32 0.5, %v6494_v44  ;;  %v2431_v1 = vmul.f32 0.5, %v6509_v43  ;;  %v6716_v25 = vadd.f32 %v2406_v53, %v1845_v49  ;;  %v5294_v12 = vld [vmem:[%s5719_s29 + $0x2c0] sm:$0xff] }
 0x7ec   : > { %3923 = vmatpush.bf16.msra.mxu1 %v5317_v23  ;;  %v2655_v23 = vadd.f32 1.0, %v5459_v57  ;;  %v2596_v13 = vmul.f32 0.7978846, %v2564_v38  ;;  %v2550_v28 = vadd.f32 %v2518_v61, %v6644_v40  ;;  %v2456_v39 = vmul.f32 0.044715, %v6703_v56  ;;  %v5306_v43 = vld [vmem:[%s5719_s29 + $0x320] sm:$0xff] }
 0x7ed   : > { %3901 = vmatpush.bf16.msrb.mxu3 %v5295_v24  ;;  %5466 = vtanh.f32 %v6631_v42  ;;  %v2565_v22 = vadd.f32 %v2533_v50, %v6652_v2  ;;  %v2671_v32 = vmul.f32 %v2639_v51, %v2415_v4  ;;  %v2519_v11 = vmul.f32 %v2487_v8, %v6672_v30  ;;  %v5313_v51 = vld [vmem:[%s5719_s29 + $0x358] sm:$0xff] }
 0x7ee   : > { %3888 = vmatpush.bf16.msrb.mxu2 %v5286_v3  ;;  %v2687_v44 = vmul.f32 %v2655_v23, %v2431_v1  ;;  %5468 = vtanh.f32 %v2593_v46  ;;  %v2566_v49 = vadd.f32 %v2534_v52, %v6656_v33  ;;  %v2503_v48 = vmul.f32 %v2471_v45, %v6694_v41  ;;  %v5333_v1 = vld [vmem:[%s5719_s29 + $0x3f8] sm:$0xff] }
 0x7ef   : > { %3910 = vmatpush.bf16.msra.mxu0 %v5308_v60  ;;  %v5461_v62 = vpop.eup %5460  ;;  %5470 = vtanh.f32 %v2578_v7  ;;  %v2472_v15 = vmul.f32 0.044715, %v6716_v25  ;;  %v6735_v3 = vmul.f32 %v2456_v39, %v6703_v56  ;;  %v2416_v46 = vmul.f32 0.5, %v6502_v21 }
 0x7f0   : > { %3924 = vmatpush.bf16.msra.mxu1 %v5316_v47  ;;  %v6729_v42 = vpop.eup %5462  ;;  %v2703_v36 = vpack.c.bf16 %v2687_v44, %v2671_v32  ;;  %v2640_v60 = vadd.f32 1.0, %v5461_v62  ;;  %5472 = vtanh.f32 %v2594_v0  ;;  %v6732_v47 = vmul.f32 0.7978846, %v2550_v28  ;;  %v5305_v0 = vld [vmem:[%s5719_s29 + $0x318] sm:$0xff] }
 0x7f1   : > { %v5465_v37 = vpop.eup %5464  ;;  %3902 = vmatpush.bf16.msrb.mxu3 %v5294_v12  ;;  %5474 = vtanh.f32 %v6690_v16  ;;  %v2597_v7 = vmul.f32 0.7978846, %v2565_v22  ;;  %v2432_v19 = vmul.f32 0.5, %v6511_v55  ;;  %v6742_v53 = vadd.f32 %v2519_v11, %v6672_v30  ;;  %v5324_v16 = vld [vmem:[%s5719_s29 + $0x3b0] sm:$0xff] }
 0x7f2   : > { %3833 = vmatmul.bf16.vlgmr.msra.gmra.mxu2 %v2703_v36  ;;  %v2656_v38 = vadd.f32 1.0, %v5465_v37  ;;  %5476 = vtanh.f32 %v2595_v9  ;;  %v2598_v24 = vmul.f32 0.7978846, %v2566_v49  ;;  %v2535_v21 = vmul.f32 %v2503_v48, %v6694_v41  ;;  %v5304_v12 = vld [vmem:[%s5719_s29 + $0x310] sm:$0xff] }
 0x7f3   : > { %3911 = vmatpush.bf16.msra.mxu0 %v5307_v14  ;;  %v5467_v61 = vpop.eup %5466  ;;  %v2417_v50 = vmul.f32 0.5, %v6518_v26  ;;  %3937 = vmatpush.bf16.msra.mxu2 %v5325_v35  ;;  %v2672_v55 = vmul.f32 %v2640_v60, %v2416_v46  ;;  %v2504_v57 = vmul.f32 %v2472_v15, %v6716_v25  ;;  %v2433_v45 = vmul.f32 0.5, %v6573_v54  ;;  %v5312_v11 = vld [vmem:[%s5719_s29 + $0x350] sm:$0xff]  ;;  %v5303_v15 = vld [vmem:[%s5719_s29 + $0x308] sm:$0xff] }
 0x7f4   : > { %3925 = vmatpush.bf16.msra.mxu1 %v5315_v17  ;;  %v5469_v14 = vpop.eup %5468  ;;  %v2688_v9 = vmul.f32 %v2656_v38, %v2432_v19  ;;  %v2641_v8 = vadd.f32 1.0, %v5467_v61  ;;  %v2418_v4 = vmul.f32 0.5, %v6530_v18  ;;  %5478 = vtanh.f32 %v6698_v63  ;;  %v5323_v18 = vld [vmem:[%s5719_s29 + $0x3a8] sm:$0xff]  ;;  %v5332_v36 = vld [vmem:[%s5719_s29 + $0x3f0] sm:$0xff]  ;;  %v5322_v38 = vld [vmem:[%s5719_s29 + $0x3a0] sm:$0xff] }
 0x7f5   : > { %v5471_v52 = vpop.eup %5470  ;;  %v2657_v17 = vadd.f32 1.0, %v5469_v14  ;;  %v2434_v28 = vmul.f32 0.5, %v6591_v20  ;;  %5480 = vtanh.f32 %v2596_v13  ;;  %v2567_v32 = vadd.f32 %v2535_v21, %v6694_v41 }
 0x7f6   : > { %v5473_v26 = vpop.eup %5472  ;;  %v2704_v23 = vpack.c.bf16 %v2688_v9, %v2672_v55  ;;  %v2642_v39 = vadd.f32 1.0, %v5471_v52  ;;  %v2673_v54 = vmul.f32 %v2641_v8, %v2417_v50  ;;  %5482 = vtanh.f32 %v2597_v7  ;;  %v5331_v50 = vld [vmem:[%s5719_s29 + $0x3e8] sm:$0xff] }
 0x7f7   : > { %3912 = vmatpush.bf16.msra.mxu0 %v5306_v43  ;;  %v5475_v22 = vpop.eup %5474  ;;  %v2689_v44 = vmul.f32 %v2657_v17, %v2433_v45  ;;  %v2658_v43 = vadd.f32 1.0, %v5473_v26  ;;  %3938 = vmatpush.bf16.msra.mxu2 %v5324_v16  ;;  %v2536_v20 = vmul.f32 %v2504_v57, %v6716_v25  ;;  %v2435_v13 = vmul.f32 0.5, %v6599_v10  ;;  %v5310_v45 = vld [vmem:[%s5719_s29 + $0x340] sm:$0xff] }
 0x7f8   : > { %3926 = vmatpush.bf16.msra.mxu1 %v5314_v34  ;;  %v5477_v63 = vpop.eup %5476  ;;  %3847 = vmatmul.bf16.vlgmr.msra.gmra.mxu3 %v2704_v23  ;;  %v2643_v62 = vadd.f32 1.0, %v5475_v22  ;;  %v2674_v48 = vmul.f32 %v2642_v39, %v2418_v4  ;;  %5484 = vtanh.f32 %v2598_v24  ;;  %v2419_v60 = vmul.f32 0.5, %v6556_v58  ;;  %v5311_v58 = vld [vmem:[%s5719_s29 + $0x348] sm:$0xff] }
 0x7f9   : > { %v2705_v49 = vpack.c.bf16 %v2689_v44, %v2673_v54  ;;  %v2690_v35 = vmul.f32 %v2658_v43, %v2434_v28  ;;  %3951 = vmatpush.bf16.msra.mxu3 %v5333_v1  ;;  %v2659_v34 = vadd.f32 1.0, %v5477_v63  ;;  %v2520_v46 = vmul.f32 %v6735_v3, %v6703_v56 }
 0x7fa   : > { %v5479_v37 = vpop.eup %5478  ;;  %v2599_v10 = vmul.f32 0.7978846, %v2567_v32  ;;  %5486 = vtanh.f32 %v6732_v47  ;;  %v2675_v61 = vmul.f32 %v2643_v62, %v2419_v60  ;;  %v2583_v24 = vmul.f32 0.7978846, %v6742_v53  ;;  %v5302_v47 = vld [vmem:[%s5719_s29 + $0x300] sm:$0xff]  ;;  %v5321_v53 = vld [vmem:[%s5719_s29 + $0x398] sm:$0xff] }
 0x7fb   : > { %3913 = vmatpush.bf16.msra.mxu0 %v5305_v0  ;;  %v2706_v7 = vpack.c.bf16 %v2690_v35, %v2674_v48  ;;  %v2691_v19 = vmul.f32 %v2659_v34, %v2435_v13  ;;  %3939 = vmatpush.bf16.msra.mxu2 %v5323_v18  ;;  %v5481_v0 = vpop.eup %5480  ;;  %v2568_v21 = vadd.f32 %v2536_v20, %v6716_v25  ;;  %v2436_v14 = vmul.f32 0.5, %v6618_v29  ;;  %v5330_v29 = vld [vmem:[%s5719_s29 + $0x3e0] sm:$0xff]  ;;  %v5329_v18 = vld [vmem:[%s5719_s29 + $0x3d8] sm:$0xff]  ;;  %v5319_v20 = vld [vmem:[%s5719_s29 + $0x388] sm:$0xff] }
 0x7fc   : > { %3927 = vmatpush.bf16.msra.mxu1 %v5313_v51  ;;  %3861 = vmatmul.bf16.vlgmr.msrb.gmra.mxu0 %v2705_v49  ;;  %v2660_v3 = vadd.f32 1.0, %v5481_v0  ;;  %v5483_v16 = vpop.eup %5482  ;;  %v2644_v55 = vadd.f32 1.0, %v5479_v37  ;;  %v2552_v9 = vadd.f32 %v2520_v46, %v6703_v56  ;;  %5488 = vtanh.f32 %v2599_v10  ;;  %v5327_v46 = vld [vmem:[%s5719_s29 + $0x3c8] sm:$0xff]  ;;  %v5326_v0 = vld [vmem:[%s5719_s29 + $0x3c0] sm:$0xff] }
 0x7fd   : > { %3875 = vmatmul.bf16.vlgmr.msrb.gmra.mxu1 %v2706_v7  ;;  %3952 = vmatpush.bf16.msra.mxu3 %v5332_v36  ;;  %v2707_v51 = vpack.c.bf16 %v2691_v19, %v2675_v61  ;;  %v2420_v8 = vmul.f32 0.5, %v6560_v31  ;;  %5490 = vtanh.f32 %v2583_v24  ;;  %v2661_v17 = vadd.f32 1.0, %v5483_v16  ;;  %v5318_v36 = vld [vmem:[%s5719_s29 + $0x380] sm:$0xff] }
 0x7fe   : > { %v5485_v57 = vpop.eup %5484  ;;  %v2692_v52 = vmul.f32 %v2660_v3, %v2436_v14  ;;  %v2600_v4 = vmul.f32 0.7978846, %v2568_v21  ;;  %v2645_v23 = vadd.f32 1.0, %v6729_v42  ;;  %v2584_v28 = vmul.f32 0.7978846, %v2552_v9 }
 0x7ff   : > { %3914 = vmatpush.bf16.msra.mxu0 %v5304_v12  ;;  %3940 = vmatpush.bf16.msra.mxu2 %v5322_v38  ;;  %v2676_v26 = vmul.f32 %v2644_v55, %v2420_v8  ;;  %v2437_v39 = vmul.f32 0.5, %v6652_v2  ;;  %v2662_v31 = vadd.f32 1.0, %v5485_v57  ;;  %v5320_v12 = vld [vmem:[%s5719_s29 + $0x390] sm:$0xff]  ;;  %v2421_v22 = vmul.f32 0.5, %v6577_v59 }
 0x800   : > { %3928 = vmatpush.bf16.msra.mxu1 %v5312_v11  ;;  %v5487_v1 = vpop.eup %5486  ;;  %v2438_v43 = vmul.f32 0.5, %v6656_v33  ;;  %5492 = vtanh.f32 %v2600_v4  ;;  %v2422_v2 = vmul.f32 0.5, %v6644_v40  ;;  %v5328_v11 = vld [vmem:[%s5719_s29 + $0x3d0] sm:$0xff]  ;;  %v2439_v35 = vmul.f32 0.5, %v6694_v41 }
 0x801   : > { %3953 = vmatpush.bf16.msra.mxu3 %v5331_v50  ;;  %v2708_v32 = vpack.c.bf16 %v2692_v52, %v2676_v26  ;;  %v2646_v44 = vadd.f32 1.0, %v5487_v1  ;;  %v2693_v42 = vmul.f32 %v2661_v17, %v2437_v39  ;;  %5494 = vtanh.f32 %v2584_v28 }
 0x802   : > { %3889 = vmatmul.bf16.vlgmr.msrb.gmra.mxu2 %v2707_v51  ;;  %v5489_v54 = vpop.eup %5488  ;;  %v2677_v13 = vmul.f32 %v2645_v23, %v2421_v22  ;;  %v2694_v59 = vmul.f32 %v2662_v31, %v2438_v43  ;;  %v2423_v60 = vmul.f32 0.5, %v6672_v30  ;;  %v2440_v38 = vmul.f32 0.5, %v6716_v25  ;;  %v5359_v25 = vld [vmem:[%s825_s7] ss:$0 sm:$0xff] }
 0x803   : > { %3915 = vmatpush.bf16.msra.mxu0 %v5303_v15  ;;  %3941 = vmatpush.bf16.msra.mxu2 %v5321_v53  ;;  %v5491_v63 = vpop.eup %5490  ;;  %v2663_v62 = vadd.f32 1.0, %v5489_v54  ;;  %v2678_v33 = vmul.f32 %v2646_v44, %v2422_v2  ;;  %v2424_v61 = vmul.f32 0.5, %v6703_v56 }
 0x804   : > { %3929 = vmatpush.bf16.msra.mxu1 %v5311_v58  ;;  %v2709_v49 = vpack.c.bf16 %v2693_v42, %v2677_v13  ;;  %v2647_v48 = vadd.f32 1.0, %v5491_v63 }
 0x805   : > { %3954 = vmatpush.bf16.msra.mxu3 %v5330_v29  ;;  %v2710_v40 = vpack.c.bf16 %v2694_v59, %v2678_v33  ;;  %v2695_v15 = vmul.f32 %v2663_v62, %v2439_v35 }
 0x806   : > { %v5493_v34 = vpop.eup %5492  ;;  %v2679_v7 = vmul.f32 %v2647_v48, %v2423_v60 }
 0x807   : > { %3916 = vmatpush.bf16.msra.mxu0 %v5302_v47  ;;  %3942 = vmatpush.bf16.msra.mxu2 %v5320_v12  ;;  %v5495_v37 = vpop.eup %5494  ;;  %v2664_v10 = vadd.f32 1.0, %v5493_v34 }
 0x808   : > { %3930 = vmatpush.bf16.msra.mxu1 %v5310_v45  ;;  %3903 = vmatmul.bf16.vlgmr.msrb.gmra.mxu3 %v2708_v32  ;;  %v2648_v19 = vadd.f32 1.0, %v5495_v37  ;;  %v2711_v41 = vpack.c.bf16 %v2695_v15, %v2679_v7 }
 0x809   : > { %3955 = vmatpush.bf16.msra.mxu3 %v5329_v18  ;;  %v2696_v58 = vmul.f32 %v2664_v10, %v2440_v38 }
 0x80a   : > { %v2680_v30 = vmul.f32 %v2648_v19, %v2424_v61 }
 0x80b   : > { %3943 = vmatpush.bf16.msra.mxu2 %v5319_v20 }
 0x80c   : > { %3917 = vmatmul.bf16.vlgmr.msra.gmra.mxu0 %v2709_v49  ;;  %v2712_v24 = vpack.c.bf16 %v2696_v58, %v2680_v30 }
 0x80d   : > { %3956 = vmatpush.bf16.msra.mxu3 %v5328_v11  ;;  %3931 = vmatmul.bf16.vlgmr.msra.gmra.mxu1 %v2710_v40 }
 0x80f   : > { %3944 = vmatpush.bf16.msra.mxu2 %v5318_v36 }
 0x811   : > { %3957 = vmatpush.bf16.msra.mxu3 %v5327_v46 }
 0x812   : > { %3945 = vmatmul.bf16.vlgmr.msra.gmra.mxu2 %v2711_v41 }
 0x815   : > { %3958 = vmatpush.bf16.msra.mxu3 %v5326_v0 }
 0x818   : > { %3959 = vmatmul.bf16.vlgmr.msra.gmra.mxu3 %v2712_v24 }
 0x847   : > { %v3750_v21 = vpop.f32.mrf.mxu0 }
 0x848   : > { %v3764_v3 = vpop.f32.mrf.mxu1  ;;  %v3751_v47 = vadd.f32 %v5359_v25, %v3750_v21 }
 0x84a   : > { %v3765_v53 = vadd.f32 %v3764_v3, %v3751_v47 }
 0x84f   : > { %v3752_v50 = vpop.f32.mrf.mxu0 }
 0x850   : > { %v3766_v51 = vpop.f32.mrf.mxu1  ;;  %v3753_v45 = vadd.f32 %v5359_v25, %v3752_v50 }
 0x852   : > { %v3767_v29 = vadd.f32 %v3766_v51, %v3753_v45 }
 0x854   : > { %v3778_v16 = vpop.f32.mrf.mxu2 }
 0x855   : > { %v3779_v57 = vadd.f32 %v3778_v16, %v3765_v53 }
 0x857   : > { %v3792_v14 = vpop.f32.mrf.mxu3 }
 0x858   : > { %v3793_v17 = vadd.f32 %v3792_v14, %v3779_v57 }
 0x85c   : > { %v3780_v56 = vpop.f32.mrf.mxu2 }
 0x85d   : > { %v3781_v23 = vadd.f32 %v3780_v56, %v3767_v29 }
 0x85f   : > { %v3794_v8 = vpop.f32.mrf.mxu3 }
 0x860   : > { %v3795_v12 = vadd.f32 %v3794_v8, %v3781_v23 }
 0x861   : > { %v3806_v55 = vpop.f32.mrf.mxu0 }
 0x862   : > { %v3807_v26 = vadd.f32 %v3806_v55, %v3793_v17 }
 0x864   : > { %v3820_v9 = vpop.f32.mrf.mxu1 }
 0x865   : > { %v3821_v31 = vadd.f32 %v3820_v9, %v3807_v26 }
 0x869   : > { %v3808_v52 = vpop.f32.mrf.mxu0 }
 0x86a   : > { %v3809_v54 = vadd.f32 %v3808_v52, %v3795_v12 }
 0x86c   : > { %v3822_v1 = vpop.f32.mrf.mxu1 }
 0x86d   : > { %v3823_v42 = vadd.f32 %v3822_v1, %v3809_v54 }
 0x875   : > { %v3834_v4 = vpop.f32.mrf.mxu2 }
 0x876   : > { %v3835_v32 = vadd.f32 %v3834_v4, %v3821_v31 }
 0x879   : > { %v3862_v39 = vpop.f32.mrf.mxu0 }
 0x87a   : > { %v3876_v44 = vpop.f32.mrf.mxu1 }
 0x87b   : > { %v3848_v28 = vpop.f32.mrf.mxu3 }
 0x87c   : > { %v3849_v43 = vadd.f32 %v3848_v28, %v3835_v32 }
 0x87d   : > { %v3836_v22 = vpop.f32.mrf.mxu2 }
 0x87e   : > { %v3863_v20 = vadd.f32 %v3862_v39, %v3849_v43  ;;  %v3837_v13 = vadd.f32 %v3836_v22, %v3823_v42  ;;  %v5360_v43 = vld [vmem:[%s828_s3] ss:$0 sm:$0xff]  ;;  %s5541_s3 = smov [#allocation3]  }
 0x87f   : > { %s4032_s30 = sshll.u32 %s5541_s3, 4  ;;  %s4033_s30 = int_to_ptr.vmem [resolvable:$true] %s4032_s30 }
 0x880   : > { %v3877_v59 = vadd.f32 %v3876_v44, %v3863_v20 }
 0x881   : > { %v3864_v63 = vpop.f32.mrf.mxu0 }
 0x882   : > { %v3878_v11 = vpop.f32.mrf.mxu1 }
 0x883   : > { %v3850_v18 = vpop.f32.mrf.mxu3 }
 0x884   : > { %v3851_v62 = vadd.f32 %v3850_v18, %v3837_v13 }
 0x885   : > { %v3890_v2 = vpop.f32.mrf.mxu2 }
 0x886   : > { %v3891_v33 = vadd.f32 %v3890_v2, %v3877_v59  ;;  %v3865_v34 = vadd.f32 %v3864_v63, %v3851_v62  ;;  %v5361_v63 = vld [vmem:[%s831_s21] ss:$0 sm:$0xff]  ;;  %s6894_s21 = sld [smem:[#allocation20_spill]] }
 0x888   : > { %v3879_v36 = vadd.f32 %v3878_v11, %v3865_v34 }
 0x889   : > { %v3918_v35 = vpop.f32.mrf.mxu0 }
 0x88a   : > { %v3932_v37 = vpop.f32.mrf.mxu1 }
 0x88b   : > { %v3904_v49 = vpop.f32.mrf.mxu3 }
 0x88c   : > { %v3905_v40 = vadd.f32 %v3904_v49, %v3891_v33  ;;  %s4034_s1 = sshll.u32 %s6894_s21, 4  ;;  %s4035_s1 = int_to_ptr.hbm [resolvable:$true] %s4034_s1 }
 0x88d   : > { %v3892_v48 = vpop.f32.mrf.mxu2 }
 0x88e   : > { %v3919_v60 = vadd.f32 %v3918_v35, %v3905_v40  ;;  %v3893_v46 = vadd.f32 %v3892_v48, %v3879_v36 }
 0x890   : > { %v3933_v7 = vadd.f32 %v3932_v37, %v3919_v60 }
 0x891   : > { %v3920_v19 = vpop.f32.mrf.mxu0 }
 0x892   : > { %v3934_v30 = vpop.f32.mrf.mxu1 }
 0x893   : > { %v3906_v15 = vpop.f32.mrf.mxu3 }
 0x894   : > { %v3907_v38 = vadd.f32 %v3906_v15, %v3893_v46 }
 0x895   : > { %v3946_v10 = vpop.f32.mrf.mxu2 }
 0x896   : > { %v3947_v41 = vadd.f32 %v3946_v10, %v3933_v7  ;;  %v3921_v0 = vadd.f32 %v3920_v19, %v3907_v38 }
 0x898   : > { %v3935_v21 = vadd.f32 %v3934_v30, %v3921_v0 }
 0x89b   : > { %v3960_v61 = vpop.f32.mrf.mxu3 }
 0x89c   : > { %v3961_v58 = vadd.f32 %v3960_v61, %v3947_v41 }
 0x89d   : > { %v3948_v24 = vpop.f32.mrf.mxu2 }
 0x89e   : > { %v3965_v3 = vadd.f32 %v3961_v58, %v6263_v5  ;;  %v3949_v50 = vadd.f32 %v3948_v24, %v3935_v21 }
 0x8a0   : > { %v3969_v16 = vsel %vm891_vm1, %v3965_v3, 0.0 }
 0x8a1   : > { %3970 = vadd.xlane.f32.xlu2 %v3969_v16 }
 0x8a3   : > { %v3962_v51 = vpop.f32.mrf.mxu3 }
 0x8a4   : > { %v3963_v25 = vadd.f32 %v3962_v51, %v3949_v50 }
 0x8a6   : > { %v3966_v14 = vadd.f32 %v3963_v25, %v6265_v27 }
 0x8a8   : > { %v3972_v55 = vsel %vm891_vm1, %v3966_v14, 0.0 }
 0x8a9   : > { %3973 = vadd.xlane.f32.xlu1 %v3972_v55 }
 0x914   : > { %v3971_v47 = vpop.xlane.xlu2 %3970 }
 0x915   : > { %v3975_v56 = vmul.f32 %v3971_v47, %v6161_v6 }
 0x917   : > { %v3977_v9 = vsub.f32 %v3965_v3, %v3975_v56 }
 0x919   : > { %v3979_v53 = vmul.f32 %v3977_v9, %v3977_v9 }
 0x91b   : > { %v3981_v57 = vsel %vm891_vm1, %v3979_v53, 0.0 }
 0x91c   : > { %v3974_v8 = vpop.xlane.xlu1 %3973  ;;  %3982 = vadd.xlane.f32.xlu2 %v3981_v57 }
 0x91d   : > { %v3976_v5 = vmul.f32 %v3974_v8, %v6161_v6 }
 0x91f   : > { %v3978_v52 = vsub.f32 %v3966_v14, %v3976_v5 }
 0x921   : > { %v3980_v45 = vmul.f32 %v3978_v52, %v3978_v52 }
 0x923   : > { %v3984_v17 = vsel %vm891_vm1, %v3980_v45, 0.0 }
 0x924   : > { %3985 = vadd.xlane.f32.xlu1 %v3984_v17 }
 0x98f   : > { %v3983_v27 = vpop.xlane.xlu2 %3982 }
 0x990   : > { %v3987_v4 = vmul.f32 %v3983_v27, %v6161_v6 }
 0x992   : > { %v3989_v29 = vadd.f32 1e-12, %v3987_v4 }
 0x994   : > { %5496 = vrsqrt.f32 %v3989_v29  ;;  %vm3997_vm11 = vweird.f32 %v3989_v29 }
 0x997   : > { %v3986_v1 = vpop.xlane.xlu1 %3985 }
 0x998   : > { %v3988_v26 = vmul.f32 %v3986_v1, %v6161_v6 }
 0x99a   : > { %v5497_v23 = vpop.eup %5496  ;;  %v3990_v28 = vadd.f32 1e-12, %v3988_v26 }
 0x99b   : > { %v3992_v39 = vmul.f32 %v5497_v23, %v3989_v29  ;;  %vm3998_vm10 = vweird.f32 %v5497_v23 }
 0x99c   : > { %5498 = vrsqrt.f32 %v3990_v28  ;;  %vm3999_vm12 = vmor %vm3997_vm11, %vm3998_vm10  ;;  %vm4007_vm14 = vweird.f32 %v3990_v28 }
 0x99d   : > { %v3993_v31 = vmul.f32 %v5497_v23, %v3992_v39 }
 0x99f   : > { %v3994_v12 = vmul.f32 0.5, %v3993_v31 }
 0x9a1   : > { %v3995_v22 = vsub.f32 1.5, %v3994_v12 }
 0x9a2   : > { %v5499_v32 = vpop.eup %5498 }
 0x9a3   : > { %v3996_v54 = vmul.f32 %v5497_v23, %v3995_v22  ;;  %v4002_v44 = vmul.f32 %v5499_v32, %v3990_v28  ;;  %vm4008_vm13 = vweird.f32 %v5499_v32 }
 0x9a4   : > { %vm4009_vm15 = vmor %vm4007_vm14, %vm4008_vm13 }
 0x9a5   : > { %v4000_v6 = vsel %vm3999_vm12, %v5497_v23, %v3996_v54  ;;  %v4003_v18 = vmul.f32 %v5499_v32, %v4002_v44 }
 0x9a6   : > { %v4011_v42 = vmul.f32 %v4000_v6, %v3977_v9 }
 0x9a7   : > { %v4004_v2 = vmul.f32 0.5, %v4003_v18 }
 0x9a8   : > { %v4016_v20 = vmul.f32 %v5360_v43, %v4011_v42 }
 0x9a9   : > { %v4005_v13 = vsub.f32 1.5, %v4004_v2 }
 0x9aa   : > { %v4021_v59 = vadd.f32 %v5361_v63, %v4016_v20 }
 0x9ab   : > { %v4006_v62 = vmul.f32 %v5499_v32, %v4005_v13 }
 0x9ac   : > { %4023 = vst.msk [vmem:[#allocation2] sm:$0xff] %vm891_vm1, %v4021_v59 }
 0x9ad   : > { %v4010_v11 = vsel %vm4009_vm15, %v5499_v32, %v4006_v62  ;;  %4025 = vst.msk [vmem:[#allocation3] sm:$0xff] %vm891_vm1, %v4021_v59 }
 0x9ae   : > { %v4012_v49 = vmul.f32 %v4010_v11, %v3978_v52 }
 0x9b0   : > { %v4017_v33 = vmul.f32 %v5360_v43, %v4012_v49 }
 0x9b2   : > { %v4022_v48 = vadd.f32 %v5361_v63, %v4017_v33 }
 0x9b4   : > { %4024 = vst.msk [vmem:[#allocation2 + $0x8] sm:$0xff] %vm891_vm1, %v4022_v48 }
 0x9b5   : > { %4026 = vst.msk [vmem:[#allocation3 + $0x8] sm:$0xff] %vm891_vm1, %v4022_v48 }
 0x9b6   : > { %5335 = dma.vmem_to_hbm [thread:$0]  (%p5338_p5), %s4033_s30, 256, %s4035_s1, [#allocation4], %s5542_s23, %s5542_s23, %s5543_s24  }
 0x9b7   : > { %5533 = dma.done.wait (%p5338_p5), [#allocation4], 256  }
 0x9b8   : > { %5535 = vsyncadd (%p5338_p5), [#allocation4], 4294967040 }
 0x9b9 PF: > { %s6895_s2 = sld [smem:[#allocation6_spill]] }
 0x9bf   : > { %s30_s0 = sadd.s32 1, %s6895_s2  }
 0x9c0   : > { %p27_p6 = scmp.ge.s32.totalorder %s30_s0, 8  }
 0x9c2   :  { %29 = sbr.rel (!%p27_p6) target bundleno = 14 (0xe), region = 172 }
 0x9c7   :  { %4051 = vsyncpa [#allocation4], 1 }
 0x9c8   :  { %4053 = vsyncpa [#allocation4 + $0x1], 1 }

</bundles_post_ra>
